<compile_context>
chip_gen: v7x
topology: tpu7x:2x2x1
jax: 0.10.0
libtpu: 0.0.40
codegen_flags: <defaults>
</compile_context>

<pallas_src>
import jax
import jax.numpy as jnp
from jax import lax
from jax.experimental import pallas as pl
from jax.experimental.pallas import tpu as pltpu

# ---------------- model hyperparameters (from the PyTorch script) ------------
INPUT_DIM = 2      # ['DateSeconds', 'DayOfWeek']
HIDDEN_DIM = 128
NUM_LAYERS = 3
OUTPUT_DIM = 1
BN_EPS = 1e-5

# small example shapes (batch = 2 tiles of 8 rows so the parallel grid is real)
BATCH = 16
SEQ = 8
BATCH_TILE = 8     # raise toward 128 (v5e) / 256 (v6e/v7x) on real batches


# ------------------------- kernel 1: 3-layer GRU ------------------------------
def gru_seq_kernel(x0_ref, x1_ref,
                   w_ih0_ref, w_hh0_ref, b_ih0_ref, b_hh0_ref,
                   w_ih1_ref, w_hh1_ref, b_ih1_ref, b_hh1_ref,
                   w_ih2_ref, w_hh2_ref, b_ih2_ref, b_hh2_ref,
                   h_last_ref,
                   gx_ref, seq_ref):
    # x0_ref / x1_ref: (T, Bt, 1) time-major feature columns of one batch tile.
    T, B, _ = x0_ref.shape
    H = w_hh0_ref.shape[0]
    H2 = 2 * H
    H3 = 3 * H

    # (1, 3H) mask selecting the r|z columns — used to fold b_hh[:, :2H] into
    # the precomputed input projection (off the serial recurrence).
    rz_mask = (lax.broadcasted_iota(jnp.int32, (1, H3), 1) < H2).astype(jnp.float32)

    def recurrence(w_hh_ref, b_hh_ref):
        """GRU time recurrence for one layer.

        Assumes gx_ref holds  X @ W_ih + b_ih + [b_hr|b_hz|0]   (shape (T,B,3H)).
        Writes per-step hidden states (bf16) into seq_ref, returns h_T (f32).
        """
        # hoist the n-gate hidden bias broadcast out of the unrolled loop
        bhn = jnp.broadcast_to(b_hh_ref[:, H2:], (B, H))        # (B, H) f32

        def step(t, h):
            gx_t = gx_ref[t]                                     # (B, 3H) f32
            # W_hh is re-read from VMEM each step (vld slots are idle on this
            # latency-bound chain) to keep vreg pressure low across the unroll.
            gh = jnp.dot(h.astype(jnp.bfloat16), w_hh_ref[...],
                         preferred_element_type=jnp.float32)     # (B, 3H) f32
            # fused r|z sigmoid over the contiguous 2H slice (one EUP chain)
            rz = jax.nn.sigmoid(gx_t[:, :H2] + gh[:, :H2])
            r = rz[:, :H]
            z = rz[:, H:H2]
            # PyTorch: n = tanh(W_in x + b_in + r*(W_hn h + b_hn))
            n = jnp.tanh(gx_t[:, H2:] + r * (gh[:, H2:] + bhn))
            h = n + z * (h - n)                                  # == (1-z)*n + z*h
            seq_ref[t] = h.astype(jnp.bfloat16)
            return h

        return lax.fori_loop(0, T, step, jnp.zeros((B, H), jnp.float32),
                             unroll=True)

    # ---- layer 0: K=2 input projection on the VPU (no degenerate MXU pass) --
    w0 = w_ih0_ref[...]                                          # (2, 3H) f32
    bias0 = b_ih0_ref[...] + b_hh0_ref[...] * rz_mask            # (1, 3H)
    gx_ref[...] = (x0_ref[...] * w0[0:1, :]
                   + x1_ref[...] * w0[1:2, :]
                   + bias0)                                      # (T, B, 3H)
    recurrence(w_hh0_ref, b_hh0_ref)

    # ---- layers 1, 2: hoisted (T*B, H) @ (H, 3H) bf16 input projection ------
    h_last = None
    for (w_ih_ref, b_ih_ref, w_hh_ref, b_hh_ref) in (
            (w_ih1_ref, b_ih1_ref, w_hh1_ref, b_hh1_ref),
            (w_ih2_ref, b_ih2_ref, w_hh2_ref, b_hh2_ref)):
        prev = seq_ref[...].reshape(T * B, H)                    # bf16 already
        bias = b_ih_ref[...] + b_hh_ref[...] * rz_mask           # (1, 3H)
        gx = jnp.dot(prev, w_ih_ref[...],
                     preferred_element_type=jnp.float32) + bias
        gx_ref[...] = gx.reshape(T, B, H3)
        h_last = recurrence(w_hh_ref, b_hh_ref)

    h_last_ref[...] = h_last                                     # out[:, -1, :]


# -------------------- kernel 2: BatchNorm1d + Linear head --------------------
def bn_fc_kernel(h_ref, gamma_ref, beta_ref, fc_w_ref, fc_b_ref, out_ref):
    # h_ref: (B, H) f32 — last-timestep hidden state of the full batch.
    h = h_ref[...]
    # training-mode batch statistics (biased variance), eps = 1e-5
    mean = jnp.mean(h, axis=0, keepdims=True)                    # (1, H)
    var = jnp.mean((h - mean) ** 2, axis=0, keepdims=True)
    xhat = (h - mean) * lax.rsqrt(var + BN_EPS)
    bn = xhat * gamma_ref[...] + beta_ref[...]                   # (B, H)
    # final Linear (H -> 1): VPU multiply + lane reduction (no N=1 MXU matmul)
    out_ref[...] = (jnp.sum(bn * fc_w_ref[...], axis=-1, keepdims=True)
                    + fc_b_ref[...])


# ---------------------------------- wrapper -----------------------------------
def gru_network_forward(x, params, batch_tile=None):
    """x: (B, T, INPUT_DIM) f32. Returns (B, OUTPUT_DIM) f32."""
    B, T, _ = x.shape
    H = HIDDEN_DIM
    H3 = 3 * H
    if batch_tile is None:
        batch_tile = min(B, 128)
    assert B % batch_tile == 0, (B, batch_tile)
    num_tiles = B // batch_tile

    # time-major layout; split the two input features so the layer-0 projection
    # is pure VPU FMAs (no per-timestep strided slicing).
    xT = jnp.transpose(x, (1, 0, 2))                             # (T, B, 2)
    x0 = xT[:, :, 0:1]
    x1 = xT[:, :, 1:2]

    def rep(shape):  # weight / bias spec: same block at every grid point
        return pl.BlockSpec(shape, lambda i: (0,) * len(shape))

    gru_in_specs = [
        pl.BlockSpec((T, batch_tile, 1), lambda i: (0, i, 0)),   # x0
        pl.BlockSpec((T, batch_tile, 1), lambda i: (0, i, 0)),   # x1
        rep((INPUT_DIM, H3)), rep((H, H3)), rep((1, H3)), rep((1, H3)),  # layer 0
        rep((H, H3)),         rep((H, H3)), rep((1, H3)), rep((1, H3)),  # layer 1
        rep((H, H3)),         rep((H, H3)), rep((1, H3)), rep((1, H3)),  # layer 2
    ]

    h_last = pl.pallas_call(
        gru_seq_kernel,
        out_shape=jax.ShapeDtypeStruct((B, H), jnp.float32),
        grid=(num_tiles,),
        in_specs=gru_in_specs,
        out_specs=pl.BlockSpec((batch_tile, H), lambda i: (i, 0)),
        scratch_shapes=[
            pltpu.VMEM((T, batch_tile, H3), jnp.float32),        # gx_ref
            pltpu.VMEM((T, batch_tile, H), jnp.bfloat16),        # seq_ref (bf16)
        ],
        compiler_params=pltpu.CompilerParams(
            dimension_semantics=("parallel",)),                  # v7x: 2 TCs
    )(x0, x1,
      params['w_ih0'], params['w_hh0'], params['b_ih0'], params['b_hh0'],
      params['w_ih1'], params['w_hh1'], params['b_ih1'], params['b_hh1'],
      params['w_ih2'], params['w_hh2'], params['b_ih2'], params['b_hh2'])

    # BatchNorm needs full-batch statistics -> separate, un-gridded tiny call.
    vmem = pl.BlockSpec(memory_space=pltpu.MemorySpace.VMEM)
    return pl.pallas_call(
        bn_fc_kernel,
        out_shape=jax.ShapeDtypeStruct((B, OUTPUT_DIM), jnp.float32),
        in_specs=[vmem] * 5,
        out_specs=vmem,
    )(h_last, params['gamma'], params['beta'], params['fc_w'], params['fc_b'])


# --------------------------- deterministic params ----------------------------
def init_params(key):
    k = 1.0 / jnp.sqrt(jnp.float32(HIDDEN_DIM))
    keys = jax.random.split(key, 32)
    ki = iter(keys)

    def u(shape):
        return jax.random.uniform(next(ki), shape, jnp.float32, -k, k)

    params = {}
    in_dims = [INPUT_DIM, HIDDEN_DIM, HIDDEN_DIM]
    for layer in range(NUM_LAYERS):
        d_in = in_dims[layer]
        w_ih = u((d_in, 3 * HIDDEN_DIM))       # stored transposed: (in, 3H), r|z|n
        w_hh = u((HIDDEN_DIM, 3 * HIDDEN_DIM))
        # MXU-bound weights stored bf16; layer-0 w_ih stays f32 (VPU path).
        params[f'w_ih{layer}'] = w_ih if layer == 0 else w_ih.astype(jnp.bfloat16)
        params[f'w_hh{layer}'] = w_hh.astype(jnp.bfloat16)
        params[f'b_ih{layer}'] = u((1, 3 * HIDDEN_DIM))
        params[f'b_hh{layer}'] = u((1, 3 * HIDDEN_DIM))
    params['gamma'] = jnp.ones((1, HIDDEN_DIM), jnp.float32)
    params['beta'] = jnp.zeros((1, HIDDEN_DIM), jnp.float32)
    params['fc_w'] = u((1, HIDDEN_DIM))        # PyTorch fc.weight layout (out, in)
    params['fc_b'] = u((1, OUTPUT_DIM))
    return params


# ------------------------------ pure-JAX reference ---------------------------
def reference_forward(x, params):
    """Mirrors the kernel's math (bf16 at the MXU boundary, f32 elsewhere)."""
    B, T, _ = x.shape
    H = HIDDEN_DIM

    def fold_bias(b_ih, b_hh):
        return b_ih + jnp.concatenate(
            [b_hh[:, :2 * H], jnp.zeros((1, H), jnp.float32)], axis=1)

    def layer(gx_all, w_hh, b_hh):
        # gx_all already includes b_ih + [b_hr|b_hz|0]
        bhn = b_hh[:, 2 * H:]
        h = jnp.zeros((B, H), jnp.float32)
        outs = []
        for t in range(T):
            gx = gx_all[:, t, :]
            gh = jnp.dot(h.astype(jnp.bfloat16), w_hh,
                         preferred_element_type=jnp.float32)
            rz = jax.nn.sigmoid(gx[:, :2 * H] + gh[:, :2 * H])
            r, z = rz[:, :H], rz[:, H:]
            n = jnp.tanh(gx[:, 2 * H:] + r * (gh[:, 2 * H:] + bhn))
            h = n + z * (h - n)
            outs.append(h)
        return jnp.stack(outs, axis=1)         # (B, T, H)

    w0 = params['w_ih0']
    gx0 = (x[:, :, 0:1] * w0[0:1, :] + x[:, :, 1:2] * w0[1:2, :]
           + fold_bias(params['b_ih0'], params['b_hh0']))        # (B, T, 3H)
    seq = layer(gx0, params['w_hh0'], params['b_hh0'])
    for l in (1, 2):
        gx = (jnp.dot(seq.reshape(B * T, H).astype(jnp.bfloat16),
                      params[f'w_ih{l}'],
                      preferred_element_type=jnp.float32)
              + fold_bias(params[f'b_ih{l}'], params[f'b_hh{l}'])
              ).reshape(B, T, 3 * H)
        seq = layer(gx, params[f'w_hh{l}'], params[f'b_hh{l}'])

    last = seq[:, -1, :]
    mean = jnp.mean(last, axis=0, keepdims=True)
    var = jnp.mean((last - mean) ** 2, axis=0, keepdims=True)
    bn = ((last - mean) * lax.rsqrt(var + BN_EPS)
          * params['gamma'] + params['beta'])
    return jnp.sum(bn * params['fc_w'], axis=-1, keepdims=True) + params['fc_b']


# ------------------------------------ main ------------------------------------
if __name__ == "__main__":
    key = jax.random.PRNGKey(0)
    k_x, k_p = jax.random.split(key)
    x = jax.random.normal(k_x, (BATCH, SEQ, INPUT_DIM), jnp.float32)
    params = init_params(k_p)

    out = jax.block_until_ready(gru_network_forward(x, params, batch_tile=BATCH_TILE))
    assert out.shape == (BATCH, OUTPUT_DIM), out.shape

    ref = jax.block_until_ready(reference_forward(x, params))
    if not jnp.allclose(out, ref, rtol=2e-3, atol=2e-3):
        raise AssertionError(f"mismatch:\nkernel={out}\nref={ref}")

    # TODO(synk): BatchNorm1d running_mean/running_var tracking (a train-mode
    # side effect with no contribution to the forward output) is not modeled.
    print("KERNEL_OK")
</pallas_src>

<mosaic_0001>
module attributes {stable_mosaic.version = 11 : i64} {
  func.func @gru_seq_kernel(%arg0: i32, %arg1: memref<8x8x1xf32, #tpu.memory_space<vmem>>, %arg2: memref<8x8x1xf32, #tpu.memory_space<vmem>>, %arg3: memref<2x384xf32, #tpu.memory_space<vmem>>, %arg4: memref<128x384xbf16, #tpu.memory_space<vmem>>, %arg5: memref<1x384xf32, #tpu.memory_space<vmem>>, %arg6: memref<1x384xf32, #tpu.memory_space<vmem>>, %arg7: memref<128x384xbf16, #tpu.memory_space<vmem>>, %arg8: memref<128x384xbf16, #tpu.memory_space<vmem>>, %arg9: memref<1x384xf32, #tpu.memory_space<vmem>>, %arg10: memref<1x384xf32, #tpu.memory_space<vmem>>, %arg11: memref<128x384xbf16, #tpu.memory_space<vmem>>, %arg12: memref<128x384xbf16, #tpu.memory_space<vmem>>, %arg13: memref<1x384xf32, #tpu.memory_space<vmem>>, %arg14: memref<1x384xf32, #tpu.memory_space<vmem>>, %arg15: memref<8x128xf32, #tpu.memory_space<vmem>>, %arg16: memref<8x8x384xf32, #tpu.memory_space<vmem>>, %arg17: memref<8x8x128xbf16, #tpu.memory_space<vmem>>) attributes {dimension_semantics = [#tpu.dimension_semantics<parallel>], iteration_bounds = array<i64: 2>, scalar_prefetch = 0 : i64, scratch_operands = 2 : i64, tpu.core_type = #tpu.core_type<tc>, window_params = [{transform_indices = @transform_0, window_bounds = array<i64: 8, 8, 1>}, {transform_indices = @transform_1, window_bounds = array<i64: 8, 8, 1>}, {pipeline_mode = #tpu.pipeline_mode<synchronous>, transform_indices = @transform_2, window_bounds = array<i64: 2, 384>}, {pipeline_mode = #tpu.pipeline_mode<synchronous>, transform_indices = @transform_3, window_bounds = array<i64: 128, 384>}, {pipeline_mode = #tpu.pipeline_mode<synchronous>, transform_indices = @transform_4, window_bounds = array<i64: 1, 384>}, {pipeline_mode = #tpu.pipeline_mode<synchronous>, transform_indices = @transform_5, window_bounds = array<i64: 1, 384>}, {pipeline_mode = #tpu.pipeline_mode<synchronous>, transform_indices = @transform_6, window_bounds = array<i64: 128, 384>}, {pipeline_mode = #tpu.pipeline_mode<synchronous>, transform_indices = @transform_7, window_bounds = array<i64: 128, 384>}, {pipeline_mode = #tpu.pipeline_mode<synchronous>, transform_indices = @transform_8, window_bounds = array<i64: 1, 384>}, {pipeline_mode = #tpu.pipeline_mode<synchronous>, transform_indices = @transform_9, window_bounds = array<i64: 1, 384>}, {pipeline_mode = #tpu.pipeline_mode<synchronous>, transform_indices = @transform_10, window_bounds = array<i64: 128, 384>}, {pipeline_mode = #tpu.pipeline_mode<synchronous>, transform_indices = @transform_11, window_bounds = array<i64: 128, 384>}, {pipeline_mode = #tpu.pipeline_mode<synchronous>, transform_indices = @transform_12, window_bounds = array<i64: 1, 384>}, {pipeline_mode = #tpu.pipeline_mode<synchronous>, transform_indices = @transform_13, window_bounds = array<i64: 1, 384>}, {transform_indices = @transform_14, window_bounds = array<i64: 8, 128>}]} {
    %0 = tpu.iota {dimensions = array<i32: 1>} : vector<1x384xi32>
    %c256_i32 = arith.constant 256 : i32
    %1 = vector.broadcast %c256_i32 : i32 to vector<1x384xi32>
    %2 = arith.cmpi slt, %0, %1 : vector<1x384xi32>
    %3 = arith.extui %2 : vector<1x384xi1> to vector<1x384xi32>
    %4 = arith.sitofp %3 : vector<1x384xi32> to vector<1x384xf32>
    %c0 = arith.constant 0 : index
    %c0_0 = arith.constant 0 : index
    %5 = vector.load %arg3[%c0, %c0_0] : memref<2x384xf32, #tpu.memory_space<vmem>>, vector<2x384xf32>
    %c0_1 = arith.constant 0 : index
    %c0_2 = arith.constant 0 : index
    %6 = vector.load %arg5[%c0_1, %c0_2] : memref<1x384xf32, #tpu.memory_space<vmem>>, vector<1x384xf32>
    %c0_3 = arith.constant 0 : index
    %c0_4 = arith.constant 0 : index
    %7 = vector.load %arg6[%c0_3, %c0_4] : memref<1x384xf32, #tpu.memory_space<vmem>>, vector<1x384xf32>
    %8 = arith.mulf %7, %4 : vector<1x384xf32>
    %9 = arith.addf %6, %8 : vector<1x384xf32>
    %c0_5 = arith.constant 0 : index
    %c0_6 = arith.constant 0 : index
    %c0_7 = arith.constant 0 : index
    %10 = vector.load %arg1[%c0_5, %c0_6, %c0_7] : memref<8x8x1xf32, #tpu.memory_space<vmem>>, vector<8x8x1xf32>
    %11 = vector.extract_strided_slice %5 {offsets = [0, 0], sizes = [1, 384], strides = [1, 1]} : vector<2x384xf32> to vector<1x384xf32>
    %12 = vector.shape_cast %11 : vector<1x384xf32> to vector<1x1x384xf32>
    %13 = vector.broadcast %10 : vector<8x8x1xf32> to vector<8x8x384xf32>
    %14 = vector.broadcast %12 : vector<1x1x384xf32> to vector<8x8x384xf32>
    %15 = arith.mulf %13, %14 : vector<8x8x384xf32>
    %c0_8 = arith.constant 0 : index
    %c0_9 = arith.constant 0 : index
    %c0_10 = arith.constant 0 : index
    %16 = vector.load %arg2[%c0_8, %c0_9, %c0_10] : memref<8x8x1xf32, #tpu.memory_space<vmem>>, vector<8x8x1xf32>
    %17 = vector.extract_strided_slice %5 {offsets = [1, 0], sizes = [1, 384], strides = [1, 1]} : vector<2x384xf32> to vector<1x384xf32>
    %18 = vector.shape_cast %17 : vector<1x384xf32> to vector<1x1x384xf32>
    %19 = vector.broadcast %16 : vector<8x8x1xf32> to vector<8x8x384xf32>
    %20 = vector.broadcast %18 : vector<1x1x384xf32> to vector<8x8x384xf32>
    %21 = arith.mulf %19, %20 : vector<8x8x384xf32>
    %22 = arith.addf %15, %21 : vector<8x8x384xf32>
    %23 = vector.shape_cast %9 : vector<1x384xf32> to vector<1x1x384xf32>
    %24 = vector.broadcast %23 : vector<1x1x384xf32> to vector<8x8x384xf32>
    %25 = arith.addf %22, %24 : vector<8x8x384xf32>
    %c0_11 = arith.constant 0 : index
    %c0_12 = arith.constant 0 : index
    %c0_13 = arith.constant 0 : index
    %26 = vector.load %arg16[%c0_11, %c0_12, %c0_13] : memref<8x8x384xf32, #tpu.memory_space<vmem>>, vector<8x8x384xf32>
    tpu.vector_store %arg16[%c0_11, %c0_12, %c0_13], %25 {strides = array<i32>} : memref<8x8x384xf32, #tpu.memory_space<vmem>>, vector<8x8x384xf32>,
    %c0_14 = arith.constant 0 : index
    %c256 = arith.constant 256 : index
    %27 = vector.load %arg6[%c0_14, %c256] : memref<1x384xf32, #tpu.memory_space<vmem>>, vector<1x128xf32>
    %28 = vector.shape_cast %27 : vector<1x128xf32> to vector<1x128xf32>
    %29 = vector.broadcast %28 : vector<1x128xf32> to vector<8x128xf32>
    %cst = arith.constant 0.000000e+00 : f32
    %30 = vector.broadcast %cst : f32 to vector<8x128xf32>
    %c0_i32 = arith.constant 0 : i32
    %31 = arith.index_cast %c0_i32 : i32 to index
    %c0_15 = arith.constant 0 : index
    %c0_16 = arith.constant 0 : index
    %32 = vector.load %arg16[%31, %c0_15, %c0_16] : memref<8x8x384xf32, #tpu.memory_space<vmem>>, vector<1x8x384xf32>
    %33 = vector.shape_cast %32 : vector<1x8x384xf32> to vector<8x384xf32>
    %34 = arith.truncf %30 : vector<8x128xf32> to vector<8x128xbf16>
    %c0_17 = arith.constant 0 : index
    %c0_18 = arith.constant 0 : index
    %35 = vector.load %arg4[%c0_17, %c0_18] : memref<128x384xbf16, #tpu.memory_space<vmem>>, vector<128x384xbf16>
    %cst_19 = arith.constant dense<0.000000e+00> : vector<8x384xf32>
    %36 = tpu.matmul %34, %35, %cst_19 {dimension_numbers = #tpu.dot_dimension_numbers<[1], [0], [0], [1], [0, 0, 1, 1], [], []>} : vector<8x128xbf16>, vector<128x384xbf16>, vector<8x384xf32> -> vector<8x384xf32>
    %37 = vector.extract_strided_slice %33 {offsets = [0, 0], sizes = [8, 256], strides = [1, 1]} : vector<8x384xf32> to vector<8x256xf32>
    %38 = vector.extract_strided_slice %36 {offsets = [0, 0], sizes = [8, 256], strides = [1, 1]} : vector<8x384xf32> to vector<8x256xf32>
    %39 = arith.addf %37, %38 : vector<8x256xf32>
    %40 = arith.negf %39 : vector<8x256xf32>
    %41 = math.exp %40 : vector<8x256xf32>
    %cst_20 = arith.constant 1.000000e+00 : f32
    %42 = vector.broadcast %cst_20 : f32 to vector<8x256xf32>
    %43 = arith.addf %42, %41 : vector<8x256xf32>
    %44 = arith.divf %42, %43 : vector<8x256xf32>
    %45 = vector.extract_strided_slice %44 {offsets = [0, 0], sizes = [8, 128], strides = [1, 1]} : vector<8x256xf32> to vector<8x128xf32>
    %46 = vector.extract_strided_slice %44 {offsets = [0, 128], sizes = [8, 128], strides = [1, 1]} : vector<8x256xf32> to vector<8x128xf32>
    %47 = vector.extract_strided_slice %33 {offsets = [0, 256], sizes = [8, 128], strides = [1, 1]} : vector<8x384xf32> to vector<8x128xf32>
    %48 = vector.extract_strided_slice %36 {offsets = [0, 256], sizes = [8, 128], strides = [1, 1]} : vector<8x384xf32> to vector<8x128xf32>
    %49 = arith.addf %48, %29 : vector<8x128xf32>
    %50 = arith.mulf %45, %49 : vector<8x128xf32>
    %51 = arith.addf %47, %50 : vector<8x128xf32>
    %52 = math.tanh %51 : vector<8x128xf32>
    %53 = arith.subf %30, %52 : vector<8x128xf32>
    %54 = arith.mulf %46, %53 : vector<8x128xf32>
    %55 = arith.addf %52, %54 : vector<8x128xf32>
    %56 = arith.truncf %55 : vector<8x128xf32> to vector<8x128xbf16>
    %57 = arith.index_cast %c0_i32 : i32 to index
    %c0_21 = arith.constant 0 : index
    %c0_22 = arith.constant 0 : index
    %58 = vector.load %arg17[%57, %c0_21, %c0_22] : memref<8x8x128xbf16, #tpu.memory_space<vmem>>, vector<1x8x128xbf16>
    %59 = vector.shape_cast %58 : vector<1x8x128xbf16> to vector<8x128xbf16>
    %60 = vector.shape_cast %56 : vector<8x128xbf16> to vector<1x8x128xbf16>
    tpu.vector_store %arg17[%57, %c0_21, %c0_22], %60 {strides = array<i32>} : memref<8x8x128xbf16, #tpu.memory_space<vmem>>, vector<1x8x128xbf16>,
    %c1_i32 = arith.constant 1 : i32
    %61 = arith.index_cast %c1_i32 : i32 to index
    %c0_23 = arith.constant 0 : index
    %c0_24 = arith.constant 0 : index
    %62 = vector.load %arg16[%61, %c0_23, %c0_24] : memref<8x8x384xf32, #tpu.memory_space<vmem>>, vector<1x8x384xf32>
    %63 = vector.shape_cast %62 : vector<1x8x384xf32> to vector<8x384xf32>
    %64 = arith.truncf %55 : vector<8x128xf32> to vector<8x128xbf16>
    %c0_25 = arith.constant 0 : index
    %c0_26 = arith.constant 0 : index
    %65 = vector.load %arg4[%c0_25, %c0_26] : memref<128x384xbf16, #tpu.memory_space<vmem>>, vector<128x384xbf16>
    %cst_27 = arith.constant dense<0.000000e+00> : vector<8x384xf32>
    %66 = tpu.matmul %64, %65, %cst_27 {dimension_numbers = #tpu.dot_dimension_numbers<[1], [0], [0], [1], [0, 0, 1, 1], [], []>} : vector<8x128xbf16>, vector<128x384xbf16>, vector<8x384xf32> -> vector<8x384xf32>
    %67 = vector.extract_strided_slice %63 {offsets = [0, 0], sizes = [8, 256], strides = [1, 1]} : vector<8x384xf32> to vector<8x256xf32>
    %68 = vector.extract_strided_slice %66 {offsets = [0, 0], sizes = [8, 256], strides = [1, 1]} : vector<8x384xf32> to vector<8x256xf32>
    %69 = arith.addf %67, %68 : vector<8x256xf32>
    %70 = arith.negf %69 : vector<8x256xf32>
    %71 = math.exp %70 : vector<8x256xf32>
    %cst_28 = arith.constant 1.000000e+00 : f32
    %72 = vector.broadcast %cst_28 : f32 to vector<8x256xf32>
    %73 = arith.addf %72, %71 : vector<8x256xf32>
    %74 = arith.divf %72, %73 : vector<8x256xf32>
    %75 = vector.extract_strided_slice %74 {offsets = [0, 0], sizes = [8, 128], strides = [1, 1]} : vector<8x256xf32> to vector<8x128xf32>
    %76 = vector.extract_strided_slice %74 {offsets = [0, 128], sizes = [8, 128], strides = [1, 1]} : vector<8x256xf32> to vector<8x128xf32>
    %77 = vector.extract_strided_slice %63 {offsets = [0, 256], sizes = [8, 128], strides = [1, 1]} : vector<8x384xf32> to vector<8x128xf32>
    %78 = vector.extract_strided_slice %66 {offsets = [0, 256], sizes = [8, 128], strides = [1, 1]} : vector<8x384xf32> to vector<8x128xf32>
    %79 = arith.addf %78, %29 : vector<8x128xf32>
    %80 = arith.mulf %75, %79 : vector<8x128xf32>
    %81 = arith.addf %77, %80 : vector<8x128xf32>
    %82 = math.tanh %81 : vector<8x128xf32>
    %83 = arith.subf %55, %82 : vector<8x128xf32>
    %84 = arith.mulf %76, %83 : vector<8x128xf32>
    %85 = arith.addf %82, %84 : vector<8x128xf32>
    %86 = arith.truncf %85 : vector<8x128xf32> to vector<8x128xbf16>
    %87 = arith.index_cast %c1_i32 : i32 to index
    %c0_29 = arith.constant 0 : index
    %c0_30 = arith.constant 0 : index
    %88 = vector.load %arg17[%87, %c0_29, %c0_30] : memref<8x8x128xbf16, #tpu.memory_space<vmem>>, vector<1x8x128xbf16>
    %89 = vector.shape_cast %88 : vector<1x8x128xbf16> to vector<8x128xbf16>
    %90 = vector.shape_cast %86 : vector<8x128xbf16> to vector<1x8x128xbf16>
    tpu.vector_store %arg17[%87, %c0_29, %c0_30], %90 {strides = array<i32>} : memref<8x8x128xbf16, #tpu.memory_space<vmem>>, vector<1x8x128xbf16>,
    %c2_i32 = arith.constant 2 : i32
    %91 = arith.index_cast %c2_i32 : i32 to index
    %c0_31 = arith.constant 0 : index
    %c0_32 = arith.constant 0 : index
    %92 = vector.load %arg16[%91, %c0_31, %c0_32] : memref<8x8x384xf32, #tpu.memory_space<vmem>>, vector<1x8x384xf32>
    %93 = vector.shape_cast %92 : vector<1x8x384xf32> to vector<8x384xf32>
    %94 = arith.truncf %85 : vector<8x128xf32> to vector<8x128xbf16>
    %c0_33 = arith.constant 0 : index
    %c0_34 = arith.constant 0 : index
    %95 = vector.load %arg4[%c0_33, %c0_34] : memref<128x384xbf16, #tpu.memory_space<vmem>>, vector<128x384xbf16>
    %cst_35 = arith.constant dense<0.000000e+00> : vector<8x384xf32>
    %96 = tpu.matmul %94, %95, %cst_35 {dimension_numbers = #tpu.dot_dimension_numbers<[1], [0], [0], [1], [0, 0, 1, 1], [], []>} : vector<8x128xbf16>, vector<128x384xbf16>, vector<8x384xf32> -> vector<8x384xf32>
    %97 = vector.extract_strided_slice %93 {offsets = [0, 0], sizes = [8, 256], strides = [1, 1]} : vector<8x384xf32> to vector<8x256xf32>
    %98 = vector.extract_strided_slice %96 {offsets = [0, 0], sizes = [8, 256], strides = [1, 1]} : vector<8x384xf32> to vector<8x256xf32>
    %99 = arith.addf %97, %98 : vector<8x256xf32>
    %100 = arith.negf %99 : vector<8x256xf32>
    %101 = math.exp %100 : vector<8x256xf32>
    %cst_36 = arith.constant 1.000000e+00 : f32
    %102 = vector.broadcast %cst_36 : f32 to vector<8x256xf32>
    %103 = arith.addf %102, %101 : vector<8x256xf32>
    %104 = arith.divf %102, %103 : vector<8x256xf32>
    %105 = vector.extract_strided_slice %104 {offsets = [0, 0], sizes = [8, 128], strides = [1, 1]} : vector<8x256xf32> to vector<8x128xf32>
    %106 = vector.extract_strided_slice %104 {offsets = [0, 128], sizes = [8, 128], strides = [1, 1]} : vector<8x256xf32> to vector<8x128xf32>
    %107 = vector.extract_strided_slice %93 {offsets = [0, 256], sizes = [8, 128], strides = [1, 1]} : vector<8x384xf32> to vector<8x128xf32>
    %108 = vector.extract_strided_slice %96 {offsets = [0, 256], sizes = [8, 128], strides = [1, 1]} : vector<8x384xf32> to vector<8x128xf32>
    %109 = arith.addf %108, %29 : vector<8x128xf32>
    %110 = arith.mulf %105, %109 : vector<8x128xf32>
    %111 = arith.addf %107, %110 : vector<8x128xf32>
    %112 = math.tanh %111 : vector<8x128xf32>
    %113 = arith.subf %85, %112 : vector<8x128xf32>
    %114 = arith.mulf %106, %113 : vector<8x128xf32>
    %115 = arith.addf %112, %114 : vector<8x128xf32>
    %116 = arith.truncf %115 : vector<8x128xf32> to vector<8x128xbf16>
    %117 = arith.index_cast %c2_i32 : i32 to index
    %c0_37 = arith.constant 0 : index
    %c0_38 = arith.constant 0 : index
    %118 = vector.load %arg17[%117, %c0_37, %c0_38] : memref<8x8x128xbf16, #tpu.memory_space<vmem>>, vector<1x8x128xbf16>
    %119 = vector.shape_cast %118 : vector<1x8x128xbf16> to vector<8x128xbf16>
    %120 = vector.shape_cast %116 : vector<8x128xbf16> to vector<1x8x128xbf16>
    tpu.vector_store %arg17[%117, %c0_37, %c0_38], %120 {strides = array<i32>} : memref<8x8x128xbf16, #tpu.memory_space<vmem>>, vector<1x8x128xbf16>,
    %c3_i32 = arith.constant 3 : i32
    %121 = arith.index_cast %c3_i32 : i32 to index
    %c0_39 = arith.constant 0 : index
    %c0_40 = arith.constant 0 : index
    %122 = vector.load %arg16[%121, %c0_39, %c0_40] : memref<8x8x384xf32, #tpu.memory_space<vmem>>, vector<1x8x384xf32>
    %123 = vector.shape_cast %122 : vector<1x8x384xf32> to vector<8x384xf32>
    %124 = arith.truncf %115 : vector<8x128xf32> to vector<8x128xbf16>
    %c0_41 = arith.constant 0 : index
    %c0_42 = arith.constant 0 : index
    %125 = vector.load %arg4[%c0_41, %c0_42] : memref<128x384xbf16, #tpu.memory_space<vmem>>, vector<128x384xbf16>
    %cst_43 = arith.constant dense<0.000000e+00> : vector<8x384xf32>
    %126 = tpu.matmul %124, %125, %cst_43 {dimension_numbers = #tpu.dot_dimension_numbers<[1], [0], [0], [1], [0, 0, 1, 1], [], []>} : vector<8x128xbf16>, vector<128x384xbf16>, vector<8x384xf32> -> vector<8x384xf32>
    %127 = vector.extract_strided_slice %123 {offsets = [0, 0], sizes = [8, 256], strides = [1, 1]} : vector<8x384xf32> to vector<8x256xf32>
    %128 = vector.extract_strided_slice %126 {offsets = [0, 0], sizes = [8, 256], strides = [1, 1]} : vector<8x384xf32> to vector<8x256xf32>
    %129 = arith.addf %127, %128 : vector<8x256xf32>
    %130 = arith.negf %129 : vector<8x256xf32>
    %131 = math.exp %130 : vector<8x256xf32>
    %cst_44 = arith.constant 1.000000e+00 : f32
    %132 = vector.broadcast %cst_44 : f32 to vector<8x256xf32>
    %133 = arith.addf %132, %131 : vector<8x256xf32>
    %134 = arith.divf %132, %133 : vector<8x256xf32>
    %135 = vector.extract_strided_slice %134 {offsets = [0, 0], sizes = [8, 128], strides = [1, 1]} : vector<8x256xf32> to vector<8x128xf32>
    %136 = vector.extract_strided_slice %134 {offsets = [0, 128], sizes = [8, 128], strides = [1, 1]} : vector<8x256xf32> to vector<8x128xf32>
    %137 = vector.extract_strided_slice %123 {offsets = [0, 256], sizes = [8, 128], strides = [1, 1]} : vector<8x384xf32> to vector<8x128xf32>
    %138 = vector.extract_strided_slice %126 {offsets = [0, 256], sizes = [8, 128], strides = [1, 1]} : vector<8x384xf32> to vector<8x128xf32>
    %139 = arith.addf %138, %29 : vector<8x128xf32>
    %140 = arith.mulf %135, %139 : vector<8x128xf32>
    %141 = arith.addf %137, %140 : vector<8x128xf32>
    %142 = math.tanh %141 : vector<8x128xf32>
    %143 = arith.subf %115, %142 : vector<8x128xf32>
    %144 = arith.mulf %136, %143 : vector<8x128xf32>
    %145 = arith.addf %142, %144 : vector<8x128xf32>
    %146 = arith.truncf %145 : vector<8x128xf32> to vector<8x128xbf16>
    %147 = arith.index_cast %c3_i32 : i32 to index
    %c0_45 = arith.constant 0 : index
    %c0_46 = arith.constant 0 : index
    %148 = vector.load %arg17[%147, %c0_45, %c0_46] : memref<8x8x128xbf16, #tpu.memory_space<vmem>>, vector<1x8x128xbf16>
    %149 = vector.shape_cast %148 : vector<1x8x128xbf16> to vector<8x128xbf16>
    %150 = vector.shape_cast %146 : vector<8x128xbf16> to vector<1x8x128xbf16>
    tpu.vector_store %arg17[%147, %c0_45, %c0_46], %150 {strides = array<i32>} : memref<8x8x128xbf16, #tpu.memory_space<vmem>>, vector<1x8x128xbf16>,
    %c4_i32 = arith.constant 4 : i32
    %151 = arith.index_cast %c4_i32 : i32 to index
    %c0_47 = arith.constant 0 : index
    %c0_48 = arith.constant 0 : index
    %152 = vector.load %arg16[%151, %c0_47, %c0_48] : memref<8x8x384xf32, #tpu.memory_space<vmem>>, vector<1x8x384xf32>
    %153 = vector.shape_cast %152 : vector<1x8x384xf32> to vector<8x384xf32>
    %154 = arith.truncf %145 : vector<8x128xf32> to vector<8x128xbf16>
    %c0_49 = arith.constant 0 : index
    %c0_50 = arith.constant 0 : index
    %155 = vector.load %arg4[%c0_49, %c0_50] : memref<128x384xbf16, #tpu.memory_space<vmem>>, vector<128x384xbf16>
    %cst_51 = arith.constant dense<0.000000e+00> : vector<8x384xf32>
    %156 = tpu.matmul %154, %155, %cst_51 {dimension_numbers = #tpu.dot_dimension_numbers<[1], [0], [0], [1], [0, 0, 1, 1], [], []>} : vector<8x128xbf16>, vector<128x384xbf16>, vector<8x384xf32> -> vector<8x384xf32>
    %157 = vector.extract_strided_slice %153 {offsets = [0, 0], sizes = [8, 256], strides = [1, 1]} : vector<8x384xf32> to vector<8x256xf32>
    %158 = vector.extract_strided_slice %156 {offsets = [0, 0], sizes = [8, 256], strides = [1, 1]} : vector<8x384xf32> to vector<8x256xf32>
    %159 = arith.addf %157, %158 : vector<8x256xf32>
    %160 = arith.negf %159 : vector<8x256xf32>
    %161 = math.exp %160 : vector<8x256xf32>
    %cst_52 = arith.constant 1.000000e+00 : f32
    %162 = vector.broadcast %cst_52 : f32 to vector<8x256xf32>
    %163 = arith.addf %162, %161 : vector<8x256xf32>
    %164 = arith.divf %162, %163 : vector<8x256xf32>
    %165 = vector.extract_strided_slice %164 {offsets = [0, 0], sizes = [8, 128], strides = [1, 1]} : vector<8x256xf32> to vector<8x128xf32>
    %166 = vector.extract_strided_slice %164 {offsets = [0, 128], sizes = [8, 128], strides = [1, 1]} : vector<8x256xf32> to vector<8x128xf32>
    %167 = vector.extract_strided_slice %153 {offsets = [0, 256], sizes = [8, 128], strides = [1, 1]} : vector<8x384xf32> to vector<8x128xf32>
    %168 = vector.extract_strided_slice %156 {offsets = [0, 256], sizes = [8, 128], strides = [1, 1]} : vector<8x384xf32> to vector<8x128xf32>
    %169 = arith.addf %168, %29 : vector<8x128xf32>
    %170 = arith.mulf %165, %169 : vector<8x128xf32>
    %171 = arith.addf %167, %170 : vector<8x128xf32>
    %172 = math.tanh %171 : vector<8x128xf32>
    %173 = arith.subf %145, %172 : vector<8x128xf32>
    %174 = arith.mulf %166, %173 : vector<8x128xf32>
    %175 = arith.addf %172, %174 : vector<8x128xf32>
    %176 = arith.truncf %175 : vector<8x128xf32> to vector<8x128xbf16>
    %177 = arith.index_cast %c4_i32 : i32 to index
    %c0_53 = arith.constant 0 : index
    %c0_54 = arith.constant 0 : index
    %178 = vector.load %arg17[%177, %c0_53, %c0_54] : memref<8x8x128xbf16, #tpu.memory_space<vmem>>, vector<1x8x128xbf16>
    %179 = vector.shape_cast %178 : vector<1x8x128xbf16> to vector<8x128xbf16>
    %180 = vector.shape_cast %176 : vector<8x128xbf16> to vector<1x8x128xbf16>
    tpu.vector_store %arg17[%177, %c0_53, %c0_54], %180 {strides = array<i32>} : memref<8x8x128xbf16, #tpu.memory_space<vmem>>, vector<1x8x128xbf16>,
    %c5_i32 = arith.constant 5 : i32
    %181 = arith.index_cast %c5_i32 : i32 to index
    %c0_55 = arith.constant 0 : index
    %c0_56 = arith.constant 0 : index
    %182 = vector.load %arg16[%181, %c0_55, %c0_56] : memref<8x8x384xf32, #tpu.memory_space<vmem>>, vector<1x8x384xf32>
    %183 = vector.shape_cast %182 : vector<1x8x384xf32> to vector<8x384xf32>
    %184 = arith.truncf %175 : vector<8x128xf32> to vector<8x128xbf16>
    %c0_57 = arith.constant 0 : index
    %c0_58 = arith.constant 0 : index
    %185 = vector.load %arg4[%c0_57, %c0_58] : memref<128x384xbf16, #tpu.memory_space<vmem>>, vector<128x384xbf16>
    %cst_59 = arith.constant dense<0.000000e+00> : vector<8x384xf32>
    %186 = tpu.matmul %184, %185, %cst_59 {dimension_numbers = #tpu.dot_dimension_numbers<[1], [0], [0], [1], [0, 0, 1, 1], [], []>} : vector<8x128xbf16>, vector<128x384xbf16>, vector<8x384xf32> -> vector<8x384xf32>
    %187 = vector.extract_strided_slice %183 {offsets = [0, 0], sizes = [8, 256], strides = [1, 1]} : vector<8x384xf32> to vector<8x256xf32>
    %188 = vector.extract_strided_slice %186 {offsets = [0, 0], sizes = [8, 256], strides = [1, 1]} : vector<8x384xf32> to vector<8x256xf32>
    %189 = arith.addf %187, %188 : vector<8x256xf32>
    %190 = arith.negf %189 : vector<8x256xf32>
    %191 = math.exp %190 : vector<8x256xf32>
    %cst_60 = arith.constant 1.000000e+00 : f32
    %192 = vector.broadcast %cst_60 : f32 to vector<8x256xf32>
    %193 = arith.addf %192, %191 : vector<8x256xf32>
    %194 = arith.divf %192, %193 : vector<8x256xf32>
    %195 = vector.extract_strided_slice %194 {offsets = [0, 0], sizes = [8, 128], strides = [1, 1]} : vector<8x256xf32> to vector<8x128xf32>
    %196 = vector.extract_strided_slice %194 {offsets = [0, 128], sizes = [8, 128], strides = [1, 1]} : vector<8x256xf32> to vector<8x128xf32>
    %197 = vector.extract_strided_slice %183 {offsets = [0, 256], sizes = [8, 128], strides = [1, 1]} : vector<8x384xf32> to vector<8x128xf32>
    %198 = vector.extract_strided_slice %186 {offsets = [0, 256], sizes = [8, 128], strides = [1, 1]} : vector<8x384xf32> to vector<8x128xf32>
    %199 = arith.addf %198, %29 : vector<8x128xf32>
    %200 = arith.mulf %195, %199 : vector<8x128xf32>
    %201 = arith.addf %197, %200 : vector<8x128xf32>
    %202 = math.tanh %201 : vector<8x128xf32>
    %203 = arith.subf %175, %202 : vector<8x128xf32>
    %204 = arith.mulf %196, %203 : vector<8x128xf32>
    %205 = arith.addf %202, %204 : vector<8x128xf32>
    %206 = arith.truncf %205 : vector<8x128xf32> to vector<8x128xbf16>
    %207 = arith.index_cast %c5_i32 : i32 to index
    %c0_61 = arith.constant 0 : index
    %c0_62 = arith.constant 0 : index
    %208 = vector.load %arg17[%207, %c0_61, %c0_62] : memref<8x8x128xbf16, #tpu.memory_space<vmem>>, vector<1x8x128xbf16>
    %209 = vector.shape_cast %208 : vector<1x8x128xbf16> to vector<8x128xbf16>
    %210 = vector.shape_cast %206 : vector<8x128xbf16> to vector<1x8x128xbf16>
    tpu.vector_store %arg17[%207, %c0_61, %c0_62], %210 {strides = array<i32>} : memref<8x8x128xbf16, #tpu.memory_space<vmem>>, vector<1x8x128xbf16>,
    %c6_i32 = arith.constant 6 : i32
    %211 = arith.index_cast %c6_i32 : i32 to index
    %c0_63 = arith.constant 0 : index
    %c0_64 = arith.constant 0 : index
    %212 = vector.load %arg16[%211, %c0_63, %c0_64] : memref<8x8x384xf32, #tpu.memory_space<vmem>>, vector<1x8x384xf32>
    %213 = vector.shape_cast %212 : vector<1x8x384xf32> to vector<8x384xf32>
    %214 = arith.truncf %205 : vector<8x128xf32> to vector<8x128xbf16>
    %c0_65 = arith.constant 0 : index
    %c0_66 = arith.constant 0 : index
    %215 = vector.load %arg4[%c0_65, %c0_66] : memref<128x384xbf16, #tpu.memory_space<vmem>>, vector<128x384xbf16>
    %cst_67 = arith.constant dense<0.000000e+00> : vector<8x384xf32>
    %216 = tpu.matmul %214, %215, %cst_67 {dimension_numbers = #tpu.dot_dimension_numbers<[1], [0], [0], [1], [0, 0, 1, 1], [], []>} : vector<8x128xbf16>, vector<128x384xbf16>, vector<8x384xf32> -> vector<8x384xf32>
    %217 = vector.extract_strided_slice %213 {offsets = [0, 0], sizes = [8, 256], strides = [1, 1]} : vector<8x384xf32> to vector<8x256xf32>
    %218 = vector.extract_strided_slice %216 {offsets = [0, 0], sizes = [8, 256], strides = [1, 1]} : vector<8x384xf32> to vector<8x256xf32>
    %219 = arith.addf %217, %218 : vector<8x256xf32>
    %220 = arith.negf %219 : vector<8x256xf32>
    %221 = math.exp %220 : vector<8x256xf32>
    %cst_68 = arith.constant 1.000000e+00 : f32
    %222 = vector.broadcast %cst_68 : f32 to vector<8x256xf32>
    %223 = arith.addf %222, %221 : vector<8x256xf32>
    %224 = arith.divf %222, %223 : vector<8x256xf32>
    %225 = vector.extract_strided_slice %224 {offsets = [0, 0], sizes = [8, 128], strides = [1, 1]} : vector<8x256xf32> to vector<8x128xf32>
    %226 = vector.extract_strided_slice %224 {offsets = [0, 128], sizes = [8, 128], strides = [1, 1]} : vector<8x256xf32> to vector<8x128xf32>
    %227 = vector.extract_strided_slice %213 {offsets = [0, 256], sizes = [8, 128], strides = [1, 1]} : vector<8x384xf32> to vector<8x128xf32>
    %228 = vector.extract_strided_slice %216 {offsets = [0, 256], sizes = [8, 128], strides = [1, 1]} : vector<8x384xf32> to vector<8x128xf32>
    %229 = arith.addf %228, %29 : vector<8x128xf32>
    %230 = arith.mulf %225, %229 : vector<8x128xf32>
    %231 = arith.addf %227, %230 : vector<8x128xf32>
    %232 = math.tanh %231 : vector<8x128xf32>
    %233 = arith.subf %205, %232 : vector<8x128xf32>
    %234 = arith.mulf %226, %233 : vector<8x128xf32>
    %235 = arith.addf %232, %234 : vector<8x128xf32>
    %236 = arith.truncf %235 : vector<8x128xf32> to vector<8x128xbf16>
    %237 = arith.index_cast %c6_i32 : i32 to index
    %c0_69 = arith.constant 0 : index
    %c0_70 = arith.constant 0 : index
    %238 = vector.load %arg17[%237, %c0_69, %c0_70] : memref<8x8x128xbf16, #tpu.memory_space<vmem>>, vector<1x8x128xbf16>
    %239 = vector.shape_cast %238 : vector<1x8x128xbf16> to vector<8x128xbf16>
    %240 = vector.shape_cast %236 : vector<8x128xbf16> to vector<1x8x128xbf16>
    tpu.vector_store %arg17[%237, %c0_69, %c0_70], %240 {strides = array<i32>} : memref<8x8x128xbf16, #tpu.memory_space<vmem>>, vector<1x8x128xbf16>,
    %c7_i32 = arith.constant 7 : i32
    %241 = arith.index_cast %c7_i32 : i32 to index
    %c0_71 = arith.constant 0 : index
    %c0_72 = arith.constant 0 : index
    %242 = vector.load %arg16[%241, %c0_71, %c0_72] : memref<8x8x384xf32, #tpu.memory_space<vmem>>, vector<1x8x384xf32>
    %243 = vector.shape_cast %242 : vector<1x8x384xf32> to vector<8x384xf32>
    %244 = arith.truncf %235 : vector<8x128xf32> to vector<8x128xbf16>
    %c0_73 = arith.constant 0 : index
    %c0_74 = arith.constant 0 : index
    %245 = vector.load %arg4[%c0_73, %c0_74] : memref<128x384xbf16, #tpu.memory_space<vmem>>, vector<128x384xbf16>
    %cst_75 = arith.constant dense<0.000000e+00> : vector<8x384xf32>
    %246 = tpu.matmul %244, %245, %cst_75 {dimension_numbers = #tpu.dot_dimension_numbers<[1], [0], [0], [1], [0, 0, 1, 1], [], []>} : vector<8x128xbf16>, vector<128x384xbf16>, vector<8x384xf32> -> vector<8x384xf32>
    %247 = vector.extract_strided_slice %243 {offsets = [0, 0], sizes = [8, 256], strides = [1, 1]} : vector<8x384xf32> to vector<8x256xf32>
    %248 = vector.extract_strided_slice %246 {offsets = [0, 0], sizes = [8, 256], strides = [1, 1]} : vector<8x384xf32> to vector<8x256xf32>
    %249 = arith.addf %247, %248 : vector<8x256xf32>
    %250 = arith.negf %249 : vector<8x256xf32>
    %251 = math.exp %250 : vector<8x256xf32>
    %cst_76 = arith.constant 1.000000e+00 : f32
    %252 = vector.broadcast %cst_76 : f32 to vector<8x256xf32>
    %253 = arith.addf %252, %251 : vector<8x256xf32>
    %254 = arith.divf %252, %253 : vector<8x256xf32>
    %255 = vector.extract_strided_slice %254 {offsets = [0, 0], sizes = [8, 128], strides = [1, 1]} : vector<8x256xf32> to vector<8x128xf32>
    %256 = vector.extract_strided_slice %254 {offsets = [0, 128], sizes = [8, 128], strides = [1, 1]} : vector<8x256xf32> to vector<8x128xf32>
    %257 = vector.extract_strided_slice %243 {offsets = [0, 256], sizes = [8, 128], strides = [1, 1]} : vector<8x384xf32> to vector<8x128xf32>
    %258 = vector.extract_strided_slice %246 {offsets = [0, 256], sizes = [8, 128], strides = [1, 1]} : vector<8x384xf32> to vector<8x128xf32>
    %259 = arith.addf %258, %29 : vector<8x128xf32>
    %260 = arith.mulf %255, %259 : vector<8x128xf32>
    %261 = arith.addf %257, %260 : vector<8x128xf32>
    %262 = math.tanh %261 : vector<8x128xf32>
    %263 = arith.subf %235, %262 : vector<8x128xf32>
    %264 = arith.mulf %256, %263 : vector<8x128xf32>
    %265 = arith.addf %262, %264 : vector<8x128xf32>
    %266 = arith.truncf %265 : vector<8x128xf32> to vector<8x128xbf16>
    %267 = arith.index_cast %c7_i32 : i32 to index
    %c0_77 = arith.constant 0 : index
    %c0_78 = arith.constant 0 : index
    %268 = vector.load %arg17[%267, %c0_77, %c0_78] : memref<8x8x128xbf16, #tpu.memory_space<vmem>>, vector<1x8x128xbf16>
    %269 = vector.shape_cast %268 : vector<1x8x128xbf16> to vector<8x128xbf16>
    %270 = vector.shape_cast %266 : vector<8x128xbf16> to vector<1x8x128xbf16>
    tpu.vector_store %arg17[%267, %c0_77, %c0_78], %270 {strides = array<i32>} : memref<8x8x128xbf16, #tpu.memory_space<vmem>>, vector<1x8x128xbf16>,
    %c8_i32 = arith.constant 8 : i32
    %c0_79 = arith.constant 0 : index
    %c0_80 = arith.constant 0 : index
    %c0_81 = arith.constant 0 : index
    %271 = vector.load %arg17[%c0_79, %c0_80, %c0_81] : memref<8x8x128xbf16, #tpu.memory_space<vmem>>, vector<8x8x128xbf16>
    %272 = vector.shape_cast %271 : vector<8x8x128xbf16> to vector<64x128xbf16>
    %c0_82 = arith.constant 0 : index
    %c0_83 = arith.constant 0 : index
    %273 = vector.load %arg9[%c0_82, %c0_83] : memref<1x384xf32, #tpu.memory_space<vmem>>, vector<1x384xf32>
    %c0_84 = arith.constant 0 : index
    %c0_85 = arith.constant 0 : index
    %274 = vector.load %arg10[%c0_84, %c0_85] : memref<1x384xf32, #tpu.memory_space<vmem>>, vector<1x384xf32>
    %275 = arith.mulf %274, %4 : vector<1x384xf32>
    %276 = arith.addf %273, %275 : vector<1x384xf32>
    %c0_86 = arith.constant 0 : index
    %c0_87 = arith.constant 0 : index
    %277 = vector.load %arg7[%c0_86, %c0_87] : memref<128x384xbf16, #tpu.memory_space<vmem>>, vector<128x384xbf16>
    %cst_88 = arith.constant dense<0.000000e+00> : vector<64x384xf32>
    %278 = tpu.matmul %272, %277, %cst_88 {dimension_numbers = #tpu.dot_dimension_numbers<[1], [0], [0], [1], [0, 0, 1, 1], [], []>} : vector<64x128xbf16>, vector<128x384xbf16>, vector<64x384xf32> -> vector<64x384xf32>
    %279 = vector.broadcast %276 : vector<1x384xf32> to vector<64x384xf32>
    %280 = arith.addf %278, %279 : vector<64x384xf32>
    %281 = vector.shape_cast %280 : vector<64x384xf32> to vector<8x8x384xf32>
    %c0_89 = arith.constant 0 : index
    %c0_90 = arith.constant 0 : index
    %c0_91 = arith.constant 0 : index
    %282 = vector.load %arg16[%c0_89, %c0_90, %c0_91] : memref<8x8x384xf32, #tpu.memory_space<vmem>>, vector<8x8x384xf32>
    tpu.vector_store %arg16[%c0_89, %c0_90, %c0_91], %281 {strides = array<i32>} : memref<8x8x384xf32, #tpu.memory_space<vmem>>, vector<8x8x384xf32>,
    %c0_92 = arith.constant 0 : index
    %c256_93 = arith.constant 256 : index
    %283 = vector.load %arg10[%c0_92, %c256_93] : memref<1x384xf32, #tpu.memory_space<vmem>>, vector<1x128xf32>
    %284 = vector.shape_cast %283 : vector<1x128xf32> to vector<1x128xf32>
    %285 = vector.broadcast %284 : vector<1x128xf32> to vector<8x128xf32>
    %cst_94 = arith.constant 0.000000e+00 : f32
    %286 = vector.broadcast %cst_94 : f32 to vector<8x128xf32>
    %c0_i32_95 = arith.constant 0 : i32
    %287 = arith.index_cast %c0_i32_95 : i32 to index
    %c0_96 = arith.constant 0 : index
    %c0_97 = arith.constant 0 : index
    %288 = vector.load %arg16[%287, %c0_96, %c0_97] : memref<8x8x384xf32, #tpu.memory_space<vmem>>, vector<1x8x384xf32>
    %289 = vector.shape_cast %288 : vector<1x8x384xf32> to vector<8x384xf32>
    %290 = arith.truncf %286 : vector<8x128xf32> to vector<8x128xbf16>
    %c0_98 = arith.constant 0 : index
    %c0_99 = arith.constant 0 : index
    %291 = vector.load %arg8[%c0_98, %c0_99] : memref<128x384xbf16, #tpu.memory_space<vmem>>, vector<128x384xbf16>
    %cst_100 = arith.constant dense<0.000000e+00> : vector<8x384xf32>
    %292 = tpu.matmul %290, %291, %cst_100 {dimension_numbers = #tpu.dot_dimension_numbers<[1], [0], [0], [1], [0, 0, 1, 1], [], []>} : vector<8x128xbf16>, vector<128x384xbf16>, vector<8x384xf32> -> vector<8x384xf32>
    %293 = vector.extract_strided_slice %289 {offsets = [0, 0], sizes = [8, 256], strides = [1, 1]} : vector<8x384xf32> to vector<8x256xf32>
    %294 = vector.extract_strided_slice %292 {offsets = [0, 0], sizes = [8, 256], strides = [1, 1]} : vector<8x384xf32> to vector<8x256xf32>
    %295 = arith.addf %293, %294 : vector<8x256xf32>
    %296 = arith.negf %295 : vector<8x256xf32>
    %297 = math.exp %296 : vector<8x256xf32>
    %cst_101 = arith.constant 1.000000e+00 : f32
    %298 = vector.broadcast %cst_101 : f32 to vector<8x256xf32>
    %299 = arith.addf %298, %297 : vector<8x256xf32>
    %300 = arith.divf %298, %299 : vector<8x256xf32>
    %301 = vector.extract_strided_slice %300 {offsets = [0, 0], sizes = [8, 128], strides = [1, 1]} : vector<8x256xf32> to vector<8x128xf32>
    %302 = vector.extract_strided_slice %300 {offsets = [0, 128], sizes = [8, 128], strides = [1, 1]} : vector<8x256xf32> to vector<8x128xf32>
    %303 = vector.extract_strided_slice %289 {offsets = [0, 256], sizes = [8, 128], strides = [1, 1]} : vector<8x384xf32> to vector<8x128xf32>
    %304 = vector.extract_strided_slice %292 {offsets = [0, 256], sizes = [8, 128], strides = [1, 1]} : vector<8x384xf32> to vector<8x128xf32>
    %305 = arith.addf %304, %285 : vector<8x128xf32>
    %306 = arith.mulf %301, %305 : vector<8x128xf32>
    %307 = arith.addf %303, %306 : vector<8x128xf32>
    %308 = math.tanh %307 : vector<8x128xf32>
    %309 = arith.subf %286, %308 : vector<8x128xf32>
    %310 = arith.mulf %302, %309 : vector<8x128xf32>
    %311 = arith.addf %308, %310 : vector<8x128xf32>
    %312 = arith.truncf %311 : vector<8x128xf32> to vector<8x128xbf16>
    %313 = arith.index_cast %c0_i32_95 : i32 to index
    %c0_102 = arith.constant 0 : index
    %c0_103 = arith.constant 0 : index
    %314 = vector.load %arg17[%313, %c0_102, %c0_103] : memref<8x8x128xbf16, #tpu.memory_space<vmem>>, vector<1x8x128xbf16>
    %315 = vector.shape_cast %314 : vector<1x8x128xbf16> to vector<8x128xbf16>
    %316 = vector.shape_cast %312 : vector<8x128xbf16> to vector<1x8x128xbf16>
    tpu.vector_store %arg17[%313, %c0_102, %c0_103], %316 {strides = array<i32>} : memref<8x8x128xbf16, #tpu.memory_space<vmem>>, vector<1x8x128xbf16>,
    %c1_i32_104 = arith.constant 1 : i32
    %317 = arith.index_cast %c1_i32_104 : i32 to index
    %c0_105 = arith.constant 0 : index
    %c0_106 = arith.constant 0 : index
    %318 = vector.load %arg16[%317, %c0_105, %c0_106] : memref<8x8x384xf32, #tpu.memory_space<vmem>>, vector<1x8x384xf32>
    %319 = vector.shape_cast %318 : vector<1x8x384xf32> to vector<8x384xf32>
    %320 = arith.truncf %311 : vector<8x128xf32> to vector<8x128xbf16>
    %c0_107 = arith.constant 0 : index
    %c0_108 = arith.constant 0 : index
    %321 = vector.load %arg8[%c0_107, %c0_108] : memref<128x384xbf16, #tpu.memory_space<vmem>>, vector<128x384xbf16>
    %cst_109 = arith.constant dense<0.000000e+00> : vector<8x384xf32>
    %322 = tpu.matmul %320, %321, %cst_109 {dimension_numbers = #tpu.dot_dimension_numbers<[1], [0], [0], [1], [0, 0, 1, 1], [], []>} : vector<8x128xbf16>, vector<128x384xbf16>, vector<8x384xf32> -> vector<8x384xf32>
    %323 = vector.extract_strided_slice %319 {offsets = [0, 0], sizes = [8, 256], strides = [1, 1]} : vector<8x384xf32> to vector<8x256xf32>
    %324 = vector.extract_strided_slice %322 {offsets = [0, 0], sizes = [8, 256], strides = [1, 1]} : vector<8x384xf32> to vector<8x256xf32>
    %325 = arith.addf %323, %324 : vector<8x256xf32>
    %326 = arith.negf %325 : vector<8x256xf32>
    %327 = math.exp %326 : vector<8x256xf32>
    %cst_110 = arith.constant 1.000000e+00 : f32
    %328 = vector.broadcast %cst_110 : f32 to vector<8x256xf32>
    %329 = arith.addf %328, %327 : vector<8x256xf32>
    %330 = arith.divf %328, %329 : vector<8x256xf32>
    %331 = vector.extract_strided_slice %330 {offsets = [0, 0], sizes = [8, 128], strides = [1, 1]} : vector<8x256xf32> to vector<8x128xf32>
    %332 = vector.extract_strided_slice %330 {offsets = [0, 128], sizes = [8, 128], strides = [1, 1]} : vector<8x256xf32> to vector<8x128xf32>
    %333 = vector.extract_strided_slice %319 {offsets = [0, 256], sizes = [8, 128], strides = [1, 1]} : vector<8x384xf32> to vector<8x128xf32>
    %334 = vector.extract_strided_slice %322 {offsets = [0, 256], sizes = [8, 128], strides = [1, 1]} : vector<8x384xf32> to vector<8x128xf32>
    %335 = arith.addf %334, %285 : vector<8x128xf32>
    %336 = arith.mulf %331, %335 : vector<8x128xf32>
    %337 = arith.addf %333, %336 : vector<8x128xf32>
    %338 = math.tanh %337 : vector<8x128xf32>
    %339 = arith.subf %311, %338 : vector<8x128xf32>
    %340 = arith.mulf %332, %339 : vector<8x128xf32>
    %341 = arith.addf %338, %340 : vector<8x128xf32>
    %342 = arith.truncf %341 : vector<8x128xf32> to vector<8x128xbf16>
    %343 = arith.index_cast %c1_i32_104 : i32 to index
    %c0_111 = arith.constant 0 : index
    %c0_112 = arith.constant 0 : index
    %344 = vector.load %arg17[%343, %c0_111, %c0_112] : memref<8x8x128xbf16, #tpu.memory_space<vmem>>, vector<1x8x128xbf16>
    %345 = vector.shape_cast %344 : vector<1x8x128xbf16> to vector<8x128xbf16>
    %346 = vector.shape_cast %342 : vector<8x128xbf16> to vector<1x8x128xbf16>
    tpu.vector_store %arg17[%343, %c0_111, %c0_112], %346 {strides = array<i32>} : memref<8x8x128xbf16, #tpu.memory_space<vmem>>, vector<1x8x128xbf16>,
    %c2_i32_113 = arith.constant 2 : i32
    %347 = arith.index_cast %c2_i32_113 : i32 to index
    %c0_114 = arith.constant 0 : index
    %c0_115 = arith.constant 0 : index
    %348 = vector.load %arg16[%347, %c0_114, %c0_115] : memref<8x8x384xf32, #tpu.memory_space<vmem>>, vector<1x8x384xf32>
    %349 = vector.shape_cast %348 : vector<1x8x384xf32> to vector<8x384xf32>
    %350 = arith.truncf %341 : vector<8x128xf32> to vector<8x128xbf16>
    %c0_116 = arith.constant 0 : index
    %c0_117 = arith.constant 0 : index
    %351 = vector.load %arg8[%c0_116, %c0_117] : memref<128x384xbf16, #tpu.memory_space<vmem>>, vector<128x384xbf16>
    %cst_118 = arith.constant dense<0.000000e+00> : vector<8x384xf32>
    %352 = tpu.matmul %350, %351, %cst_118 {dimension_numbers = #tpu.dot_dimension_numbers<[1], [0], [0], [1], [0, 0, 1, 1], [], []>} : vector<8x128xbf16>, vector<128x384xbf16>, vector<8x384xf32> -> vector<8x384xf32>
    %353 = vector.extract_strided_slice %349 {offsets = [0, 0], sizes = [8, 256], strides = [1, 1]} : vector<8x384xf32> to vector<8x256xf32>
    %354 = vector.extract_strided_slice %352 {offsets = [0, 0], sizes = [8, 256], strides = [1, 1]} : vector<8x384xf32> to vector<8x256xf32>
    %355 = arith.addf %353, %354 : vector<8x256xf32>
    %356 = arith.negf %355 : vector<8x256xf32>
    %357 = math.exp %356 : vector<8x256xf32>
    %cst_119 = arith.constant 1.000000e+00 : f32
    %358 = vector.broadcast %cst_119 : f32 to vector<8x256xf32>
    %359 = arith.addf %358, %357 : vector<8x256xf32>
    %360 = arith.divf %358, %359 : vector<8x256xf32>
    %361 = vector.extract_strided_slice %360 {offsets = [0, 0], sizes = [8, 128], strides = [1, 1]} : vector<8x256xf32> to vector<8x128xf32>
    %362 = vector.extract_strided_slice %360 {offsets = [0, 128], sizes = [8, 128], strides = [1, 1]} : vector<8x256xf32> to vector<8x128xf32>
    %363 = vector.extract_strided_slice %349 {offsets = [0, 256], sizes = [8, 128], strides = [1, 1]} : vector<8x384xf32> to vector<8x128xf32>
    %364 = vector.extract_strided_slice %352 {offsets = [0, 256], sizes = [8, 128], strides = [1, 1]} : vector<8x384xf32> to vector<8x128xf32>
    %365 = arith.addf %364, %285 : vector<8x128xf32>
    %366 = arith.mulf %361, %365 : vector<8x128xf32>
    %367 = arith.addf %363, %366 : vector<8x128xf32>
    %368 = math.tanh %367 : vector<8x128xf32>
    %369 = arith.subf %341, %368 : vector<8x128xf32>
    %370 = arith.mulf %362, %369 : vector<8x128xf32>
    %371 = arith.addf %368, %370 : vector<8x128xf32>
    %372 = arith.truncf %371 : vector<8x128xf32> to vector<8x128xbf16>
    %373 = arith.index_cast %c2_i32_113 : i32 to index
    %c0_120 = arith.constant 0 : index
    %c0_121 = arith.constant 0 : index
    %374 = vector.load %arg17[%373, %c0_120, %c0_121] : memref<8x8x128xbf16, #tpu.memory_space<vmem>>, vector<1x8x128xbf16>
    %375 = vector.shape_cast %374 : vector<1x8x128xbf16> to vector<8x128xbf16>
    %376 = vector.shape_cast %372 : vector<8x128xbf16> to vector<1x8x128xbf16>
    tpu.vector_store %arg17[%373, %c0_120, %c0_121], %376 {strides = array<i32>} : memref<8x8x128xbf16, #tpu.memory_space<vmem>>, vector<1x8x128xbf16>,
    %c3_i32_122 = arith.constant 3 : i32
    %377 = arith.index_cast %c3_i32_122 : i32 to index
    %c0_123 = arith.constant 0 : index
    %c0_124 = arith.constant 0 : index
    %378 = vector.load %arg16[%377, %c0_123, %c0_124] : memref<8x8x384xf32, #tpu.memory_space<vmem>>, vector<1x8x384xf32>
    %379 = vector.shape_cast %378 : vector<1x8x384xf32> to vector<8x384xf32>
    %380 = arith.truncf %371 : vector<8x128xf32> to vector<8x128xbf16>
    %c0_125 = arith.constant 0 : index
    %c0_126 = arith.constant 0 : index
    %381 = vector.load %arg8[%c0_125, %c0_126] : memref<128x384xbf16, #tpu.memory_space<vmem>>, vector<128x384xbf16>
    %cst_127 = arith.constant dense<0.000000e+00> : vector<8x384xf32>
    %382 = tpu.matmul %380, %381, %cst_127 {dimension_numbers = #tpu.dot_dimension_numbers<[1], [0], [0], [1], [0, 0, 1, 1], [], []>} : vector<8x128xbf16>, vector<128x384xbf16>, vector<8x384xf32> -> vector<8x384xf32>
    %383 = vector.extract_strided_slice %379 {offsets = [0, 0], sizes = [8, 256], strides = [1, 1]} : vector<8x384xf32> to vector<8x256xf32>
    %384 = vector.extract_strided_slice %382 {offsets = [0, 0], sizes = [8, 256], strides = [1, 1]} : vector<8x384xf32> to vector<8x256xf32>
    %385 = arith.addf %383, %384 : vector<8x256xf32>
    %386 = arith.negf %385 : vector<8x256xf32>
    %387 = math.exp %386 : vector<8x256xf32>
    %cst_128 = arith.constant 1.000000e+00 : f32
    %388 = vector.broadcast %cst_128 : f32 to vector<8x256xf32>
    %389 = arith.addf %388, %387 : vector<8x256xf32>
    %390 = arith.divf %388, %389 : vector<8x256xf32>
    %391 = vector.extract_strided_slice %390 {offsets = [0, 0], sizes = [8, 128], strides = [1, 1]} : vector<8x256xf32> to vector<8x128xf32>
    %392 = vector.extract_strided_slice %390 {offsets = [0, 128], sizes = [8, 128], strides = [1, 1]} : vector<8x256xf32> to vector<8x128xf32>
    %393 = vector.extract_strided_slice %379 {offsets = [0, 256], sizes = [8, 128], strides = [1, 1]} : vector<8x384xf32> to vector<8x128xf32>
    %394 = vector.extract_strided_slice %382 {offsets = [0, 256], sizes = [8, 128], strides = [1, 1]} : vector<8x384xf32> to vector<8x128xf32>
    %395 = arith.addf %394, %285 : vector<8x128xf32>
    %396 = arith.mulf %391, %395 : vector<8x128xf32>
    %397 = arith.addf %393, %396 : vector<8x128xf32>
    %398 = math.tanh %397 : vector<8x128xf32>
    %399 = arith.subf %371, %398 : vector<8x128xf32>
    %400 = arith.mulf %392, %399 : vector<8x128xf32>
    %401 = arith.addf %398, %400 : vector<8x128xf32>
    %402 = arith.truncf %401 : vector<8x128xf32> to vector<8x128xbf16>
    %403 = arith.index_cast %c3_i32_122 : i32 to index
    %c0_129 = arith.constant 0 : index
    %c0_130 = arith.constant 0 : index
    %404 = vector.load %arg17[%403, %c0_129, %c0_130] : memref<8x8x128xbf16, #tpu.memory_space<vmem>>, vector<1x8x128xbf16>
    %405 = vector.shape_cast %404 : vector<1x8x128xbf16> to vector<8x128xbf16>
    %406 = vector.shape_cast %402 : vector<8x128xbf16> to vector<1x8x128xbf16>
    tpu.vector_store %arg17[%403, %c0_129, %c0_130], %406 {strides = array<i32>} : memref<8x8x128xbf16, #tpu.memory_space<vmem>>, vector<1x8x128xbf16>,
    %c4_i32_131 = arith.constant 4 : i32
    %407 = arith.index_cast %c4_i32_131 : i32 to index
    %c0_132 = arith.constant 0 : index
    %c0_133 = arith.constant 0 : index
    %408 = vector.load %arg16[%407, %c0_132, %c0_133] : memref<8x8x384xf32, #tpu.memory_space<vmem>>, vector<1x8x384xf32>
    %409 = vector.shape_cast %408 : vector<1x8x384xf32> to vector<8x384xf32>
    %410 = arith.truncf %401 : vector<8x128xf32> to vector<8x128xbf16>
    %c0_134 = arith.constant 0 : index
    %c0_135 = arith.constant 0 : index
    %411 = vector.load %arg8[%c0_134, %c0_135] : memref<128x384xbf16, #tpu.memory_space<vmem>>, vector<128x384xbf16>
    %cst_136 = arith.constant dense<0.000000e+00> : vector<8x384xf32>
    %412 = tpu.matmul %410, %411, %cst_136 {dimension_numbers = #tpu.dot_dimension_numbers<[1], [0], [0], [1], [0, 0, 1, 1], [], []>} : vector<8x128xbf16>, vector<128x384xbf16>, vector<8x384xf32> -> vector<8x384xf32>
    %413 = vector.extract_strided_slice %409 {offsets = [0, 0], sizes = [8, 256], strides = [1, 1]} : vector<8x384xf32> to vector<8x256xf32>
    %414 = vector.extract_strided_slice %412 {offsets = [0, 0], sizes = [8, 256], strides = [1, 1]} : vector<8x384xf32> to vector<8x256xf32>
    %415 = arith.addf %413, %414 : vector<8x256xf32>
    %416 = arith.negf %415 : vector<8x256xf32>
    %417 = math.exp %416 : vector<8x256xf32>
    %cst_137 = arith.constant 1.000000e+00 : f32
    %418 = vector.broadcast %cst_137 : f32 to vector<8x256xf32>
    %419 = arith.addf %418, %417 : vector<8x256xf32>
    %420 = arith.divf %418, %419 : vector<8x256xf32>
    %421 = vector.extract_strided_slice %420 {offsets = [0, 0], sizes = [8, 128], strides = [1, 1]} : vector<8x256xf32> to vector<8x128xf32>
    %422 = vector.extract_strided_slice %420 {offsets = [0, 128], sizes = [8, 128], strides = [1, 1]} : vector<8x256xf32> to vector<8x128xf32>
    %423 = vector.extract_strided_slice %409 {offsets = [0, 256], sizes = [8, 128], strides = [1, 1]} : vector<8x384xf32> to vector<8x128xf32>
    %424 = vector.extract_strided_slice %412 {offsets = [0, 256], sizes = [8, 128], strides = [1, 1]} : vector<8x384xf32> to vector<8x128xf32>
    %425 = arith.addf %424, %285 : vector<8x128xf32>
    %426 = arith.mulf %421, %425 : vector<8x128xf32>
    %427 = arith.addf %423, %426 : vector<8x128xf32>
    %428 = math.tanh %427 : vector<8x128xf32>
    %429 = arith.subf %401, %428 : vector<8x128xf32>
    %430 = arith.mulf %422, %429 : vector<8x128xf32>
    %431 = arith.addf %428, %430 : vector<8x128xf32>
    %432 = arith.truncf %431 : vector<8x128xf32> to vector<8x128xbf16>
    %433 = arith.index_cast %c4_i32_131 : i32 to index
    %c0_138 = arith.constant 0 : index
    %c0_139 = arith.constant 0 : index
    %434 = vector.load %arg17[%433, %c0_138, %c0_139] : memref<8x8x128xbf16, #tpu.memory_space<vmem>>, vector<1x8x128xbf16>
    %435 = vector.shape_cast %434 : vector<1x8x128xbf16> to vector<8x128xbf16>
    %436 = vector.shape_cast %432 : vector<8x128xbf16> to vector<1x8x128xbf16>
    tpu.vector_store %arg17[%433, %c0_138, %c0_139], %436 {strides = array<i32>} : memref<8x8x128xbf16, #tpu.memory_space<vmem>>, vector<1x8x128xbf16>,
    %c5_i32_140 = arith.constant 5 : i32
    %437 = arith.index_cast %c5_i32_140 : i32 to index
    %c0_141 = arith.constant 0 : index
    %c0_142 = arith.constant 0 : index
    %438 = vector.load %arg16[%437, %c0_141, %c0_142] : memref<8x8x384xf32, #tpu.memory_space<vmem>>, vector<1x8x384xf32>
    %439 = vector.shape_cast %438 : vector<1x8x384xf32> to vector<8x384xf32>
    %440 = arith.truncf %431 : vector<8x128xf32> to vector<8x128xbf16>
    %c0_143 = arith.constant 0 : index
    %c0_144 = arith.constant 0 : index
    %441 = vector.load %arg8[%c0_143, %c0_144] : memref<128x384xbf16, #tpu.memory_space<vmem>>, vector<128x384xbf16>
    %cst_145 = arith.constant dense<0.000000e+00> : vector<8x384xf32>
    %442 = tpu.matmul %440, %441, %cst_145 {dimension_numbers = #tpu.dot_dimension_numbers<[1], [0], [0], [1], [0, 0, 1, 1], [], []>} : vector<8x128xbf16>, vector<128x384xbf16>, vector<8x384xf32> -> vector<8x384xf32>
    %443 = vector.extract_strided_slice %439 {offsets = [0, 0], sizes = [8, 256], strides = [1, 1]} : vector<8x384xf32> to vector<8x256xf32>
    %444 = vector.extract_strided_slice %442 {offsets = [0, 0], sizes = [8, 256], strides = [1, 1]} : vector<8x384xf32> to vector<8x256xf32>
    %445 = arith.addf %443, %444 : vector<8x256xf32>
    %446 = arith.negf %445 : vector<8x256xf32>
    %447 = math.exp %446 : vector<8x256xf32>
    %cst_146 = arith.constant 1.000000e+00 : f32
    %448 = vector.broadcast %cst_146 : f32 to vector<8x256xf32>
    %449 = arith.addf %448, %447 : vector<8x256xf32>
    %450 = arith.divf %448, %449 : vector<8x256xf32>
    %451 = vector.extract_strided_slice %450 {offsets = [0, 0], sizes = [8, 128], strides = [1, 1]} : vector<8x256xf32> to vector<8x128xf32>
    %452 = vector.extract_strided_slice %450 {offsets = [0, 128], sizes = [8, 128], strides = [1, 1]} : vector<8x256xf32> to vector<8x128xf32>
    %453 = vector.extract_strided_slice %439 {offsets = [0, 256], sizes = [8, 128], strides = [1, 1]} : vector<8x384xf32> to vector<8x128xf32>
    %454 = vector.extract_strided_slice %442 {offsets = [0, 256], sizes = [8, 128], strides = [1, 1]} : vector<8x384xf32> to vector<8x128xf32>
    %455 = arith.addf %454, %285 : vector<8x128xf32>
    %456 = arith.mulf %451, %455 : vector<8x128xf32>
    %457 = arith.addf %453, %456 : vector<8x128xf32>
    %458 = math.tanh %457 : vector<8x128xf32>
    %459 = arith.subf %431, %458 : vector<8x128xf32>
    %460 = arith.mulf %452, %459 : vector<8x128xf32>
    %461 = arith.addf %458, %460 : vector<8x128xf32>
    %462 = arith.truncf %461 : vector<8x128xf32> to vector<8x128xbf16>
    %463 = arith.index_cast %c5_i32_140 : i32 to index
    %c0_147 = arith.constant 0 : index
    %c0_148 = arith.constant 0 : index
    %464 = vector.load %arg17[%463, %c0_147, %c0_148] : memref<8x8x128xbf16, #tpu.memory_space<vmem>>, vector<1x8x128xbf16>
    %465 = vector.shape_cast %464 : vector<1x8x128xbf16> to vector<8x128xbf16>
    %466 = vector.shape_cast %462 : vector<8x128xbf16> to vector<1x8x128xbf16>
    tpu.vector_store %arg17[%463, %c0_147, %c0_148], %466 {strides = array<i32>} : memref<8x8x128xbf16, #tpu.memory_space<vmem>>, vector<1x8x128xbf16>,
    %c6_i32_149 = arith.constant 6 : i32
    %467 = arith.index_cast %c6_i32_149 : i32 to index
    %c0_150 = arith.constant 0 : index
    %c0_151 = arith.constant 0 : index
    %468 = vector.load %arg16[%467, %c0_150, %c0_151] : memref<8x8x384xf32, #tpu.memory_space<vmem>>, vector<1x8x384xf32>
    %469 = vector.shape_cast %468 : vector<1x8x384xf32> to vector<8x384xf32>
    %470 = arith.truncf %461 : vector<8x128xf32> to vector<8x128xbf16>
    %c0_152 = arith.constant 0 : index
    %c0_153 = arith.constant 0 : index
    %471 = vector.load %arg8[%c0_152, %c0_153] : memref<128x384xbf16, #tpu.memory_space<vmem>>, vector<128x384xbf16>
    %cst_154 = arith.constant dense<0.000000e+00> : vector<8x384xf32>
    %472 = tpu.matmul %470, %471, %cst_154 {dimension_numbers = #tpu.dot_dimension_numbers<[1], [0], [0], [1], [0, 0, 1, 1], [], []>} : vector<8x128xbf16>, vector<128x384xbf16>, vector<8x384xf32> -> vector<8x384xf32>
    %473 = vector.extract_strided_slice %469 {offsets = [0, 0], sizes = [8, 256], strides = [1, 1]} : vector<8x384xf32> to vector<8x256xf32>
    %474 = vector.extract_strided_slice %472 {offsets = [0, 0], sizes = [8, 256], strides = [1, 1]} : vector<8x384xf32> to vector<8x256xf32>
    %475 = arith.addf %473, %474 : vector<8x256xf32>
    %476 = arith.negf %475 : vector<8x256xf32>
    %477 = math.exp %476 : vector<8x256xf32>
    %cst_155 = arith.constant 1.000000e+00 : f32
    %478 = vector.broadcast %cst_155 : f32 to vector<8x256xf32>
    %479 = arith.addf %478, %477 : vector<8x256xf32>
    %480 = arith.divf %478, %479 : vector<8x256xf32>
    %481 = vector.extract_strided_slice %480 {offsets = [0, 0], sizes = [8, 128], strides = [1, 1]} : vector<8x256xf32> to vector<8x128xf32>
    %482 = vector.extract_strided_slice %480 {offsets = [0, 128], sizes = [8, 128], strides = [1, 1]} : vector<8x256xf32> to vector<8x128xf32>
    %483 = vector.extract_strided_slice %469 {offsets = [0, 256], sizes = [8, 128], strides = [1, 1]} : vector<8x384xf32> to vector<8x128xf32>
    %484 = vector.extract_strided_slice %472 {offsets = [0, 256], sizes = [8, 128], strides = [1, 1]} : vector<8x384xf32> to vector<8x128xf32>
    %485 = arith.addf %484, %285 : vector<8x128xf32>
    %486 = arith.mulf %481, %485 : vector<8x128xf32>
    %487 = arith.addf %483, %486 : vector<8x128xf32>
    %488 = math.tanh %487 : vector<8x128xf32>
    %489 = arith.subf %461, %488 : vector<8x128xf32>
    %490 = arith.mulf %482, %489 : vector<8x128xf32>
    %491 = arith.addf %488, %490 : vector<8x128xf32>
    %492 = arith.truncf %491 : vector<8x128xf32> to vector<8x128xbf16>
    %493 = arith.index_cast %c6_i32_149 : i32 to index
    %c0_156 = arith.constant 0 : index
    %c0_157 = arith.constant 0 : index
    %494 = vector.load %arg17[%493, %c0_156, %c0_157] : memref<8x8x128xbf16, #tpu.memory_space<vmem>>, vector<1x8x128xbf16>
    %495 = vector.shape_cast %494 : vector<1x8x128xbf16> to vector<8x128xbf16>
    %496 = vector.shape_cast %492 : vector<8x128xbf16> to vector<1x8x128xbf16>
    tpu.vector_store %arg17[%493, %c0_156, %c0_157], %496 {strides = array<i32>} : memref<8x8x128xbf16, #tpu.memory_space<vmem>>, vector<1x8x128xbf16>,
    %c7_i32_158 = arith.constant 7 : i32
    %497 = arith.index_cast %c7_i32_158 : i32 to index
    %c0_159 = arith.constant 0 : index
    %c0_160 = arith.constant 0 : index
    %498 = vector.load %arg16[%497, %c0_159, %c0_160] : memref<8x8x384xf32, #tpu.memory_space<vmem>>, vector<1x8x384xf32>
    %499 = vector.shape_cast %498 : vector<1x8x384xf32> to vector<8x384xf32>
    %500 = arith.truncf %491 : vector<8x128xf32> to vector<8x128xbf16>
    %c0_161 = arith.constant 0 : index
    %c0_162 = arith.constant 0 : index
    %501 = vector.load %arg8[%c0_161, %c0_162] : memref<128x384xbf16, #tpu.memory_space<vmem>>, vector<128x384xbf16>
    %cst_163 = arith.constant dense<0.000000e+00> : vector<8x384xf32>
    %502 = tpu.matmul %500, %501, %cst_163 {dimension_numbers = #tpu.dot_dimension_numbers<[1], [0], [0], [1], [0, 0, 1, 1], [], []>} : vector<8x128xbf16>, vector<128x384xbf16>, vector<8x384xf32> -> vector<8x384xf32>
    %503 = vector.extract_strided_slice %499 {offsets = [0, 0], sizes = [8, 256], strides = [1, 1]} : vector<8x384xf32> to vector<8x256xf32>
    %504 = vector.extract_strided_slice %502 {offsets = [0, 0], sizes = [8, 256], strides = [1, 1]} : vector<8x384xf32> to vector<8x256xf32>
    %505 = arith.addf %503, %504 : vector<8x256xf32>
    %506 = arith.negf %505 : vector<8x256xf32>
    %507 = math.exp %506 : vector<8x256xf32>
    %cst_164 = arith.constant 1.000000e+00 : f32
    %508 = vector.broadcast %cst_164 : f32 to vector<8x256xf32>
    %509 = arith.addf %508, %507 : vector<8x256xf32>
    %510 = arith.divf %508, %509 : vector<8x256xf32>
    %511 = vector.extract_strided_slice %510 {offsets = [0, 0], sizes = [8, 128], strides = [1, 1]} : vector<8x256xf32> to vector<8x128xf32>
    %512 = vector.extract_strided_slice %510 {offsets = [0, 128], sizes = [8, 128], strides = [1, 1]} : vector<8x256xf32> to vector<8x128xf32>
    %513 = vector.extract_strided_slice %499 {offsets = [0, 256], sizes = [8, 128], strides = [1, 1]} : vector<8x384xf32> to vector<8x128xf32>
    %514 = vector.extract_strided_slice %502 {offsets = [0, 256], sizes = [8, 128], strides = [1, 1]} : vector<8x384xf32> to vector<8x128xf32>
    %515 = arith.addf %514, %285 : vector<8x128xf32>
    %516 = arith.mulf %511, %515 : vector<8x128xf32>
    %517 = arith.addf %513, %516 : vector<8x128xf32>
    %518 = math.tanh %517 : vector<8x128xf32>
    %519 = arith.subf %491, %518 : vector<8x128xf32>
    %520 = arith.mulf %512, %519 : vector<8x128xf32>
    %521 = arith.addf %518, %520 : vector<8x128xf32>
    %522 = arith.truncf %521 : vector<8x128xf32> to vector<8x128xbf16>
    %523 = arith.index_cast %c7_i32_158 : i32 to index
    %c0_165 = arith.constant 0 : index
    %c0_166 = arith.constant 0 : index
    %524 = vector.load %arg17[%523, %c0_165, %c0_166] : memref<8x8x128xbf16, #tpu.memory_space<vmem>>, vector<1x8x128xbf16>
    %525 = vector.shape_cast %524 : vector<1x8x128xbf16> to vector<8x128xbf16>
    %526 = vector.shape_cast %522 : vector<8x128xbf16> to vector<1x8x128xbf16>
    tpu.vector_store %arg17[%523, %c0_165, %c0_166], %526 {strides = array<i32>} : memref<8x8x128xbf16, #tpu.memory_space<vmem>>, vector<1x8x128xbf16>,
    %c8_i32_167 = arith.constant 8 : i32
    %c0_168 = arith.constant 0 : index
    %c0_169 = arith.constant 0 : index
    %c0_170 = arith.constant 0 : index
    %527 = vector.load %arg17[%c0_168, %c0_169, %c0_170] : memref<8x8x128xbf16, #tpu.memory_space<vmem>>, vector<8x8x128xbf16>
    %528 = vector.shape_cast %527 : vector<8x8x128xbf16> to vector<64x128xbf16>
    %c0_171 = arith.constant 0 : index
    %c0_172 = arith.constant 0 : index
    %529 = vector.load %arg13[%c0_171, %c0_172] : memref<1x384xf32, #tpu.memory_space<vmem>>, vector<1x384xf32>
    %c0_173 = arith.constant 0 : index
    %c0_174 = arith.constant 0 : index
    %530 = vector.load %arg14[%c0_173, %c0_174] : memref<1x384xf32, #tpu.memory_space<vmem>>, vector<1x384xf32>
    %531 = arith.mulf %530, %4 : vector<1x384xf32>
    %532 = arith.addf %529, %531 : vector<1x384xf32>
    %c0_175 = arith.constant 0 : index
    %c0_176 = arith.constant 0 : index
    %533 = vector.load %arg11[%c0_175, %c0_176] : memref<128x384xbf16, #tpu.memory_space<vmem>>, vector<128x384xbf16>
    %cst_177 = arith.constant dense<0.000000e+00> : vector<64x384xf32>
    %534 = tpu.matmul %528, %533, %cst_177 {dimension_numbers = #tpu.dot_dimension_numbers<[1], [0], [0], [1], [0, 0, 1, 1], [], []>} : vector<64x128xbf16>, vector<128x384xbf16>, vector<64x384xf32> -> vector<64x384xf32>
    %535 = vector.broadcast %532 : vector<1x384xf32> to vector<64x384xf32>
    %536 = arith.addf %534, %535 : vector<64x384xf32>
    %537 = vector.shape_cast %536 : vector<64x384xf32> to vector<8x8x384xf32>
    %c0_178 = arith.constant 0 : index
    %c0_179 = arith.constant 0 : index
    %c0_180 = arith.constant 0 : index
    %538 = vector.load %arg16[%c0_178, %c0_179, %c0_180] : memref<8x8x384xf32, #tpu.memory_space<vmem>>, vector<8x8x384xf32>
    tpu.vector_store %arg16[%c0_178, %c0_179, %c0_180], %537 {strides = array<i32>} : memref<8x8x384xf32, #tpu.memory_space<vmem>>, vector<8x8x384xf32>,
    %c0_181 = arith.constant 0 : index
    %c256_182 = arith.constant 256 : index
    %539 = vector.load %arg14[%c0_181, %c256_182] : memref<1x384xf32, #tpu.memory_space<vmem>>, vector<1x128xf32>
    %540 = vector.shape_cast %539 : vector<1x128xf32> to vector<1x128xf32>
    %541 = vector.broadcast %540 : vector<1x128xf32> to vector<8x128xf32>
    %cst_183 = arith.constant 0.000000e+00 : f32
    %542 = vector.broadcast %cst_183 : f32 to vector<8x128xf32>
    %c0_i32_184 = arith.constant 0 : i32
    %543 = arith.index_cast %c0_i32_184 : i32 to index
    %c0_185 = arith.constant 0 : index
    %c0_186 = arith.constant 0 : index
    %544 = vector.load %arg16[%543, %c0_185, %c0_186] : memref<8x8x384xf32, #tpu.memory_space<vmem>>, vector<1x8x384xf32>
    %545 = vector.shape_cast %544 : vector<1x8x384xf32> to vector<8x384xf32>
    %546 = arith.truncf %542 : vector<8x128xf32> to vector<8x128xbf16>
    %c0_187 = arith.constant 0 : index
    %c0_188 = arith.constant 0 : index
    %547 = vector.load %arg12[%c0_187, %c0_188] : memref<128x384xbf16, #tpu.memory_space<vmem>>, vector<128x384xbf16>
    %cst_189 = arith.constant dense<0.000000e+00> : vector<8x384xf32>
    %548 = tpu.matmul %546, %547, %cst_189 {dimension_numbers = #tpu.dot_dimension_numbers<[1], [0], [0], [1], [0, 0, 1, 1], [], []>} : vector<8x128xbf16>, vector<128x384xbf16>, vector<8x384xf32> -> vector<8x384xf32>
    %549 = vector.extract_strided_slice %545 {offsets = [0, 0], sizes = [8, 256], strides = [1, 1]} : vector<8x384xf32> to vector<8x256xf32>
    %550 = vector.extract_strided_slice %548 {offsets = [0, 0], sizes = [8, 256], strides = [1, 1]} : vector<8x384xf32> to vector<8x256xf32>
    %551 = arith.addf %549, %550 : vector<8x256xf32>
    %552 = arith.negf %551 : vector<8x256xf32>
    %553 = math.exp %552 : vector<8x256xf32>
    %cst_190 = arith.constant 1.000000e+00 : f32
    %554 = vector.broadcast %cst_190 : f32 to vector<8x256xf32>
    %555 = arith.addf %554, %553 : vector<8x256xf32>
    %556 = arith.divf %554, %555 : vector<8x256xf32>
    %557 = vector.extract_strided_slice %556 {offsets = [0, 0], sizes = [8, 128], strides = [1, 1]} : vector<8x256xf32> to vector<8x128xf32>
    %558 = vector.extract_strided_slice %556 {offsets = [0, 128], sizes = [8, 128], strides = [1, 1]} : vector<8x256xf32> to vector<8x128xf32>
    %559 = vector.extract_strided_slice %545 {offsets = [0, 256], sizes = [8, 128], strides = [1, 1]} : vector<8x384xf32> to vector<8x128xf32>
    %560 = vector.extract_strided_slice %548 {offsets = [0, 256], sizes = [8, 128], strides = [1, 1]} : vector<8x384xf32> to vector<8x128xf32>
    %561 = arith.addf %560, %541 : vector<8x128xf32>
    %562 = arith.mulf %557, %561 : vector<8x128xf32>
    %563 = arith.addf %559, %562 : vector<8x128xf32>
    %564 = math.tanh %563 : vector<8x128xf32>
    %565 = arith.subf %542, %564 : vector<8x128xf32>
    %566 = arith.mulf %558, %565 : vector<8x128xf32>
    %567 = arith.addf %564, %566 : vector<8x128xf32>
    %568 = arith.truncf %567 : vector<8x128xf32> to vector<8x128xbf16>
    %569 = arith.index_cast %c0_i32_184 : i32 to index
    %c0_191 = arith.constant 0 : index
    %c0_192 = arith.constant 0 : index
    %570 = vector.load %arg17[%569, %c0_191, %c0_192] : memref<8x8x128xbf16, #tpu.memory_space<vmem>>, vector<1x8x128xbf16>
    %571 = vector.shape_cast %570 : vector<1x8x128xbf16> to vector<8x128xbf16>
    %572 = vector.shape_cast %568 : vector<8x128xbf16> to vector<1x8x128xbf16>
    tpu.vector_store %arg17[%569, %c0_191, %c0_192], %572 {strides = array<i32>} : memref<8x8x128xbf16, #tpu.memory_space<vmem>>, vector<1x8x128xbf16>,
    %c1_i32_193 = arith.constant 1 : i32
    %573 = arith.index_cast %c1_i32_193 : i32 to index
    %c0_194 = arith.constant 0 : index
    %c0_195 = arith.constant 0 : index
    %574 = vector.load %arg16[%573, %c0_194, %c0_195] : memref<8x8x384xf32, #tpu.memory_space<vmem>>, vector<1x8x384xf32>
    %575 = vector.shape_cast %574 : vector<1x8x384xf32> to vector<8x384xf32>
    %576 = arith.truncf %567 : vector<8x128xf32> to vector<8x128xbf16>
    %c0_196 = arith.constant 0 : index
    %c0_197 = arith.constant 0 : index
    %577 = vector.load %arg12[%c0_196, %c0_197] : memref<128x384xbf16, #tpu.memory_space<vmem>>, vector<128x384xbf16>
    %cst_198 = arith.constant dense<0.000000e+00> : vector<8x384xf32>
    %578 = tpu.matmul %576, %577, %cst_198 {dimension_numbers = #tpu.dot_dimension_numbers<[1], [0], [0], [1], [0, 0, 1, 1], [], []>} : vector<8x128xbf16>, vector<128x384xbf16>, vector<8x384xf32> -> vector<8x384xf32>
    %579 = vector.extract_strided_slice %575 {offsets = [0, 0], sizes = [8, 256], strides = [1, 1]} : vector<8x384xf32> to vector<8x256xf32>
    %580 = vector.extract_strided_slice %578 {offsets = [0, 0], sizes = [8, 256], strides = [1, 1]} : vector<8x384xf32> to vector<8x256xf32>
    %581 = arith.addf %579, %580 : vector<8x256xf32>
    %582 = arith.negf %581 : vector<8x256xf32>
    %583 = math.exp %582 : vector<8x256xf32>
    %cst_199 = arith.constant 1.000000e+00 : f32
    %584 = vector.broadcast %cst_199 : f32 to vector<8x256xf32>
    %585 = arith.addf %584, %583 : vector<8x256xf32>
    %586 = arith.divf %584, %585 : vector<8x256xf32>
    %587 = vector.extract_strided_slice %586 {offsets = [0, 0], sizes = [8, 128], strides = [1, 1]} : vector<8x256xf32> to vector<8x128xf32>
    %588 = vector.extract_strided_slice %586 {offsets = [0, 128], sizes = [8, 128], strides = [1, 1]} : vector<8x256xf32> to vector<8x128xf32>
    %589 = vector.extract_strided_slice %575 {offsets = [0, 256], sizes = [8, 128], strides = [1, 1]} : vector<8x384xf32> to vector<8x128xf32>
    %590 = vector.extract_strided_slice %578 {offsets = [0, 256], sizes = [8, 128], strides = [1, 1]} : vector<8x384xf32> to vector<8x128xf32>
    %591 = arith.addf %590, %541 : vector<8x128xf32>
    %592 = arith.mulf %587, %591 : vector<8x128xf32>
    %593 = arith.addf %589, %592 : vector<8x128xf32>
    %594 = math.tanh %593 : vector<8x128xf32>
    %595 = arith.subf %567, %594 : vector<8x128xf32>
    %596 = arith.mulf %588, %595 : vector<8x128xf32>
    %597 = arith.addf %594, %596 : vector<8x128xf32>
    %598 = arith.truncf %597 : vector<8x128xf32> to vector<8x128xbf16>
    %599 = arith.index_cast %c1_i32_193 : i32 to index
    %c0_200 = arith.constant 0 : index
    %c0_201 = arith.constant 0 : index
    %600 = vector.load %arg17[%599, %c0_200, %c0_201] : memref<8x8x128xbf16, #tpu.memory_space<vmem>>, vector<1x8x128xbf16>
    %601 = vector.shape_cast %600 : vector<1x8x128xbf16> to vector<8x128xbf16>
    %602 = vector.shape_cast %598 : vector<8x128xbf16> to vector<1x8x128xbf16>
    tpu.vector_store %arg17[%599, %c0_200, %c0_201], %602 {strides = array<i32>} : memref<8x8x128xbf16, #tpu.memory_space<vmem>>, vector<1x8x128xbf16>,
    %c2_i32_202 = arith.constant 2 : i32
    %603 = arith.index_cast %c2_i32_202 : i32 to index
    %c0_203 = arith.constant 0 : index
    %c0_204 = arith.constant 0 : index
    %604 = vector.load %arg16[%603, %c0_203, %c0_204] : memref<8x8x384xf32, #tpu.memory_space<vmem>>, vector<1x8x384xf32>
    %605 = vector.shape_cast %604 : vector<1x8x384xf32> to vector<8x384xf32>
    %606 = arith.truncf %597 : vector<8x128xf32> to vector<8x128xbf16>
    %c0_205 = arith.constant 0 : index
    %c0_206 = arith.constant 0 : index
    %607 = vector.load %arg12[%c0_205, %c0_206] : memref<128x384xbf16, #tpu.memory_space<vmem>>, vector<128x384xbf16>
    %cst_207 = arith.constant dense<0.000000e+00> : vector<8x384xf32>
    %608 = tpu.matmul %606, %607, %cst_207 {dimension_numbers = #tpu.dot_dimension_numbers<[1], [0], [0], [1], [0, 0, 1, 1], [], []>} : vector<8x128xbf16>, vector<128x384xbf16>, vector<8x384xf32> -> vector<8x384xf32>
    %609 = vector.extract_strided_slice %605 {offsets = [0, 0], sizes = [8, 256], strides = [1, 1]} : vector<8x384xf32> to vector<8x256xf32>
    %610 = vector.extract_strided_slice %608 {offsets = [0, 0], sizes = [8, 256], strides = [1, 1]} : vector<8x384xf32> to vector<8x256xf32>
    %611 = arith.addf %609, %610 : vector<8x256xf32>
    %612 = arith.negf %611 : vector<8x256xf32>
    %613 = math.exp %612 : vector<8x256xf32>
    %cst_208 = arith.constant 1.000000e+00 : f32
    %614 = vector.broadcast %cst_208 : f32 to vector<8x256xf32>
    %615 = arith.addf %614, %613 : vector<8x256xf32>
    %616 = arith.divf %614, %615 : vector<8x256xf32>
    %617 = vector.extract_strided_slice %616 {offsets = [0, 0], sizes = [8, 128], strides = [1, 1]} : vector<8x256xf32> to vector<8x128xf32>
    %618 = vector.extract_strided_slice %616 {offsets = [0, 128], sizes = [8, 128], strides = [1, 1]} : vector<8x256xf32> to vector<8x128xf32>
    %619 = vector.extract_strided_slice %605 {offsets = [0, 256], sizes = [8, 128], strides = [1, 1]} : vector<8x384xf32> to vector<8x128xf32>
    %620 = vector.extract_strided_slice %608 {offsets = [0, 256], sizes = [8, 128], strides = [1, 1]} : vector<8x384xf32> to vector<8x128xf32>
    %621 = arith.addf %620, %541 : vector<8x128xf32>
    %622 = arith.mulf %617, %621 : vector<8x128xf32>
    %623 = arith.addf %619, %622 : vector<8x128xf32>
    %624 = math.tanh %623 : vector<8x128xf32>
    %625 = arith.subf %597, %624 : vector<8x128xf32>
    %626 = arith.mulf %618, %625 : vector<8x128xf32>
    %627 = arith.addf %624, %626 : vector<8x128xf32>
    %628 = arith.truncf %627 : vector<8x128xf32> to vector<8x128xbf16>
    %629 = arith.index_cast %c2_i32_202 : i32 to index
    %c0_209 = arith.constant 0 : index
    %c0_210 = arith.constant 0 : index
    %630 = vector.load %arg17[%629, %c0_209, %c0_210] : memref<8x8x128xbf16, #tpu.memory_space<vmem>>, vector<1x8x128xbf16>
    %631 = vector.shape_cast %630 : vector<1x8x128xbf16> to vector<8x128xbf16>
    %632 = vector.shape_cast %628 : vector<8x128xbf16> to vector<1x8x128xbf16>
    tpu.vector_store %arg17[%629, %c0_209, %c0_210], %632 {strides = array<i32>} : memref<8x8x128xbf16, #tpu.memory_space<vmem>>, vector<1x8x128xbf16>,
    %c3_i32_211 = arith.constant 3 : i32
    %633 = arith.index_cast %c3_i32_211 : i32 to index
    %c0_212 = arith.constant 0 : index
    %c0_213 = arith.constant 0 : index
    %634 = vector.load %arg16[%633, %c0_212, %c0_213] : memref<8x8x384xf32, #tpu.memory_space<vmem>>, vector<1x8x384xf32>
    %635 = vector.shape_cast %634 : vector<1x8x384xf32> to vector<8x384xf32>
    %636 = arith.truncf %627 : vector<8x128xf32> to vector<8x128xbf16>
    %c0_214 = arith.constant 0 : index
    %c0_215 = arith.constant 0 : index
    %637 = vector.load %arg12[%c0_214, %c0_215] : memref<128x384xbf16, #tpu.memory_space<vmem>>, vector<128x384xbf16>
    %cst_216 = arith.constant dense<0.000000e+00> : vector<8x384xf32>
    %638 = tpu.matmul %636, %637, %cst_216 {dimension_numbers = #tpu.dot_dimension_numbers<[1], [0], [0], [1], [0, 0, 1, 1], [], []>} : vector<8x128xbf16>, vector<128x384xbf16>, vector<8x384xf32> -> vector<8x384xf32>
    %639 = vector.extract_strided_slice %635 {offsets = [0, 0], sizes = [8, 256], strides = [1, 1]} : vector<8x384xf32> to vector<8x256xf32>
    %640 = vector.extract_strided_slice %638 {offsets = [0, 0], sizes = [8, 256], strides = [1, 1]} : vector<8x384xf32> to vector<8x256xf32>
    %641 = arith.addf %639, %640 : vector<8x256xf32>
    %642 = arith.negf %641 : vector<8x256xf32>
    %643 = math.exp %642 : vector<8x256xf32>
    %cst_217 = arith.constant 1.000000e+00 : f32
    %644 = vector.broadcast %cst_217 : f32 to vector<8x256xf32>
    %645 = arith.addf %644, %643 : vector<8x256xf32>
    %646 = arith.divf %644, %645 : vector<8x256xf32>
    %647 = vector.extract_strided_slice %646 {offsets = [0, 0], sizes = [8, 128], strides = [1, 1]} : vector<8x256xf32> to vector<8x128xf32>
    %648 = vector.extract_strided_slice %646 {offsets = [0, 128], sizes = [8, 128], strides = [1, 1]} : vector<8x256xf32> to vector<8x128xf32>
    %649 = vector.extract_strided_slice %635 {offsets = [0, 256], sizes = [8, 128], strides = [1, 1]} : vector<8x384xf32> to vector<8x128xf32>
    %650 = vector.extract_strided_slice %638 {offsets = [0, 256], sizes = [8, 128], strides = [1, 1]} : vector<8x384xf32> to vector<8x128xf32>
    %651 = arith.addf %650, %541 : vector<8x128xf32>
    %652 = arith.mulf %647, %651 : vector<8x128xf32>
    %653 = arith.addf %649, %652 : vector<8x128xf32>
    %654 = math.tanh %653 : vector<8x128xf32>
    %655 = arith.subf %627, %654 : vector<8x128xf32>
    %656 = arith.mulf %648, %655 : vector<8x128xf32>
    %657 = arith.addf %654, %656 : vector<8x128xf32>
    %658 = arith.truncf %657 : vector<8x128xf32> to vector<8x128xbf16>
    %659 = arith.index_cast %c3_i32_211 : i32 to index
    %c0_218 = arith.constant 0 : index
    %c0_219 = arith.constant 0 : index
    %660 = vector.load %arg17[%659, %c0_218, %c0_219] : memref<8x8x128xbf16, #tpu.memory_space<vmem>>, vector<1x8x128xbf16>
    %661 = vector.shape_cast %660 : vector<1x8x128xbf16> to vector<8x128xbf16>
    %662 = vector.shape_cast %658 : vector<8x128xbf16> to vector<1x8x128xbf16>
    tpu.vector_store %arg17[%659, %c0_218, %c0_219], %662 {strides = array<i32>} : memref<8x8x128xbf16, #tpu.memory_space<vmem>>, vector<1x8x128xbf16>,
    %c4_i32_220 = arith.constant 4 : i32
    %663 = arith.index_cast %c4_i32_220 : i32 to index
    %c0_221 = arith.constant 0 : index
    %c0_222 = arith.constant 0 : index
    %664 = vector.load %arg16[%663, %c0_221, %c0_222] : memref<8x8x384xf32, #tpu.memory_space<vmem>>, vector<1x8x384xf32>
    %665 = vector.shape_cast %664 : vector<1x8x384xf32> to vector<8x384xf32>
    %666 = arith.truncf %657 : vector<8x128xf32> to vector<8x128xbf16>
    %c0_223 = arith.constant 0 : index
    %c0_224 = arith.constant 0 : index
    %667 = vector.load %arg12[%c0_223, %c0_224] : memref<128x384xbf16, #tpu.memory_space<vmem>>, vector<128x384xbf16>
    %cst_225 = arith.constant dense<0.000000e+00> : vector<8x384xf32>
    %668 = tpu.matmul %666, %667, %cst_225 {dimension_numbers = #tpu.dot_dimension_numbers<[1], [0], [0], [1], [0, 0, 1, 1], [], []>} : vector<8x128xbf16>, vector<128x384xbf16>, vector<8x384xf32> -> vector<8x384xf32>
    %669 = vector.extract_strided_slice %665 {offsets = [0, 0], sizes = [8, 256], strides = [1, 1]} : vector<8x384xf32> to vector<8x256xf32>
    %670 = vector.extract_strided_slice %668 {offsets = [0, 0], sizes = [8, 256], strides = [1, 1]} : vector<8x384xf32> to vector<8x256xf32>
    %671 = arith.addf %669, %670 : vector<8x256xf32>
    %672 = arith.negf %671 : vector<8x256xf32>
    %673 = math.exp %672 : vector<8x256xf32>
    %cst_226 = arith.constant 1.000000e+00 : f32
    %674 = vector.broadcast %cst_226 : f32 to vector<8x256xf32>
    %675 = arith.addf %674, %673 : vector<8x256xf32>
    %676 = arith.divf %674, %675 : vector<8x256xf32>
    %677 = vector.extract_strided_slice %676 {offsets = [0, 0], sizes = [8, 128], strides = [1, 1]} : vector<8x256xf32> to vector<8x128xf32>
    %678 = vector.extract_strided_slice %676 {offsets = [0, 128], sizes = [8, 128], strides = [1, 1]} : vector<8x256xf32> to vector<8x128xf32>
    %679 = vector.extract_strided_slice %665 {offsets = [0, 256], sizes = [8, 128], strides = [1, 1]} : vector<8x384xf32> to vector<8x128xf32>
    %680 = vector.extract_strided_slice %668 {offsets = [0, 256], sizes = [8, 128], strides = [1, 1]} : vector<8x384xf32> to vector<8x128xf32>
    %681 = arith.addf %680, %541 : vector<8x128xf32>
    %682 = arith.mulf %677, %681 : vector<8x128xf32>
    %683 = arith.addf %679, %682 : vector<8x128xf32>
    %684 = math.tanh %683 : vector<8x128xf32>
    %685 = arith.subf %657, %684 : vector<8x128xf32>
    %686 = arith.mulf %678, %685 : vector<8x128xf32>
    %687 = arith.addf %684, %686 : vector<8x128xf32>
    %688 = arith.truncf %687 : vector<8x128xf32> to vector<8x128xbf16>
    %689 = arith.index_cast %c4_i32_220 : i32 to index
    %c0_227 = arith.constant 0 : index
    %c0_228 = arith.constant 0 : index
    %690 = vector.load %arg17[%689, %c0_227, %c0_228] : memref<8x8x128xbf16, #tpu.memory_space<vmem>>, vector<1x8x128xbf16>
    %691 = vector.shape_cast %690 : vector<1x8x128xbf16> to vector<8x128xbf16>
    %692 = vector.shape_cast %688 : vector<8x128xbf16> to vector<1x8x128xbf16>
    tpu.vector_store %arg17[%689, %c0_227, %c0_228], %692 {strides = array<i32>} : memref<8x8x128xbf16, #tpu.memory_space<vmem>>, vector<1x8x128xbf16>,
    %c5_i32_229 = arith.constant 5 : i32
    %693 = arith.index_cast %c5_i32_229 : i32 to index
    %c0_230 = arith.constant 0 : index
    %c0_231 = arith.constant 0 : index
    %694 = vector.load %arg16[%693, %c0_230, %c0_231] : memref<8x8x384xf32, #tpu.memory_space<vmem>>, vector<1x8x384xf32>
    %695 = vector.shape_cast %694 : vector<1x8x384xf32> to vector<8x384xf32>
    %696 = arith.truncf %687 : vector<8x128xf32> to vector<8x128xbf16>
    %c0_232 = arith.constant 0 : index
    %c0_233 = arith.constant 0 : index
    %697 = vector.load %arg12[%c0_232, %c0_233] : memref<128x384xbf16, #tpu.memory_space<vmem>>, vector<128x384xbf16>
    %cst_234 = arith.constant dense<0.000000e+00> : vector<8x384xf32>
    %698 = tpu.matmul %696, %697, %cst_234 {dimension_numbers = #tpu.dot_dimension_numbers<[1], [0], [0], [1], [0, 0, 1, 1], [], []>} : vector<8x128xbf16>, vector<128x384xbf16>, vector<8x384xf32> -> vector<8x384xf32>
    %699 = vector.extract_strided_slice %695 {offsets = [0, 0], sizes = [8, 256], strides = [1, 1]} : vector<8x384xf32> to vector<8x256xf32>
    %700 = vector.extract_strided_slice %698 {offsets = [0, 0], sizes = [8, 256], strides = [1, 1]} : vector<8x384xf32> to vector<8x256xf32>
    %701 = arith.addf %699, %700 : vector<8x256xf32>
    %702 = arith.negf %701 : vector<8x256xf32>
    %703 = math.exp %702 : vector<8x256xf32>
    %cst_235 = arith.constant 1.000000e+00 : f32
    %704 = vector.broadcast %cst_235 : f32 to vector<8x256xf32>
    %705 = arith.addf %704, %703 : vector<8x256xf32>
    %706 = arith.divf %704, %705 : vector<8x256xf32>
    %707 = vector.extract_strided_slice %706 {offsets = [0, 0], sizes = [8, 128], strides = [1, 1]} : vector<8x256xf32> to vector<8x128xf32>
    %708 = vector.extract_strided_slice %706 {offsets = [0, 128], sizes = [8, 128], strides = [1, 1]} : vector<8x256xf32> to vector<8x128xf32>
    %709 = vector.extract_strided_slice %695 {offsets = [0, 256], sizes = [8, 128], strides = [1, 1]} : vector<8x384xf32> to vector<8x128xf32>
    %710 = vector.extract_strided_slice %698 {offsets = [0, 256], sizes = [8, 128], strides = [1, 1]} : vector<8x384xf32> to vector<8x128xf32>
    %711 = arith.addf %710, %541 : vector<8x128xf32>
    %712 = arith.mulf %707, %711 : vector<8x128xf32>
    %713 = arith.addf %709, %712 : vector<8x128xf32>
    %714 = math.tanh %713 : vector<8x128xf32>
    %715 = arith.subf %687, %714 : vector<8x128xf32>
    %716 = arith.mulf %708, %715 : vector<8x128xf32>
    %717 = arith.addf %714, %716 : vector<8x128xf32>
    %718 = arith.truncf %717 : vector<8x128xf32> to vector<8x128xbf16>
    %719 = arith.index_cast %c5_i32_229 : i32 to index
    %c0_236 = arith.constant 0 : index
    %c0_237 = arith.constant 0 : index
    %720 = vector.load %arg17[%719, %c0_236, %c0_237] : memref<8x8x128xbf16, #tpu.memory_space<vmem>>, vector<1x8x128xbf16>
    %721 = vector.shape_cast %720 : vector<1x8x128xbf16> to vector<8x128xbf16>
    %722 = vector.shape_cast %718 : vector<8x128xbf16> to vector<1x8x128xbf16>
    tpu.vector_store %arg17[%719, %c0_236, %c0_237], %722 {strides = array<i32>} : memref<8x8x128xbf16, #tpu.memory_space<vmem>>, vector<1x8x128xbf16>,
    %c6_i32_238 = arith.constant 6 : i32
    %723 = arith.index_cast %c6_i32_238 : i32 to index
    %c0_239 = arith.constant 0 : index
    %c0_240 = arith.constant 0 : index
    %724 = vector.load %arg16[%723, %c0_239, %c0_240] : memref<8x8x384xf32, #tpu.memory_space<vmem>>, vector<1x8x384xf32>
    %725 = vector.shape_cast %724 : vector<1x8x384xf32> to vector<8x384xf32>
    %726 = arith.truncf %717 : vector<8x128xf32> to vector<8x128xbf16>
    %c0_241 = arith.constant 0 : index
    %c0_242 = arith.constant 0 : index
    %727 = vector.load %arg12[%c0_241, %c0_242] : memref<128x384xbf16, #tpu.memory_space<vmem>>, vector<128x384xbf16>
    %cst_243 = arith.constant dense<0.000000e+00> : vector<8x384xf32>
    %728 = tpu.matmul %726, %727, %cst_243 {dimension_numbers = #tpu.dot_dimension_numbers<[1], [0], [0], [1], [0, 0, 1, 1], [], []>} : vector<8x128xbf16>, vector<128x384xbf16>, vector<8x384xf32> -> vector<8x384xf32>
    %729 = vector.extract_strided_slice %725 {offsets = [0, 0], sizes = [8, 256], strides = [1, 1]} : vector<8x384xf32> to vector<8x256xf32>
    %730 = vector.extract_strided_slice %728 {offsets = [0, 0], sizes = [8, 256], strides = [1, 1]} : vector<8x384xf32> to vector<8x256xf32>
    %731 = arith.addf %729, %730 : vector<8x256xf32>
    %732 = arith.negf %731 : vector<8x256xf32>
    %733 = math.exp %732 : vector<8x256xf32>
    %cst_244 = arith.constant 1.000000e+00 : f32
    %734 = vector.broadcast %cst_244 : f32 to vector<8x256xf32>
    %735 = arith.addf %734, %733 : vector<8x256xf32>
    %736 = arith.divf %734, %735 : vector<8x256xf32>
    %737 = vector.extract_strided_slice %736 {offsets = [0, 0], sizes = [8, 128], strides = [1, 1]} : vector<8x256xf32> to vector<8x128xf32>
    %738 = vector.extract_strided_slice %736 {offsets = [0, 128], sizes = [8, 128], strides = [1, 1]} : vector<8x256xf32> to vector<8x128xf32>
    %739 = vector.extract_strided_slice %725 {offsets = [0, 256], sizes = [8, 128], strides = [1, 1]} : vector<8x384xf32> to vector<8x128xf32>
    %740 = vector.extract_strided_slice %728 {offsets = [0, 256], sizes = [8, 128], strides = [1, 1]} : vector<8x384xf32> to vector<8x128xf32>
    %741 = arith.addf %740, %541 : vector<8x128xf32>
    %742 = arith.mulf %737, %741 : vector<8x128xf32>
    %743 = arith.addf %739, %742 : vector<8x128xf32>
    %744 = math.tanh %743 : vector<8x128xf32>
    %745 = arith.subf %717, %744 : vector<8x128xf32>
    %746 = arith.mulf %738, %745 : vector<8x128xf32>
    %747 = arith.addf %744, %746 : vector<8x128xf32>
    %748 = arith.truncf %747 : vector<8x128xf32> to vector<8x128xbf16>
    %749 = arith.index_cast %c6_i32_238 : i32 to index
    %c0_245 = arith.constant 0 : index
    %c0_246 = arith.constant 0 : index
    %750 = vector.load %arg17[%749, %c0_245, %c0_246] : memref<8x8x128xbf16, #tpu.memory_space<vmem>>, vector<1x8x128xbf16>
    %751 = vector.shape_cast %750 : vector<1x8x128xbf16> to vector<8x128xbf16>
    %752 = vector.shape_cast %748 : vector<8x128xbf16> to vector<1x8x128xbf16>
    tpu.vector_store %arg17[%749, %c0_245, %c0_246], %752 {strides = array<i32>} : memref<8x8x128xbf16, #tpu.memory_space<vmem>>, vector<1x8x128xbf16>,
    %c7_i32_247 = arith.constant 7 : i32
    %753 = arith.index_cast %c7_i32_247 : i32 to index
    %c0_248 = arith.constant 0 : index
    %c0_249 = arith.constant 0 : index
    %754 = vector.load %arg16[%753, %c0_248, %c0_249] : memref<8x8x384xf32, #tpu.memory_space<vmem>>, vector<1x8x384xf32>
    %755 = vector.shape_cast %754 : vector<1x8x384xf32> to vector<8x384xf32>
    %756 = arith.truncf %747 : vector<8x128xf32> to vector<8x128xbf16>
    %c0_250 = arith.constant 0 : index
    %c0_251 = arith.constant 0 : index
    %757 = vector.load %arg12[%c0_250, %c0_251] : memref<128x384xbf16, #tpu.memory_space<vmem>>, vector<128x384xbf16>
    %cst_252 = arith.constant dense<0.000000e+00> : vector<8x384xf32>
    %758 = tpu.matmul %756, %757, %cst_252 {dimension_numbers = #tpu.dot_dimension_numbers<[1], [0], [0], [1], [0, 0, 1, 1], [], []>} : vector<8x128xbf16>, vector<128x384xbf16>, vector<8x384xf32> -> vector<8x384xf32>
    %759 = vector.extract_strided_slice %755 {offsets = [0, 0], sizes = [8, 256], strides = [1, 1]} : vector<8x384xf32> to vector<8x256xf32>
    %760 = vector.extract_strided_slice %758 {offsets = [0, 0], sizes = [8, 256], strides = [1, 1]} : vector<8x384xf32> to vector<8x256xf32>
    %761 = arith.addf %759, %760 : vector<8x256xf32>
    %762 = arith.negf %761 : vector<8x256xf32>
    %763 = math.exp %762 : vector<8x256xf32>
    %cst_253 = arith.constant 1.000000e+00 : f32
    %764 = vector.broadcast %cst_253 : f32 to vector<8x256xf32>
    %765 = arith.addf %764, %763 : vector<8x256xf32>
    %766 = arith.divf %764, %765 : vector<8x256xf32>
    %767 = vector.extract_strided_slice %766 {offsets = [0, 0], sizes = [8, 128], strides = [1, 1]} : vector<8x256xf32> to vector<8x128xf32>
    %768 = vector.extract_strided_slice %766 {offsets = [0, 128], sizes = [8, 128], strides = [1, 1]} : vector<8x256xf32> to vector<8x128xf32>
    %769 = vector.extract_strided_slice %755 {offsets = [0, 256], sizes = [8, 128], strides = [1, 1]} : vector<8x384xf32> to vector<8x128xf32>
    %770 = vector.extract_strided_slice %758 {offsets = [0, 256], sizes = [8, 128], strides = [1, 1]} : vector<8x384xf32> to vector<8x128xf32>
    %771 = arith.addf %770, %541 : vector<8x128xf32>
    %772 = arith.mulf %767, %771 : vector<8x128xf32>
    %773 = arith.addf %769, %772 : vector<8x128xf32>
    %774 = math.tanh %773 : vector<8x128xf32>
    %775 = arith.subf %747, %774 : vector<8x128xf32>
    %776 = arith.mulf %768, %775 : vector<8x128xf32>
    %777 = arith.addf %774, %776 : vector<8x128xf32>
    %778 = arith.truncf %777 : vector<8x128xf32> to vector<8x128xbf16>
    %779 = arith.index_cast %c7_i32_247 : i32 to index
    %c0_254 = arith.constant 0 : index
    %c0_255 = arith.constant 0 : index
    %780 = vector.load %arg17[%779, %c0_254, %c0_255] : memref<8x8x128xbf16, #tpu.memory_space<vmem>>, vector<1x8x128xbf16>
    %781 = vector.shape_cast %780 : vector<1x8x128xbf16> to vector<8x128xbf16>
    %782 = vector.shape_cast %778 : vector<8x128xbf16> to vector<1x8x128xbf16>
    tpu.vector_store %arg17[%779, %c0_254, %c0_255], %782 {strides = array<i32>} : memref<8x8x128xbf16, #tpu.memory_space<vmem>>, vector<1x8x128xbf16>,
    %c8_i32_256 = arith.constant 8 : i32
    %c0_257 = arith.constant 0 : index
    %c0_258 = arith.constant 0 : index
    %783 = vector.load %arg15[%c0_257, %c0_258] : memref<8x128xf32, #tpu.memory_space<vmem>>, vector<8x128xf32>
    tpu.vector_store %arg15[%c0_257, %c0_258], %777 {strides = array<i32>} : memref<8x128xf32, #tpu.memory_space<vmem>>, vector<8x128xf32>,
    return
  }
  func.func @transform_0(%arg0: i32) -> (i32, i32, i32) {
    %c0_i32 = arith.constant 0 : i32
    %c0_i32_0 = arith.constant 0 : i32
    %c0_i32_1 = arith.constant 0 : i32
    return %c0_i32, %arg0, %c0_i32_0 : i32, i32, i32
  }
  func.func @transform_1(%arg0: i32) -> (i32, i32, i32) {
    %c0_i32 = arith.constant 0 : i32
    %c0_i32_0 = arith.constant 0 : i32
    %c0_i32_1 = arith.constant 0 : i32
    return %c0_i32, %arg0, %c0_i32_0 : i32, i32, i32
  }
  func.func @transform_2(%arg0: i32) -> (i32, i32) {
    %c0_i32 = arith.constant 0 : i32
    %c0_i32_0 = arith.constant 0 : i32
    %c0_i32_1 = arith.constant 0 : i32
    return %c0_i32, %c0_i32_0 : i32, i32
  }
  func.func @transform_3(%arg0: i32) -> (i32, i32) {
    %c0_i32 = arith.constant 0 : i32
    %c0_i32_0 = arith.constant 0 : i32
    %c0_i32_1 = arith.constant 0 : i32
    return %c0_i32, %c0_i32_0 : i32, i32
  }
  func.func @transform_4(%arg0: i32) -> (i32, i32) {
    %c0_i32 = arith.constant 0 : i32
    %c0_i32_0 = arith.constant 0 : i32
    %c0_i32_1 = arith.constant 0 : i32
    return %c0_i32, %c0_i32_0 : i32, i32
  }
  func.func @transform_5(%arg0: i32) -> (i32, i32) {
    %c0_i32 = arith.constant 0 : i32
    %c0_i32_0 = arith.constant 0 : i32
    %c0_i32_1 = arith.constant 0 : i32
    return %c0_i32, %c0_i32_0 : i32, i32
  }
  func.func @transform_6(%arg0: i32) -> (i32, i32) {
    %c0_i32 = arith.constant 0 : i32
    %c0_i32_0 = arith.constant 0 : i32
    %c0_i32_1 = arith.constant 0 : i32
    return %c0_i32, %c0_i32_0 : i32, i32
  }
  func.func @transform_7(%arg0: i32) -> (i32, i32) {
    %c0_i32 = arith.constant 0 : i32
    %c0_i32_0 = arith.constant 0 : i32
    %c0_i32_1 = arith.constant 0 : i32
    return %c0_i32, %c0_i32_0 : i32, i32
  }
  func.func @transform_8(%arg0: i32) -> (i32, i32) {
    %c0_i32 = arith.constant 0 : i32
    %c0_i32_0 = arith.constant 0 : i32
    %c0_i32_1 = arith.constant 0 : i32
    return %c0_i32, %c0_i32_0 : i32, i32
  }
  func.func @transform_9(%arg0: i32) -> (i32, i32) {
    %c0_i32 = arith.constant 0 : i32
    %c0_i32_0 = arith.constant 0 : i32
    %c0_i32_1 = arith.constant 0 : i32
    return %c0_i32, %c0_i32_0 : i32, i32
  }
  func.func @transform_10(%arg0: i32) -> (i32, i32) {
    %c0_i32 = arith.constant 0 : i32
    %c0_i32_0 = arith.constant 0 : i32
    %c0_i32_1 = arith.constant 0 : i32
    return %c0_i32, %c0_i32_0 : i32, i32
  }
  func.func @transform_11(%arg0: i32) -> (i32, i32) {
    %c0_i32 = arith.constant 0 : i32
    %c0_i32_0 = arith.constant 0 : i32
    %c0_i32_1 = arith.constant 0 : i32
    return %c0_i32, %c0_i32_0 : i32, i32
  }
  func.func @transform_12(%arg0: i32) -> (i32, i32) {
    %c0_i32 = arith.constant 0 : i32
    %c0_i32_0 = arith.constant 0 : i32
    %c0_i32_1 = arith.constant 0 : i32
    return %c0_i32, %c0_i32_0 : i32, i32
  }
  func.func @transform_13(%arg0: i32) -> (i32, i32) {
    %c0_i32 = arith.constant 0 : i32
    %c0_i32_0 = arith.constant 0 : i32
    %c0_i32_1 = arith.constant 0 : i32
    return %c0_i32, %c0_i32_0 : i32, i32
  }
  func.func @transform_14(%arg0: i32) -> (i32, i32) {
    %c0_i32 = arith.constant 0 : i32
    %c0_i32_0 = arith.constant 0 : i32
    return %arg0, %c0_i32 : i32, i32
  }
}

</mosaic_0001>

<bundles_post_ra>
// kernel: tpu_custom_call.1
= control target key start
LH: loop header
LB: loop body
LE: loop exit
PB: predicated region body
PF: predicated region fallthrough
CT: control target
= control target key end

     0   :  { %s12858_s0 = inlined_call_operand.vmem [shape: f32[8,16,1], index: 0, kind: input, shape index: {}]   ;;  %s12859_s1 = inlined_call_operand.vmem [shape: f32[8,16,1], index: 1, kind: input, shape index: {}]   ;;  %s12860_s2 = inlined_call_operand.vmem [shape: f32[2,384], index: 2, kind: input, shape index: {}]   ;;  %s12861_s3 = inlined_call_operand.vmem [shape: bf16[128,384], index: 3, kind: input, shape index: {}]   ;;  %s12862_s4 = inlined_call_operand.vmem [shape: f32[1,384], index: 4, kind: input, shape index: {}]   ;;  %s12863_s5 = inlined_call_operand.vmem [shape: f32[1,384], index: 5, kind: input, shape index: {}]   ;;  %s12864_s6 = inlined_call_operand.hbm [shape: bf16[128,384], index: 6, kind: input, shape index: {}]   ;;  %s12865_s7 = inlined_call_operand.hbm [shape: bf16[128,384], index: 7, kind: input, shape index: {}]   ;;  %s12866_s8 = inlined_call_operand.vmem [shape: f32[1,384], index: 8, kind: input, shape index: {}]   ;;  %s12867_s9 = inlined_call_operand.vmem [shape: f32[1,384], index: 9, kind: input, shape index: {}]   ;;  %s12868_s10 = inlined_call_operand.hbm [shape: bf16[128,384], index: 10, kind: input, shape index: {}]   ;;  %s12869_s11 = inlined_call_operand.hbm [shape: bf16[128,384], index: 11, kind: input, shape index: {}]   ;;  %s12870_s12 = inlined_call_operand.vmem [shape: f32[1,384], index: 12, kind: input, shape index: {}]   ;;  %s12871_s13 = inlined_call_operand.vmem [shape: f32[1,384], index: 13, kind: input, shape index: {}]   ;;  %s12872_s14 = inlined_call_operand.hbm [shape: f32[16,128], index: 14, kind: output, shape index: {}]  }
   0x1   :  { %12889 = sst [smem:[#allocation24_spill]] %s12862_s4 }
   0x2   :  { %12890 = sst [smem:[#allocation25_spill]] %s12866_s8 }
   0x3   :  { %12891 = sst [smem:[#allocation26_spill]] %s12867_s9 }
   0x4   :  { %12892 = sst [smem:[#allocation27_spill]] %s12870_s12 }
   0x5   :  { %12893 = sst [smem:[#allocation28_spill]] %s12871_s13 }
   0x6   :  { %12894 = sst [smem:[#allocation29_spill]] %s12872_s14 }
   0x7   :  { %19 = vsyncpa [#allocation7], 0 }
   0x8   :  { %20 = vsyncpa [#allocation10], 0 }
   0x9   :  { %21 = vsyncpa [#allocation13], 0 }
   0xa   :  { %22 = vsyncpa [#allocation8], 0 }
   0xb   :  { %24 = vsyncpa [#allocation8 + $0x1], 0  ;;  %s10836_s29 = smov 0   ;;  %s10838_s30 = smov 0  }
   0xc   :  { %s10840_s15 = smov 0   ;;  %s10842_s16 = smov 0  }
   0xd LB: > { %12895 = sst [smem:[#allocation19_spill]] %s10735_s29  ;;  %s10857_s17 = sadd.s32 4294967295, %s10747_s16   ;;  %s10747_s16 = sphi %s10842_s16, %s12930_s16   ;;  %s10743_s15 = sphi %s10840_s15, %s12934_s15   ;;  %s10739_s30 = sphi %s10838_s30, %s12933_s30   ;;  %s10735_s29 = sphi %s10836_s29, %s12932_s29  }
   0xe   : > { %s8332_s18 = sadd.s32 4294967294, %s10747_s16   ;;  %s10861_s19 = sadd.s32 1, %s10747_s16  }
   0xf   : > { %12896 = sst [smem:[#allocation20_spill]] %s10861_s19  ;;  %s37_s20 = sadd.s32 1, %s10743_s15 }
  0x10   : > { %s34_s21 = ssub.s32 %s10747_s16, %s10861_s19  ;;  %p44_p0 = scmp.ne.s32.totalorder %s10743_s15, %s10739_s30 }
  0x11   : > { %p35_p1 = scmp.eq.s32.totalorder %s34_s21, 0  ;;  %p45_p2 = scmp.eq.s32.totalorder %s10747_s16, 0 }
  0x12   : > { %p352_p3 = scmp.eq.s32.totalorder %s10857_s17, 1  ;;  %p357_p4 = scmp.ne.s32.totalorder %s10739_s30, %s10735_s29 }
  0x13   : > { %s10873_s22 = scalar_select %p35_p1, %s10743_s15, %s37_s20  }
  0x14   : > { %p10875_p5 = por %p45_p2, %p44_p0  ;;  %p10879_p6 = por %p352_p3, %p44_p0 }
  0x15   : > { %12897 = sst [smem:[#allocation21_spill]] %s10873_s22  ;;  %p358_p7 = scmp.eq.s32.totalorder %s8332_s18, 1 }
  0x16   : > { %s12898_s23 = scalar_select %p10875_p5, 1, 0 }
  0x17   : > { %s12899_s24 = scalar_select %p10879_p6, 1, 0 }
  0x18   : > { %p8333_p8 = scmp.ge.s32.totalorder %s10747_s16, 1  ;;  %p365_p9 = scmp.lt.s32.totalorder %s10747_s16, 3 }
  0x19   : > { %12900 = sst [smem:[#allocation22_spill]] %s12899_s24  ;;  %p10885_p10 = por %p358_p7, %p357_p4 }
  0x1a   : > { %p12880_p11 = scmp.eq.s32.totalorder %s10857_s17, 0  ;;  %p10890_p12 = pnand %p8333_p8, %p365_p9 }
  0x1b   : > { %s12901_s25 = scalar_select %p10885_p10, 1, 0 }
  0x1c   : > { %s12903_s26 = scalar_select %p10890_p12, 1, 0 }
  0x1d   : > { %12902 = sst [smem:[#allocation23_spill]] %s12901_s25  ;;  %p9824_p13 = pneg %p10890_p12 }
  0x1e   : > { %s10749_s27 = smov [#allocation9]   ;;  %s10750_s20 = smov [#allocation6]  }
  0x1f   : > { %s402_s28 = sshll.u32 %s10749_s27, 4  ;;  %p10900_p0 = pnand %p12880_p11, %p9824_p13  ;;  %s10896_s28 = int_to_ptr.vmem [resolvable:$true] %s402_s28 }
  0x20   : > { %s389_s21 = sshll.u32 %s10750_s20, 4  ;;  %s10751_s22 = smov [#allocation11]   ;;  %s10904_s21 = int_to_ptr.vmem [resolvable:$true] %s389_s21 }
  0x21   : > { %s10906_s19 = sshll.u32 %s10751_s22, 4  ;;  %s10561_s14 = scalar_lea.hbm %s12865_s7, 3072  ;;  %s422_s19 = int_to_ptr.vmem [resolvable:$true] %s10906_s19 }
  0x22   : > { %p10562_p1 = scmp.ne.s32.totalorder %s12865_s7, %s10561_s14  ;;  %p10916_p2 = pneg %p10900_p0 }
  0x23   : > { %p10568_p7 = scmp.lt.u32.totalorder %s10561_s14, %s12865_s7 }
  0x24   : > { %p10564_p3 = pnand %p10916_p2, %p10562_p1 }
  0x26   : > { %p10565_p4 = pneg %p10564_p3 }
  0x28   : > { %p10570_p8 = pnand %p10568_p7, %p10565_p4 }
  0x2a   : > { %10573 = shalt.err (!%p10570_p8)
}
  0x2b   : > { %s10574_s29 = scalar_lea.vmem %s10896_s28, 3072  ;;  %p10582_p10 = scmp.lt.s32.totalorder %s10896_s28, %s10896_s28 }
  0x2c   : > { %p10575_p9 = scmp.ne.s32.totalorder %s10896_s28, %s10574_s29  ;;  %p10583_p6 = scmp.lt.s32.totalorder %s10574_s29, %s10574_s29 }
  0x2e   : > { %p10577_p13 = pnand %p10575_p9, %p10916_p2  ;;  %p10584_p1 = por %p10583_p6, %p10582_p10 }
  0x30   : > { %p10578_p11 = pneg %p10577_p13 }
  0x32   : > { %p10585_p3 = pnand %p10584_p1, %p10578_p11 }
  0x34   : > { %10588 = shalt.err (!%p10585_p3)
}
  0x35   : > { %s10752_s24 = smov 192   ;;  %s10753_s14 = smov 12  }
  0x36   : > { %9830 = dma.hbm_to_vmem [thread:$0]  (!%p10900_p0), %s12865_s7, 3072, %s10896_s28, [#allocation10], %s10752_s24, %s10752_s24, %s10753_s14  }
  0x37   : > { %s10589_s29 = scalar_lea.hbm %s12864_s6, 3072 }
  0x38   : > { %p10590_p6 = scmp.ne.s32.totalorder %s12864_s6, %s10589_s29  ;;  %p10596_p4 = scmp.lt.u32.totalorder %s10589_s29, %s12864_s6 }
  0x3a   : > { %p10592_p10 = pnand %p10590_p6, %p10916_p2 }
  0x3c   : > { %p10593_p11 = pneg %p10592_p10 }
  0x3e   : > { %p10598_p7 = pnand %p10596_p4, %p10593_p11 }
  0x40   : > { %10601 = shalt.err (!%p10598_p7)
}
  0x41   : > { %s10602_s28 = scalar_lea.vmem %s10904_s21, 3072  ;;  %p10610_p1 = scmp.lt.s32.totalorder %s10904_s21, %s10904_s21 }
  0x42   : > { %p10603_p8 = scmp.ne.s32.totalorder %s10904_s21, %s10602_s28  ;;  %p10611_p3 = scmp.lt.s32.totalorder %s10602_s28, %s10602_s28 }
  0x44   : > { %p10605_p9 = pnand %p10603_p8, %p10916_p2  ;;  %p10612_p6 = por %p10611_p3, %p10610_p1 }
  0x46   : > { %p10606_p13 = pneg %p10605_p9 }
  0x48   : > { %p10613_p10 = pnand %p10612_p6, %p10606_p13 }
  0x4a   : > { %10616 = shalt.err (!%p10613_p10)
}
  0x4b   : > { %9827 = dma.hbm_to_vmem [thread:$0]  (!%p10900_p0), %s12864_s6, 3072, %s10904_s21, [#allocation7], %s10752_s24, %s10752_s24, %s10753_s14  }
  0x4c   : > { %s10617_s25 = scalar_lea.hbm %s12868_s10, 3072 }
  0x4d   : > { %p10618_p11 = scmp.ne.s32.totalorder %s12868_s10, %s10617_s25  ;;  %p10624_p8 = scmp.lt.u32.totalorder %s10617_s25, %s12868_s10 }
  0x4f   : > { %p10620_p4 = pnand %p10618_p11, %p10916_p2 }
  0x51   : > { %p10621_p7 = pneg %p10620_p4 }
  0x53   : > { %p10626_p9 = pnand %p10624_p8, %p10621_p7 }
  0x55   : > { %10629 = shalt.err (!%p10626_p9)
}
  0x56   : > { %s10630_s28 = scalar_lea.vmem %s422_s19, 3072  ;;  %p10638_p6 = scmp.lt.s32.totalorder %s422_s19, %s422_s19 }
  0x57   : > { %p10631_p13 = scmp.ne.s32.totalorder %s422_s19, %s10630_s28  ;;  %p10639_p10 = scmp.lt.s32.totalorder %s10630_s28, %s10630_s28 }
  0x59   : > { %p10633_p1 = pnand %p10631_p13, %p10916_p2  ;;  %p10640_p12 = por %p10639_p10, %p10638_p6 }
  0x5b   : > { %p10634_p3 = pneg %p10633_p1 }
  0x5d   : > { %p10641_p5 = pnand %p10640_p12, %p10634_p3 }
  0x5f   : > { %10644 = shalt.err (!%p10641_p5)
}
  0x60   : > { %9833 = dma.hbm_to_vmem [thread:$0]  (!%p10900_p0), %s12868_s10, 3072, %s422_s19, [#allocation10], %s10752_s24, %s10752_s24, %s10753_s14  }
  0x61   : > { %s10754_s8 = smov [#allocation12]   ;;  %s10645_s27 = scalar_lea.hbm %s12869_s11, 3072 }
  0x62   : > { %s434_s9 = sshll.u32 %s10754_s8, 4  ;;  %p10646_p5 = scmp.ne.s32.totalorder %s12869_s11, %s10645_s27  ;;  %s435_s9 = int_to_ptr.vmem [resolvable:$true] %s434_s9 }
  0x63   : > { %p10652_p4 = scmp.lt.u32.totalorder %s10645_s27, %s12869_s11 }
  0x64   : > { %p10648_p12 = pnand %p10646_p5, %p10916_p2 }
  0x66   : > { %p10649_p11 = pneg %p10648_p12 }
  0x68   : > { %p10654_p7 = pnand %p10652_p4, %p10649_p11 }
  0x6a   : > { %10657 = shalt.err (!%p10654_p7)
}
  0x6b   : > { %s10658_s19 = scalar_lea.vmem %s435_s9, 3072  ;;  %p10666_p1 = scmp.lt.s32.totalorder %s435_s9, %s435_s9 }
  0x6c   : > { %p10659_p8 = scmp.ne.s32.totalorder %s435_s9, %s10658_s19  ;;  %p10667_p3 = scmp.lt.s32.totalorder %s10658_s19, %s10658_s19 }
  0x6e   : > { %p10661_p9 = pnand %p10659_p8, %p10916_p2  ;;  %p10668_p6 = por %p10667_p3, %p10666_p1 }
  0x70   : > { %p10662_p13 = pneg %p10661_p9 }
  0x72   : > { %p10669_p10 = pnand %p10668_p6, %p10662_p13 }
  0x74   : > { %10672 = shalt.err (!%p10669_p10)
}
  0x75   : > { %9836 = dma.hbm_to_vmem [thread:$0]  (!%p10900_p0), %s12869_s11, 3072, %s435_s9, [#allocation13], %s10752_s24, %s10752_s24, %s10753_s14  }
  0x76   : > { %p8338_p5 = scmp.ge.s32.totalorder %s10747_s16, 2 }
  0x77   : > { %p12906_p2 = scmp.ne.s32.totalorder (!%p8338_p5), %s12898_s23, 0 }
  0x78   : > { %450 = sbr.rel (%p8338_p5) target bundleno = 144 (0x90), region = 64 }
  0x7f   : > { %453 = sbr.rel (!%p12906_p2) target bundleno = 135 (0x87), region = 68  ;;  %s455_s12 = sand.u32 (%p12906_p2), 1, %s10743_s15  }
  0x80   : > { %s8340_s8 = sshll.u32 (%p12906_p2), %s10747_s16, 3  ;;  %s8339_s18 = sshll.u32 (%p12906_p2), %s455_s12, 6 }
  0x81   : > { %s459_s27 = scalar_lea.vmem (%p12906_p2), %s12858_s0, %s8340_s8  ;;  %s457_s24 = scalar_lea.vmem (%p12906_p2), [#allocation4], %s8339_s18 }
  0x82   : > { %v501_v0 = vld [vmem:[%s459_s27] sm:$0xff] (%p12906_p2)  ;;  %v503_v1 = vld [vmem:[%s459_s27 + $0x10] sm:$0xff] (%p12906_p2) }
  0x83   : > { %v505_v2 = vld [vmem:[%s459_s27 + $0x20] sm:$0xff] (%p12906_p2)  ;;  %502 = vst [vmem:[%s457_s24] sm:$0xff] (%p12906_p2), %v501_v0  ;;  %504 = vst [vmem:[%s457_s24 + $0x8] sm:$0xff] (%p12906_p2), %v503_v1  ;;  %v507_v3 = vld [vmem:[%s459_s27 + $0x30] sm:$0xff] (%p12906_p2) }
  0x84   : > { %506 = vst [vmem:[%s457_s24 + $0x10] sm:$0xff] (%p12906_p2), %v505_v2  ;;  %v509_v4 = vld [vmem:[%s459_s27 + $0x40] sm:$0xff] (%p12906_p2)  ;;  %v511_v5 = vld [vmem:[%s459_s27 + $0x50] sm:$0xff] (%p12906_p2)  ;;  %508 = vst [vmem:[%s457_s24 + $0x18] sm:$0xff] (%p12906_p2), %v507_v3 }
  0x85   : > { %510 = vst [vmem:[%s457_s24 + $0x20] sm:$0xff] (%p12906_p2), %v509_v4  ;;  %512 = vst [vmem:[%s457_s24 + $0x28] sm:$0xff] (%p12906_p2), %v511_v5  ;;  %v513_v6 = vld [vmem:[%s459_s27 + $0x60] sm:$0xff] (%p12906_p2)  ;;  %v515_v7 = vld [vmem:[%s459_s27 + $0x70] sm:$0xff] (%p12906_p2) }
  0x86   : > { %514 = vst [vmem:[%s457_s24 + $0x30] sm:$0xff] %v513_v6  ;;  %516 = vst [vmem:[%s457_s24 + $0x38] sm:$0xff] %v515_v7 }
  0x87 PF: > { %p12907_p0 = scmp.ne.s32.totalorder %s12898_s23, 0 }
  0x88   : > { %s524_s14 = sand.u32 (%p12907_p0), 1, %s10743_s15   ;;  %s8342_s9 = sshll.u32 (%p12907_p0), %s10747_s16, 3 }
  0x89   : > { %522 = sbr.rel (!%p12907_p0) target bundleno = 144 (0x90), region = 106  ;;  %s8341_s20 = sshll.u32 (%p12907_p0), %s524_s14, 6 }
  0x8a   : > { %s528_s28 = scalar_lea.vmem (%p12907_p0), %s12859_s1, %s8342_s9  ;;  %s526_s19 = scalar_lea.vmem (%p12907_p0), [#allocation5], %s8341_s20 }
  0x8b   : > { %v570_v8 = vld [vmem:[%s528_s28] sm:$0xff] (%p12907_p0)  ;;  %v572_v9 = vld [vmem:[%s528_s28 + $0x10] sm:$0xff] (%p12907_p0) }
  0x8c   : > { %v574_v10 = vld [vmem:[%s528_s28 + $0x20] sm:$0xff] (%p12907_p0)  ;;  %571 = vst [vmem:[%s526_s19] sm:$0xff] (%p12907_p0), %v570_v8  ;;  %573 = vst [vmem:[%s526_s19 + $0x8] sm:$0xff] (%p12907_p0), %v572_v9  ;;  %v576_v11 = vld [vmem:[%s528_s28 + $0x30] sm:$0xff] (%p12907_p0) }
  0x8d   : > { %575 = vst [vmem:[%s526_s19 + $0x10] sm:$0xff] (%p12907_p0), %v574_v10  ;;  %v578_v12 = vld [vmem:[%s528_s28 + $0x40] sm:$0xff] (%p12907_p0)  ;;  %v580_v13 = vld [vmem:[%s528_s28 + $0x50] sm:$0xff] (%p12907_p0)  ;;  %577 = vst [vmem:[%s526_s19 + $0x18] sm:$0xff] (%p12907_p0), %v576_v11 }
  0x8e   : > { %579 = vst [vmem:[%s526_s19 + $0x20] sm:$0xff] (%p12907_p0), %v578_v12  ;;  %581 = vst [vmem:[%s526_s19 + $0x28] sm:$0xff] (%p12907_p0), %v580_v13  ;;  %v582_v14 = vld [vmem:[%s528_s28 + $0x60] sm:$0xff] (%p12907_p0)  ;;  %v584_v15 = vld [vmem:[%s528_s28 + $0x70] sm:$0xff] (%p12907_p0) }
  0x8f   : > { %583 = vst [vmem:[%s526_s19 + $0x30] sm:$0xff] (%p12907_p0), %v582_v14  ;;  %585 = vst [vmem:[%s526_s19 + $0x38] sm:$0xff] (%p12907_p0), %v584_v15 }
  0x90 PF: > { %p12908_p12 = scmp.ne.s32.totalorder %s12903_s26, 0 }
  0x91   : > { %s11029_s23 = sand.u32 (!%p12908_p12), 1, %s10739_s30   ;;  %p12909_p11 = scmp.eq.s32.totalorder (!%p12908_p12), %s10857_s17, 0 }
  0x92   : > { %594 = sbr.rel (%p12908_p12) target bundleno = 6552 (0x1998), region = 144  ;;  %s8344_s21 = sshll.u32 (!%p12908_p12), %s11029_s23, 6 }
  0x93   : > { %s11032_s4 = scalar_lea.vmem (!%p12908_p12), [#allocation4], %s8344_s21  ;;  %s11034_s12 = scalar_lea.vmem (!%p12908_p12), [#allocation5], %s8344_s21 }
  0x99   : > { %10718 = dma.done.wait (%p12909_p11), [#allocation7], 3072   ;;  %p12910_p4 = pmov %p12909_p11 }
  0x9b   : > { %10720 = vsyncadd (%p12910_p4), [#allocation7], 4294964224  ;;  %p12911_p7 = pmov %p12910_p4 }
  0x9c   : > { %p12912_p8 = pmov %p12910_p4 }
  0x9d   : > { %10722 = dma.done.wait (%p12911_p7), [#allocation10], 6144  }
  0x9e   : > { %10724 = vsyncadd (%p12912_p8), [#allocation10], 4294961152  ;;  %p12913_p9 = pmov %p12910_p4 }
  0x9f   : > { %p12914_p13 = pmov %p12910_p4 }
  0xa0   : > { %10726 = dma.done.wait (%p12913_p9), [#allocation13], 3072  }
  0xa1   : > { %10728 = vsyncadd (%p12914_p13), [#allocation13], 4294964224  ;;  %v12885_v16 = vmov 0.0   ;;  %v12887_v17 = vmov 0   ;;  %vm10757_vm0 = vmmov 0   ;;  %v716_v32 = vld [vmem:[%s11032_s4 + $0x8] sm:$0xff]  ;;  %v693_v58 = vlaneseq }
  0xa2   : > { %9278 = vmatprep.subr.bf16.mxu1 %v12885_v16  ;;  %1204 = vmatprep.mubr.bf16.mxu0 %v12887_v17  ;;  %v11057_v18 = vld [vmem:[%s12861_s3 + $0x4] ss:$12 sps:$4 sm:$0xff]   ;;  %v11062_v19 = vld [vmem:[%s12861_s3] ss:$12 sps:$4 sm:$0xff]   ;;  %v11068_v20 = vld [vmem:[%s12861_s3 + $0x1c] ss:$12 sps:$4 sm:$0xff]  }
  0xa3   : > { %9294 = vmatprep.mubr.msk.bf16.mxu1 %vm10757_vm0, %v12885_v16  ;;  %9894 = vset.pattern.permute.xlu1 %v12887_v17  ;;  %v11074_v21 = vld [vmem:[%s12861_s3 + $0x18] ss:$12 sps:$4 sm:$0xff]   ;;  %v11080_v22 = vld [vmem:[%s12861_s3 + $0x34] ss:$12 sps:$4 sm:$0xff]   ;;  %v11086_v23 = vld [vmem:[%s12861_s3 + $0x30] ss:$12 sps:$4 sm:$0xff]  }
  0xa4   : > { %9893 = vset.pattern.permute.xlu0 %v12887_v17  ;;  %1172 = vmatprep.subr.bf16.mxu0 %v11057_v18  ;;  %v11092_v24 = vld [vmem:[%s12861_s3 + $0x4c] ss:$12 sps:$4 sm:$0xff]   ;;  %v9915_v25 = vld [vmem:[%s12861_s3 + $0x8] ss:$12 sps:$4 sm:$0xff]   ;;  %v11107_v27 = vld [vmem:[%s12861_s3 + $0x64] ss:$12 sps:$4 sm:$0xff]  }
  0xa5   : > { %1173 = vmatpush1.bf16.msra.mxu0 %v11062_v19  ;;  %v11101_v26 = vld [vmem:[%s12861_s3 + $0x48] ss:$12 sps:$4 sm:$0xff]   ;;  %9279 = vmatpush3.bf16.msra.mxu1 %v9915_v25  ;;  %v9919_v28 = vld [vmem:[%s12861_s3 + $0x20] ss:$12 sps:$4 sm:$0xff]   ;;  %v9921_v30 = vld [vmem:[%s12861_s3 + $0x38] ss:$12 sps:$4 sm:$0xff]  }
  0xa6   : > { %1174 = vmatprep.subr.bf16.mxu0 %v11068_v20  ;;  %9280 = vmatprep.subr.bf16.mxu1 %v12885_v16  ;;  %v11116_v29 = vld [vmem:[%s12861_s3 + $0x60] ss:$12 sps:$4 sm:$0xff]   ;;  %v11126_v31 = vld [vmem:[%s12861_s3 + $0x7c] ss:$12 sps:$4 sm:$0xff]   ;;  %v11134_v33 = vld [vmem:[%s12861_s3 + $0x78] ss:$12 sps:$4 sm:$0xff]  }
  0xa7   : > { %v9922_v34 = vld [vmem:[%s12861_s3 + $0x50] ss:$12 sps:$4 sm:$0xff]   ;;  %v715_v35 = vld [vmem:[%s11032_s4] sm:$0xff]  ;;  %730 = vperm.xlu1 %9894, %v716_v32   ;;  %v816_v37 = vld [vmem:[%s11034_s12 + $0x8] sm:$0xff]  ;;  %v694_v59 = vshrl.u32 %v693_v58, 7  ;;  %v10759_v63 = vmov 1.0  }
  0xa8   : > { %v11144_v36 = vld [vmem:[%s12861_s3 + $0x94] ss:$12 sps:$4 sm:$0xff]   ;;  %725 = vperm.xlu0 %9893, %v715_v35   ;;  %v11153_v39 = vld [vmem:[%s12861_s3 + $0x90] ss:$12 sps:$4 sm:$0xff]   ;;  %v11158_v40 = vld [vmem:[%s12861_s3 + $0xac] ss:$12 sps:$4 sm:$0xff]   ;;  %v689_v0 = vcombine.low %v10759_v63, %v10759_v63 }
  0xa9   : > { %1175 = vmatpush1.bf16.msra.mxu0 %v11074_v21  ;;  %9281 = vmatpush3.bf16.msra.mxu1 %v9919_v28  ;;  %v815_v38 = vld [vmem:[%s11034_s12] sm:$0xff]  ;;  %v9923_v41 = vld [vmem:[%s12861_s3 + $0x68] ss:$12 sps:$4 sm:$0xff]   ;;  %v818_v46 = vld [vmem:[%s11034_s12 + $0x18] sm:$0xff]  ;;  %v10758_v60 = vmov 1966171168  }
  0xaa   : > { %1176 = vmatprep.subr.bf16.mxu0 %v11080_v22  ;;  %9282 = vmatprep.subr.bf16.mxu1 %v12885_v16  ;;  %v817_v42 = vld [vmem:[%s11034_s12 + $0x10] sm:$0xff]  ;;  %v9924_v45 = vld [vmem:[%s12861_s3 + $0x80] ss:$12 sps:$4 sm:$0xff]   ;;  %v718_v47 = vld [vmem:[%s11032_s4 + $0x18] sm:$0xff]  ;;  %v691_v61 = vunpack.c.l.s4 %v10758_v60  ;;  %v774_v7 = vsub.s32 4, %v694_v59  ;;  %v873_v9 = vsub.s32 5, %v694_v59 }
  0xab   : > { %v717_v43 = vld [vmem:[%s11032_s4 + $0x10] sm:$0xff]  ;;  %830 = vperm.xlu1 %9894, %v816_v37   ;;  %v9925_v48 = vld [vmem:[%s12861_s3 + $0x98] ss:$12 sps:$4 sm:$0xff]   ;;  %v820_v52 = vld [vmem:[%s11034_s12 + $0x28] sm:$0xff]  ;;  %v11231_v11 = vsub.s32 0, %v694_v59  ;;  %v11233_v13 = vsub.s32 1, %v694_v59 }
  0xac   : > { %v9920_v44 = vld [vmem:[%s12861_s3 + $0xa8] ss:$12 sps:$4 sm:$0xff]   ;;  %825 = vperm.xlu0 %9893, %v815_v38   ;;  %v819_v49 = vld [vmem:[%s11034_s12 + $0x20] sm:$0xff]  ;;  %v9926_v51 = vld [vmem:[%s12861_s3 + $0xb0] ss:$12 sps:$4 sm:$0xff]   ;;  %v692_v62 = vunpack.c.0.s8 %v691_v61  ;;  %v869_v14 = vsub.s32 3, %v694_v59 }
  0xad   : > { %1177 = vmatpush1.bf16.msra.mxu0 %v11086_v23  ;;  %9283 = vmatpush3.bf16.msra.mxu1 %v9921_v30  ;;  %v719_v50 = vld [vmem:[%s11032_s4 + $0x20] sm:$0xff]  ;;  %v720_v53 = vld [vmem:[%s11032_s4 + $0x28] sm:$0xff]  ;;  %v821_v54 = vld [vmem:[%s11034_s12 + $0x30] sm:$0xff]  ;;  %s12915_s18 = sld [smem:[#allocation24_spill]]  ;;  %s12917_s25 = sld [smem:[#allocation25_spill]] }
  0xae   : > { %1178 = vmatprep.subr.bf16.mxu0 %v11092_v24  ;;  %9284 = vmatprep.subr.bf16.mxu1 %v12885_v16  ;;  %v721_v55 = vld [vmem:[%s11032_s4 + $0x30] sm:$0xff]  ;;  %v822_v56 = vld [vmem:[%s11034_s12 + $0x38] sm:$0xff]  ;;  %v695_v1 = vsub.s32 %v692_v62, %v694_v59  ;;  %v683_v5 = vld [vmem:[%s12860_s2] sm:$0x3f]  ;;  %s12920_s29 = sld [smem:[#allocation28_spill]]  ;;  %s12922_s26 = sld [smem:[#allocation27_spill]] }
  0xaf   : > { %835 = vperm.xlu1 %9894, %v817_v42   ;;  %v722_v57 = vld [vmem:[%s11032_s4 + $0x38] sm:$0xff]  ;;  %v9927_v2 = vld [vmem:[%s12861_s3 + $0x8] ss:$12 sps:$4 sm:$0xff]   ;;  %v9928_v6 = vld [vmem:[%s12861_s3 + $0x20] ss:$12 sps:$4 sm:$0xff]   ;;  %v775_v12 = vrot.slane %v683_v5, %v774_v7  ;;  %s12916_s4 = sld [smem:[#allocation26_spill]] }
  0xb0   : > { %735 = vperm.xlu0 %9893, %v717_v43   ;;  %v696_v3 = vrot.slane %v689_v0, %v695_v1  ;;  %v703_v4 = vrot.slane %v12885_v16, %v695_v1  ;;  %v9929_v10 = vld [vmem:[%s12861_s3 + $0x38] ss:$12 sps:$4 sm:$0xff]   ;;  %v685_v15 = vld [vmem:[%s12863_s5] sm:$0x7]  ;;  %v9931_v30 = vld [vmem:[%s12861_s3 + $0x68] ss:$12 sps:$4 sm:$0xff]  }
  0xb1   : > { %1179 = vmatpush1.bf16.msra.mxu0 %v11101_v26  ;;  %9285 = vmatpush3.bf16.msra.mxu1 %v9922_v34  ;;  %v11252_v25 = vrot.slane %v775_v12, %v11231_v11  ;;  %v9934_v58 = vld [vmem:[%s12861_s3 + $0xb0] ss:$12 sps:$4 sm:$0xff]   ;;  %s12923_s27 = sld [smem:[#allocation22_spill]]  ;;  %s9035_s24 = sshll.u32 %s10857_s17, 7 }
  0xb2   : > { %1180 = vmatprep.subr.bf16.mxu0 %v11107_v27  ;;  %9286 = vmatprep.subr.bf16.mxu1 %v12885_v16  ;;  %v704_v8 = vcombine.low %v696_v3, %v703_v4  ;;  %s10760_s17 = smov [#allocation14]  }
  0xb3   : > { %840 = vperm.xlu1 %9894, %v818_v46   ;;  %v9933_v46 = vld [vmem:[%s12861_s3 + $0x98] ss:$12 sps:$4 sm:$0xff]  }
  0xb4   : > { %740 = vperm.xlu0 %9893, %v718_v47   ;;  %s12921_s28 = smov %s12920_s29 }
  0xb5   : > { %1181 = vmatpush1.bf16.msra.mxu0 %v11116_v29  ;;  %9287 = vmatpush3.bf16.msra.mxu1 %v9923_v41 }
  0xb6   : > { %1182 = vmatprep.subr.bf16.mxu0 %v11126_v31  ;;  %9288 = vmatprep.subr.bf16.mxu1 %v12885_v16 }
  0xb7   : > { %845 = vperm.xlu1 %9894, %v819_v49   ;;  %p12926_p3 = scmp.ne.s32.totalorder %s12923_s27, 0 }
  0xb8   : > { %745 = vperm.xlu0 %9893, %v719_v50  }
  0xb9   : > { %1183 = vmatpush1.bf16.msra.mxu0 %v11134_v33  ;;  %9289 = vmatpush3.bf16.msra.mxu1 %v9924_v45 }
  0xba   : > { %1184 = vmatprep.subr.bf16.mxu0 %v11144_v36  ;;  %9290 = vmatprep.subr.bf16.mxu1 %v12885_v16 }
  0xbb   : > { %850 = vperm.xlu1 %9894, %v820_v52  }
  0xbc   : > { %750 = vperm.xlu0 %9893, %v720_v53  }
  0xbd   : > { %1185 = vmatpush1.bf16.msra.mxu0 %v11153_v39  ;;  %9291 = vmatpush3.bf16.msra.mxu1 %v9925_v48 }
  0xbe   : > { %1186 = vmatprep.subr.bf16.mxu0 %v11158_v40  ;;  %9292 = vmatprep.subr.bf16.mxu1 %v12885_v16 }
  0xbf   : > { %855 = vperm.xlu1 %9894, %v821_v54  }
  0xc0   : > { %755 = vperm.xlu0 %9893, %v721_v55  }
  0xc1   : > { %1187 = vmatpush1.bf16.msra.mxu0 %v9920_v44  ;;  %9293 = vmatpush3.bf16.msra.mxu1 %v9926_v51 }
  0xc2   : > { %1440 = vmatprep.subr.bf16.mxu0 %v11057_v18  ;;  %9298 = vmatprep.subr.bf16.mxu1 %v12885_v16 }
  0xc3   : > { %860 = vperm.xlu1 %9894, %v822_v56  }
  0xc4   : > { %1205 = vmatmul.mubr.bf16.vlgmr.msra.gmra.mrb[0].mxu0 %v12887_v17  ;;  %9295 = vmatmul.mubr.bf16.vlgmr.msra.gmra.mrb[0].mxu1 %v12887_v17 }
  0xc5   : > { %1441 = vmatpush1.bf16.msra.mxu0 %v11062_v19  ;;  %1472 = vmatprep.mubr.bf16.mxu0 %v12887_v17  ;;  %v11240_v19 = vrot.slane %v704_v8, %v695_v1 }
  0xc6   : > { %1442 = vmatprep.subr.bf16.mxu0 %v11068_v20  ;;  %9314 = vmatprep.mubr.msk.bf16.mxu1 %vm10757_vm0, %v12885_v16  ;;  %v874_v20 = vrot.slane %v683_v5, %v873_v9 }
  0xc7   : > { %760 = vperm.xlu0 %9893, %v722_v57   ;;  %9299 = vmatpush3.bf16.msra.mxu1 %v9927_v2 }
  0xc8   : > { %9300 = vmatprep.subr.bf16.mxu1 %v12885_v16  ;;  %v11263_v32 = vrot.slane %v874_v20, %v11233_v13 }
  0xc9   : > { %1443 = vmatpush1.bf16.msra.mxu0 %v11074_v21 }
  0xca   : > { %1444 = vmatprep.subr.bf16.mxu0 %v11080_v22 }
  0xcb   : > { %9301 = vmatpush3.bf16.msra.mxu1 %v9928_v6 }
  0xcc   : > { %9302 = vmatprep.subr.bf16.mxu1 %v12885_v16 }
  0xcd   : > { %1445 = vmatpush1.bf16.msra.mxu0 %v11086_v23  ;;  %v9930_v23 = vld [vmem:[%s12861_s3 + $0x50] ss:$12 sps:$4 sm:$0xff]  }
  0xce   : > { %1446 = vmatprep.subr.bf16.mxu0 %v11092_v24  ;;  %v767_v24 = vrot.slane %v683_v5, %v11231_v11 }
  0xcf   : > { %9303 = vmatpush3.bf16.msra.mxu1 %v9929_v10 }
  0xd0   : > { %9304 = vmatprep.subr.bf16.mxu1 %v12885_v16  ;;  %v11277_v37 = vrot.slane %v767_v24, %v11231_v11 }
  0xd1   : > { %1447 = vmatpush1.bf16.msra.mxu0 %v11101_v26  ;;  %v866_v26 = vrot.slane %v683_v5, %v11233_v13 }
  0xd2   : > { %1448 = vmatprep.subr.bf16.mxu0 %v11107_v27  ;;  %v870_v27 = vrot.slane %v683_v5, %v869_v14 }
  0xd3   : > { %9305 = vmatpush3.bf16.msra.mxu1 %v9930_v23  ;;  %v11280_v38 = vrot.slane %v866_v26, %v11233_v13 }
  0xd4   : > { %9306 = vmatprep.subr.bf16.mxu1 %v12885_v16 }
  0xd5   : > { %1449 = vmatpush1.bf16.msra.mxu0 %v11116_v29  ;;  %v713_v29 = vmul.f32 %v11240_v19, %v685_v15 }
  0xd6   : > { %1450 = vmatprep.subr.bf16.mxu0 %v11126_v31 }
  0xd7   : > { %9307 = vmatpush3.bf16.msra.mxu1 %v9931_v30 }
  0xd8   : > { %9308 = vmatprep.subr.bf16.mxu1 %v12885_v16 }
  0xd9   : > { %1451 = vmatpush1.bf16.msra.mxu0 %v11134_v33  ;;  %v684_v33 = vld [vmem:[%s12915_s18] sm:$0x7]  ;;  %s10677_s18 = sshll.u32 %s10760_s17, 4  ;;  %s10678_s18 = int_to_ptr.vmem [resolvable:$false] %s10677_s18 }
  0xda   : > { %1452 = vmatprep.subr.bf16.mxu0 %v11144_v36  ;;  %v9932_v36 = vld [vmem:[%s12861_s3 + $0x80] ss:$12 sps:$4 sm:$0xff]   ;;  %v11290_v42 = vadd.f32 %v713_v29, %v684_v33  ;;  %s10679_s12 = scalar_lea.vmem %s10678_s18, 256 }
  0xdb   : > { %9309 = vmatpush3.bf16.msra.mxu1 %v9932_v36 }
  0xdc   : > { %v11306_v53 = vrot.slane %v11290_v42, %v11231_v11  ;;  %9310 = vmatprep.subr.bf16.mxu1 %v12885_v16 }
  0xdd   : > { %1453 = vmatpush1.bf16.msra.mxu0 %v11153_v39  ;;  %v11283_v39 = vrot.slane %v870_v27, %v11233_v13 }
  0xde   : > { %1454 = vmatprep.subr.bf16.mxu0 %v11158_v40 }
  0xdf   : > { %9311 = vmatpush3.bf16.msra.mxu1 %v9933_v46 }
  0xe0   : > { %9312 = vmatprep.subr.bf16.mxu1 %v12885_v16 }
  0xe1   : > { %1455 = vmatpush1.bf16.msra.mxu0 %v9920_v44 }
  0xe2   : > { %1709 = vmatprep.subr.bf16.mxu0 %v11057_v18  ;;  %v11238_v18 = vsub.s32 2, %v694_v59 }
  0xe3   : > { %9313 = vmatpush3.bf16.msra.mxu1 %v9934_v58 }
  0xe4   : > { %v771_v28 = vrot.slane %v683_v5, %v11238_v18  ;;  %9318 = vmatprep.subr.bf16.mxu1 %v12885_v16 }
  0xe6   : > { %v11288_v41 = vrot.slane %v771_v28, %v11231_v11 }
 0x126   : > { %v11243_v21 = vpop.permute.xlu1 %730 }
 0x127   : > { %v11245_v22 = vpop.permute.xlu0 %725  ;;  %v796_v31 = vmul.f32 %v11252_v25, %v11243_v21  ;;  %v794_v4 = vmul.f32 %v11277_v37, %v11243_v21 }
 0x12a   : > { %v11269_v34 = vpop.permute.xlu1 %830 }
 0x12b   : > { %v11271_v35 = vpop.permute.xlu0 %825  ;;  %v895_v40 = vmul.f32 %v11263_v32, %v11269_v34  ;;  %v893_v15 = vmul.f32 %v11280_v38, %v11269_v34 }
 0x12d   : > { %v11292_v43 = vadd.f32 %v895_v40, %v796_v31  ;;  %v917_v46 = vadd.f32 %v893_v15, %v794_v4 }
 0x12e   : > { %v836_v44 = vpop.permute.xlu1 %835 }
 0x12f   : > { %v736_v45 = vpop.permute.xlu0 %735  ;;  %v896_v47 = vmul.f32 %v11280_v38, %v836_v44  ;;  %v897_v48 = vmul.f32 %v11283_v39, %v836_v44  ;;  %v898_v49 = vmul.f32 %v11263_v32, %v836_v44 }
 0x130   : > { %v797_v50 = vmul.f32 %v11277_v37, %v736_v45  ;;  %v798_v51 = vmul.f32 %v11288_v41, %v736_v45  ;;  %v799_v52 = vmul.f32 %v11252_v25, %v736_v45 }
 0x132   : > { %v920_v54 = vadd.f32 %v896_v47, %v797_v50  ;;  %v11309_v55 = vadd.f32 %v898_v49, %v799_v52  ;;  %v841_v56 = vpop.permute.xlu1 %840  ;;  %v11314_v59 = vadd.f32 %v897_v48, %v798_v51  ;;  %v11360_v52 = vadd.f32 %v11306_v53, %v917_v46 }
 0x133   : > { %v741_v57 = vpop.permute.xlu0 %740  ;;  %v899_v60 = vmul.f32 %v11280_v38, %v841_v56  ;;  %v900_v61 = vmul.f32 %v11283_v39, %v841_v56  ;;  %v901_v62 = vmul.f32 %v11263_v32, %v841_v56 }
 0x134   : > { %v800_v63 = vmul.f32 %v11277_v37, %v741_v57  ;;  %v801_v0 = vmul.f32 %v11288_v41, %v741_v57  ;;  %v802_v1 = vmul.f32 %v11252_v25, %v741_v57  ;;  %v11323_v2 = vadd.f32 %v11306_v53, %v920_v54 }
 0x136   : > { %v923_v3 = vadd.f32 %v899_v60, %v800_v63  ;;  %v11328_v5 = vadd.f32 %v901_v62, %v802_v1  ;;  %v846_v6 = vpop.permute.xlu1 %845  ;;  %v11330_v8 = vadd.f32 %v900_v61, %v801_v0 }
 0x137   : > { %v746_v7 = vpop.permute.xlu0 %745  ;;  %v902_v9 = vmul.f32 %v11280_v38, %v846_v6  ;;  %v903_v10 = vmul.f32 %v11283_v39, %v846_v6  ;;  %v904_v12 = vmul.f32 %v11263_v32, %v846_v6 }
 0x138   : > { %v803_v14 = vmul.f32 %v11277_v37, %v746_v7  ;;  %v804_v20 = vmul.f32 %v11288_v41, %v746_v7  ;;  %v805_v23 = vmul.f32 %v11252_v25, %v746_v7  ;;  %v11341_v24 = vadd.f32 %v11306_v53, %v923_v3 }
 0x13a   : > { %v926_v26 = vadd.f32 %v902_v9, %v803_v14  ;;  %v11344_v27 = vadd.f32 %v904_v12, %v805_v23  ;;  %v851_v28 = vpop.permute.xlu1 %850  ;;  %v11346_v30 = vadd.f32 %v903_v10, %v804_v20 }
 0x13b   : > { %v751_v29 = vpop.permute.xlu0 %750  ;;  %v905_v31 = vmul.f32 %v11280_v38, %v851_v28  ;;  %v906_v33 = vmul.f32 %v11283_v39, %v851_v28  ;;  %v907_v36 = vmul.f32 %v11263_v32, %v851_v28 }
 0x13c   : > { %v806_v40 = vmul.f32 %v11277_v37, %v751_v29  ;;  %v807_v44 = vmul.f32 %v11288_v41, %v751_v29  ;;  %v808_v45 = vmul.f32 %v11252_v25, %v751_v29  ;;  %v11355_v47 = vadd.f32 %v11306_v53, %v926_v26 }
 0x13e   : > { %v929_v48 = vadd.f32 %v905_v31, %v806_v40  ;;  %v11357_v49 = vadd.f32 %v907_v36, %v808_v45  ;;  %v856_v50 = vpop.permute.xlu1 %855  ;;  %v11362_v54 = vadd.f32 %v906_v33, %v807_v44  ;;  %v791_v31 = vmul.f32 %v11277_v37, %v11245_v22 }
 0x13f   : > { %v756_v51 = vpop.permute.xlu0 %755  ;;  %v908_v56 = vmul.f32 %v11280_v38, %v856_v50  ;;  %v909_v57 = vmul.f32 %v11283_v39, %v856_v50  ;;  %v910_v58 = vmul.f32 %v11263_v32, %v856_v50  ;;  %v890_v33 = vmul.f32 %v11280_v38, %v11271_v35 }
 0x140   : > { %v809_v60 = vmul.f32 %v11277_v37, %v756_v51  ;;  %v810_v61 = vmul.f32 %v11288_v41, %v756_v51  ;;  %v811_v62 = vmul.f32 %v11252_v25, %v756_v51  ;;  %v11371_v63 = vadd.f32 %v11306_v53, %v929_v48 }
 0x141   : > { %v914_v36 = vadd.f32 %v890_v33, %v791_v31  ;;  %v792_v40 = vmul.f32 %v11288_v41, %v11245_v22  ;;  %v891_v44 = vmul.f32 %v11283_v39, %v11271_v35 }
 0x142   : > { %v932_v0 = vadd.f32 %v908_v56, %v809_v60  ;;  %v11373_v1 = vadd.f32 %v910_v58, %v811_v62  ;;  %v861_v3 = vpop.permute.xlu1 %860  ;;  %v11375_v6 = vadd.f32 %v909_v57, %v810_v61 }
 0x143   : > { %v911_v7 = vmul.f32 %v11280_v38, %v861_v3  ;;  %v912_v9 = vmul.f32 %v11283_v39, %v861_v3  ;;  %v913_v10 = vmul.f32 %v11263_v32, %v861_v3  ;;  %v954_v45 = vadd.f32 %v11306_v53, %v914_v36 }
 0x144   : > { %v11384_v20 = vadd.f32 %v11306_v53, %v932_v0  ;;  %v915_v57 = vadd.f32 %v891_v44, %v792_v40 }
 0x146   : > { %v761_v4 = vpop.permute.xlu0 %760 }
 0x147   : > { %v812_v12 = vmul.f32 %v11277_v37, %v761_v4  ;;  %v813_v14 = vmul.f32 %v11288_v41, %v761_v4  ;;  %v814_v15 = vmul.f32 %v11252_v25, %v761_v4  ;;  %v11404_v37 = vrot.slane %v11290_v42, %v11233_v13 }
 0x149   : > { %v935_v23 = vadd.f32 %v911_v7, %v812_v12  ;;  %v11386_v26 = vadd.f32 %v912_v9, %v813_v14  ;;  %v11388_v28 = vadd.f32 %v913_v10, %v814_v15  ;;  %v955_v58 = vadd.f32 %v11404_v37, %v915_v57  ;;  %v11414_v12 = vld [vmem:[%s12863_s5 + $0x2] ss:$0 sm:$0xff]  ;;  %v10547_v57 = vld [vmem:[%s12861_s3 + $0x30] ss:$12 sps:$4 sm:$0xff]  }
 0x14a   : > { %v793_v9 = vmul.f32 %v11252_v25, %v11245_v22  ;;  %v892_v10 = vmul.f32 %v11263_v32, %v11271_v35  ;;  %v11418_v15 = vrot.slane %v11290_v42, %v11238_v18 }
 0x14b   : > { %v11391_v29 = vadd.f32 %v11306_v53, %v935_v23 }
 0x14c   : > { %v916_v14 = vadd.f32 %v892_v10, %v793_v9  ;;  %v795_v9 = vmul.f32 %v11288_v41, %v11243_v21  ;;  %v894_v10 = vmul.f32 %v11283_v39, %v11269_v34  ;;  %v9937_v21 = vld [vmem:[%s12861_s3 + $0x38] ss:$12 sps:$4 sm:$0xff]   ;;  %v9938_v34 = vld [vmem:[%s12861_s3 + $0x50] ss:$12 sps:$4 sm:$0xff]   ;;  %v9939_v39 = vld [vmem:[%s12861_s3 + $0x68] ss:$12 sps:$4 sm:$0xff]  }
 0x14d   : > { %v9940_v41 = vld [vmem:[%s12861_s3 + $0x80] ss:$12 sps:$4 sm:$0xff]  }
 0x14e   : > { %v956_v36 = vadd.f32 %v11418_v15, %v916_v14  ;;  %v918_v14 = vadd.f32 %v894_v10, %v795_v9 }
 0x197   : > { %v1206_v46 = vpop.f32.mrb[0].mxu0  ;;  %v1247_v60 = vpop.f32.mrb[0].mxu1 }
 0x198   : > { %v1253_v48 = vadd.f32 %v1206_v46, %v954_v45  ;;  %v1208_v50 = vpop.f32.mrb[1].mxu0  ;;  %v9296_v62 = vpop.f32.mrb[1].mxu1  ;;  %v1267_v23 = vadd.f32 %v11414_v12, %v1247_v60  ;;  %v10550_v60 = vld [vmem:[%s12861_s3 + $0x64] ss:$12 sps:$4 sm:$0xff]  }
 0x199   : > { %v1210_v51 = vpop.f32.mrb[2].mxu0  ;;  %v1254_v61 = vadd.f32 %v1208_v50, %v955_v58  ;;  %v1250_v0 = vpop.f32.mrb[2].mxu1  ;;  %v10544_v50 = vld [vmem:[%s12861_s3 + $0x1c] ss:$12 sps:$4 sm:$0xff]  }
 0x19a   : > { %v8376_v56 = vmul.f32 -1.442695, %v1253_v48  ;;  %v1211_v38 = vpop.f32.mrb[3].mxu0  ;;  %v9297_v3 = vpop.f32.mrb[3].mxu1  ;;  %v10543_v48 = vld [vmem:[%s12861_s3] ss:$12 sps:$4 sm:$0xff]  }
 0x19b   : > { %v8377_v53 = vmul.f32 -1.442695, %v1254_v61  ;;  %v10545_v51 = vld [vmem:[%s12861_s3 + $0x18] ss:$12 sps:$4 sm:$0xff]   ;;  %v10549_v58 = vld [vmem:[%s12861_s3 + $0x48] ss:$12 sps:$4 sm:$0xff]  }
 0x19c   : > { %10303 = vpow2.f32 %v8376_v56  ;;  %v10546_v56 = vld [vmem:[%s12861_s3 + $0x34] ss:$12 sps:$4 sm:$0xff]   ;;  %v10548_v38 = vld [vmem:[%s12861_s3 + $0x4c] ss:$12 sps:$4 sm:$0xff]   ;;  %v10552_v62 = vld [vmem:[%s12861_s3 + $0x7c] ss:$12 sps:$4 sm:$0xff]  }
 0x19d   : > { %10305 = vpow2.f32 %v8377_v53  ;;  %v10551_v61 = vld [vmem:[%s12861_s3 + $0x60] ss:$12 sps:$4 sm:$0xff]   ;;  %v10553_v0 = vld [vmem:[%s12861_s3 + $0x78] ss:$12 sps:$4 sm:$0xff]   ;;  %v10555_v53 = vld [vmem:[%s12861_s3 + $0x90] ss:$12 sps:$4 sm:$0xff]  }
 0x19e   : > { %v10554_v3 = vld [vmem:[%s12861_s3 + $0x94] ss:$12 sps:$4 sm:$0xff]  }
 0x1a6   : > { %v10304_v4 = vpop.eup %10303 }
 0x1a7   : > { %v1261_v7 = vadd.f32 1.0, %v10304_v4  ;;  %v10306_v31 = vpop.eup %10305  ;;  %v10556_v4 = vld [vmem:[%s12861_s3 + $0xac] ss:$12 sps:$4 sm:$0xff]  }
 0x1a8   : > { %v1262_v25 = vadd.f32 1.0, %v10306_v31  ;;  %v9936_v31 = vld [vmem:[%s12861_s3 + $0x20] ss:$12 sps:$4 sm:$0xff]  }
 0x1a9   : > { %10307 = vrcp.f32 %v1261_v7  ;;  %v10557_v7 = vld [vmem:[%s12861_s3 + $0xa8] ss:$12 sps:$4 sm:$0xff]  }
 0x1b3   : > { %v10308_v33 = vpop.eup %10307 }
 0x1b4   : > { %v1268_v22 = vmul.f32 %v10308_v33, %v1267_v23  ;;  %v9935_v23 = vld [vmem:[%s12861_s3 + $0x8] ss:$12 sps:$4 sm:$0xff]   ;;  %v9941_v33 = vld [vmem:[%s12861_s3 + $0x98] ss:$12 sps:$4 sm:$0xff]  }
 0x1b6   : > { %v1269_v40 = vadd.f32 %v1268_v22, %v956_v36  ;;  %v9942_v36 = vld [vmem:[%s12861_s3 + $0xb0] ss:$12 sps:$4 sm:$0xff]  }
 0x1b8   : > { %10309 = vtanh.f32 %v1269_v40  ;;  %v958_v40 = vadd.f32 %v11404_v37, %v918_v14 }
 0x1b9   : > { %10311 = vrcp.f32 %v1262_v25 }
 0x1c2   : > { %v10310_v32 = vpop.eup %10309 }
 0x1c3   : > { %v1271_v35 = vsub.f32 0.0, %v10310_v32  ;;  %v10312_v44 = vpop.eup %10311 }
 0x1c5   : > { %v1272_v45 = vmul.f32 %v10312_v44, %v1271_v35 }
 0x1c7   : > { %v11422_v46 = vadd.f32 %v10310_v32, %v1272_v45 }
 0x1c9   : > { %v1274_v42 = vpack.c.bf16 %v11422_v46, %v11422_v46 }
 0x1cb   : > { %1275 = vst [vmem:[#allocation3] sm:$0xf] %v1274_v42  ;;  %1473 = vmatmul.mubr.bf16.vlgmr.msra.gmra.mrb[4].mxu0 %v1274_v42  ;;  %9315 = vmatmul.mubr.bf16.vlgmr.msra.gmra.mrb[4].mxu1 %v1274_v42 }
 0x1cc   : > { %1710 = vmatpush1.bf16.msra.mxu0 %v10543_v48  ;;  %1741 = vmatprep.mubr.bf16.mxu0 %v12887_v17 }
 0x1cd   : > { %1711 = vmatprep.subr.bf16.mxu0 %v10544_v50  ;;  %9334 = vmatprep.mubr.msk.bf16.mxu1 %vm10757_vm0, %v12885_v16 }
 0x1ce   : > { %9319 = vmatpush3.bf16.msra.mxu1 %v9935_v23 }
 0x1cf   : > { %9320 = vmatprep.subr.bf16.mxu1 %v12885_v16 }
 0x1d0   : > { %1712 = vmatpush1.bf16.msra.mxu0 %v10545_v51 }
 0x1d1   : > { %1713 = vmatprep.subr.bf16.mxu0 %v10546_v56 }
 0x1d2   : > { %9321 = vmatpush3.bf16.msra.mxu1 %v9936_v31  ;;  %v9946_v31 = vld [vmem:[%s12861_s3 + $0x8] ss:$12 sps:$4 sm:$0xff]  }
 0x1d3   : > { %9322 = vmatprep.subr.bf16.mxu1 %v12885_v16 }
 0x1d4   : > { %1714 = vmatpush1.bf16.msra.mxu0 %v10547_v57 }
 0x1d5   : > { %1715 = vmatprep.subr.bf16.mxu0 %v10548_v38 }
 0x1d6   : > { %9323 = vmatpush3.bf16.msra.mxu1 %v9937_v21  ;;  %v11541_v21 = vld [vmem:[%s12861_s3 + $0x1c] ss:$12 sps:$4 sm:$0xff]  }
 0x1d7   : > { %9324 = vmatprep.subr.bf16.mxu1 %v12885_v16 }
 0x1d8   : > { %1716 = vmatpush1.bf16.msra.mxu0 %v10549_v58 }
 0x1d9   : > { %1717 = vmatprep.subr.bf16.mxu0 %v10550_v60 }
 0x1da   : > { %9325 = vmatpush3.bf16.msra.mxu1 %v9938_v34  ;;  %v11547_v34 = vld [vmem:[%s12861_s3 + $0x18] ss:$12 sps:$4 sm:$0xff]  }
 0x1db   : > { %9326 = vmatprep.subr.bf16.mxu1 %v12885_v16 }
 0x1dc   : > { %1718 = vmatpush1.bf16.msra.mxu0 %v10551_v61 }
 0x1dd   : > { %1719 = vmatprep.subr.bf16.mxu0 %v10552_v62 }
 0x1de   : > { %9327 = vmatpush3.bf16.msra.mxu1 %v9939_v39  ;;  %v9950_v39 = vld [vmem:[%s12861_s3 + $0x20] ss:$12 sps:$4 sm:$0xff]  }
 0x1df   : > { %9328 = vmatprep.subr.bf16.mxu1 %v12885_v16 }
 0x1e0   : > { %1720 = vmatpush1.bf16.msra.mxu0 %v10553_v0 }
 0x1e1   : > { %1721 = vmatprep.subr.bf16.mxu0 %v10554_v3 }
 0x1e2   : > { %9329 = vmatpush3.bf16.msra.mxu1 %v9940_v41  ;;  %v11557_v41 = vld [vmem:[%s12861_s3 + $0x34] ss:$12 sps:$4 sm:$0xff]  }
 0x1e3   : > { %9330 = vmatprep.subr.bf16.mxu1 %v12885_v16 }
 0x1e4   : > { %1722 = vmatpush1.bf16.msra.mxu0 %v10555_v53 }
 0x1e5   : > { %1723 = vmatprep.subr.bf16.mxu0 %v10556_v4 }
 0x1e6   : > { %9331 = vmatpush3.bf16.msra.mxu1 %v9941_v33  ;;  %v11563_v33 = vld [vmem:[%s12861_s3 + $0x30] ss:$12 sps:$4 sm:$0xff]  }
 0x1e7   : > { %9332 = vmatprep.subr.bf16.mxu1 %v12885_v16 }
 0x1e8   : > { %1724 = vmatpush1.bf16.msra.mxu0 %v10557_v7 }
 0x1ea   : > { %9333 = vmatpush3.bf16.msra.mxu1 %v9942_v36  ;;  %v9954_v36 = vld [vmem:[%s12861_s3 + $0x38] ss:$12 sps:$4 sm:$0xff]  }
 0x1eb   : > { %9338 = vmatprep.subr.bf16.mxu1 %v12885_v16 }
 0x29e   : > { %v1474_v22 = vpop.f32.mrb[4].mxu0  ;;  %v1515_v25 = vpop.f32.mrb[4].mxu1 }
 0x29f   : > { %v1521_v32 = vadd.f32 %v1474_v22, %v11360_v52  ;;  %v1476_v35 = vpop.f32.mrb[5].mxu0  ;;  %v9316_v44 = vpop.f32.mrb[5].mxu1  ;;  %v1535_v61 = vadd.f32 %v11414_v12, %v1515_v25  ;;  %v959_v52 = vadd.f32 %v11418_v15, %v11292_v43  ;;  %v11526_v43 = vld [vmem:[%s12861_s3 + $0x4] ss:$12 sps:$4 sm:$0xff]   ;;  %v11573_v22 = vld [vmem:[%s12861_s3 + $0x4c] ss:$12 sps:$4 sm:$0xff]  }
 0x2a0   : > { %v1522_v45 = vadd.f32 %v1476_v35, %v958_v40  ;;  %v1478_v42 = vpop.f32.mrb[6].mxu0  ;;  %v1518_v48 = vpop.f32.mrb[6].mxu1  ;;  %1978 = vmatprep.subr.bf16.mxu0 %v11526_v43  ;;  %v11579_v25 = vld [vmem:[%s12861_s3 + $0x48] ss:$12 sps:$4 sm:$0xff]   ;;  %v9958_v40 = vld [vmem:[%s12861_s3 + $0x50] ss:$12 sps:$4 sm:$0xff]  }
 0x2a1   : > { %v8402_v50 = vmul.f32 -1.442695, %v1521_v32  ;;  %v1479_v51 = vpop.f32.mrb[7].mxu0  ;;  %v9317_v56 = vpop.f32.mrb[7].mxu1  ;;  %v11589_v32 = vld [vmem:[%s12861_s3 + $0x60] ss:$12 sps:$4 sm:$0xff]  }
 0x2a2   : > { %v8403_v57 = vmul.f32 -1.442695, %v1522_v45  ;;  %v11594_v35 = vld [vmem:[%s12861_s3 + $0x64] ss:$12 sps:$4 sm:$0xff]   ;;  %v9962_v44 = vld [vmem:[%s12861_s3 + $0x68] ss:$12 sps:$4 sm:$0xff]  }
 0x2a3   : > { %10313 = vpow2.f32 %v8402_v50  ;;  %v11603_v45 = vld [vmem:[%s12861_s3 + $0x7c] ss:$12 sps:$4 sm:$0xff]   ;;  %v11610_v42 = vld [vmem:[%s12861_s3 + $0x78] ss:$12 sps:$4 sm:$0xff]   ;;  %v9966_v48 = vld [vmem:[%s12861_s3 + $0x80] ss:$12 sps:$4 sm:$0xff]  }
 0x2a4   : > { %10315 = vpow2.f32 %v8403_v57  ;;  %v11620_v50 = vld [vmem:[%s12861_s3 + $0x94] ss:$12 sps:$4 sm:$0xff]   ;;  %v11626_v51 = vld [vmem:[%s12861_s3 + $0x90] ss:$12 sps:$4 sm:$0xff]   ;;  %v9970_v56 = vld [vmem:[%s12861_s3 + $0x98] ss:$12 sps:$4 sm:$0xff]  }
 0x2a5   : > { %v11636_v57 = vld [vmem:[%s12861_s3 + $0xac] ss:$12 sps:$4 sm:$0xff]  }
 0x2ad   : > { %v10314_v38 = vpop.eup %10313 }
 0x2ae   : > { %v1529_v58 = vadd.f32 1.0, %v10314_v38  ;;  %v10316_v60 = vpop.eup %10315  ;;  %v11642_v38 = vld [vmem:[%s12861_s3 + $0xa8] ss:$12 sps:$4 sm:$0xff]  }
 0x2af   : > { %v1530_v53 = vadd.f32 1.0, %v10316_v60 }
 0x2b0   : > { %10317 = vrcp.f32 %v1529_v58  ;;  %v9974_v58 = vld [vmem:[%s12861_s3 + $0xb0] ss:$12 sps:$4 sm:$0xff]  }
 0x2ba   : > { %v10318_v62 = vpop.eup %10317 }
 0x2bb   : > { %v1536_v0 = vmul.f32 %v10318_v62, %v1535_v61  ;;  %v961_v62 = vadd.f32 %v11404_v37, %v11314_v59 }
 0x2bd   : > { %v1537_v3 = vadd.f32 %v1536_v0, %v959_v52 }
 0x2bf   : > { %10319 = vtanh.f32 %v1537_v3 }
 0x2c0   : > { %10321 = vrcp.f32 %v1530_v53 }
 0x2c9   : > { %v10320_v4 = vpop.eup %10319 }
 0x2ca   : > { %v1539_v7 = vsub.f32 %v11422_v46, %v10320_v4  ;;  %v10322_v9 = vpop.eup %10321  ;;  %v11531_v46 = vld [vmem:[%s12861_s3] ss:$12 sps:$4 sm:$0xff]  }
 0x2cc   : > { %v1540_v10 = vmul.f32 %v10322_v9, %v1539_v7 }
 0x2ce   : > { %v11516_v14 = vadd.f32 %v10320_v4, %v1540_v10 }
 0x2d0   : > { %v1542_v23 = vpack.c.bf16 %v11516_v14, %v11516_v14 }
 0x2d2   : > { %1544 = vst [vmem:[#allocation3 + $0x4] sm:$0xf] %v1542_v23  ;;  %1742 = vmatmul.mubr.bf16.vlgmr.msra.gmra.mrb[8].mxu0 %v1542_v23  ;;  %9335 = vmatmul.mubr.bf16.vlgmr.msra.gmra.mrb[8].mxu1 %v1542_v23 }
 0x2d3   : > { %2010 = vmatprep.mubr.bf16.mxu0 %v12887_v17  ;;  %9354 = vmatprep.mubr.msk.bf16.mxu1 %vm10757_vm0, %v12885_v16 }
 0x2d4   : > { %1979 = vmatpush1.bf16.msra.mxu0 %v11531_v46  ;;  %9339 = vmatpush3.bf16.msra.mxu1 %v9946_v31 }
 0x2d5   : > { %9340 = vmatprep.subr.bf16.mxu1 %v12885_v16  ;;  %1980 = vmatprep.subr.bf16.mxu0 %v11541_v21 }
 0x2d8   : > { %1981 = vmatpush1.bf16.msra.mxu0 %v11547_v34  ;;  %9341 = vmatpush3.bf16.msra.mxu1 %v9950_v39 }
 0x2d9   : > { %9342 = vmatprep.subr.bf16.mxu1 %v12885_v16  ;;  %1982 = vmatprep.subr.bf16.mxu0 %v11557_v41 }
 0x2dc   : > { %1983 = vmatpush1.bf16.msra.mxu0 %v11563_v33  ;;  %9343 = vmatpush3.bf16.msra.mxu1 %v9954_v36 }
 0x2dd   : > { %9344 = vmatprep.subr.bf16.mxu1 %v12885_v16  ;;  %1984 = vmatprep.subr.bf16.mxu0 %v11573_v22 }
 0x2e0   : > { %1985 = vmatpush1.bf16.msra.mxu0 %v11579_v25  ;;  %9345 = vmatpush3.bf16.msra.mxu1 %v9958_v40 }
 0x2e1   : > { %9346 = vmatprep.subr.bf16.mxu1 %v12885_v16  ;;  %1986 = vmatprep.subr.bf16.mxu0 %v11594_v35 }
 0x2e4   : > { %1987 = vmatpush1.bf16.msra.mxu0 %v11589_v32  ;;  %9347 = vmatpush3.bf16.msra.mxu1 %v9962_v44 }
 0x2e5   : > { %1988 = vmatprep.subr.bf16.mxu0 %v11603_v45  ;;  %9348 = vmatprep.subr.bf16.mxu1 %v12885_v16 }
 0x2e8   : > { %1989 = vmatpush1.bf16.msra.mxu0 %v11610_v42  ;;  %9349 = vmatpush3.bf16.msra.mxu1 %v9966_v48 }
 0x2e9   : > { %1990 = vmatprep.subr.bf16.mxu0 %v11620_v50  ;;  %9350 = vmatprep.subr.bf16.mxu1 %v12885_v16 }
 0x2ec   : > { %1991 = vmatpush1.bf16.msra.mxu0 %v11626_v51  ;;  %9351 = vmatpush3.bf16.msra.mxu1 %v9970_v56 }
 0x2ed   : > { %1992 = vmatprep.subr.bf16.mxu0 %v11636_v57  ;;  %9352 = vmatprep.subr.bf16.mxu1 %v12885_v16 }
 0x2f0   : > { %1993 = vmatpush1.bf16.msra.mxu0 %v11642_v38  ;;  %9353 = vmatpush3.bf16.msra.mxu1 %v9974_v58 }
 0x2f1   : > { %2247 = vmatprep.subr.bf16.mxu0 %v11526_v43  ;;  %9358 = vmatprep.subr.bf16.mxu1 %v12885_v16 }
 0x3a5   : > { %v1743_v60 = vpop.f32.mrb[8].mxu0  ;;  %v1784_v61 = vpop.f32.mrb[8].mxu1 }
 0x3a6   : > { %v1790_v52 = vadd.f32 %v1743_v60, %v11323_v2  ;;  %v1745_v0 = vpop.f32.mrb[9].mxu0  ;;  %v9336_v3 = vpop.f32.mrb[9].mxu1  ;;  %v1804_v44 = vadd.f32 %v11414_v12, %v1784_v61  ;;  %v962_v2 = vadd.f32 %v11418_v15, %v11309_v55  ;;  %v9975_v55 = vld [vmem:[%s12861_s3 + $0x8] ss:$12 sps:$4 sm:$0xff]   ;;  %v9977_v61 = vld [vmem:[%s12861_s3 + $0x38] ss:$12 sps:$4 sm:$0xff]  }
 0x3a7   : > { %v1791_v53 = vadd.f32 %v1745_v0, %v961_v62  ;;  %v1747_v4 = vpop.f32.mrb[10].mxu0  ;;  %v1787_v7 = vpop.f32.mrb[10].mxu1 }
 0x3a8   : > { %v8428_v9 = vmul.f32 -1.442695, %v1790_v52  ;;  %v1748_v10 = vpop.f32.mrb[11].mxu0  ;;  %v9337_v23 = vpop.f32.mrb[11].mxu1  ;;  %v9978_v4 = vld [vmem:[%s12861_s3 + $0x50] ss:$12 sps:$4 sm:$0xff]  }
 0x3a9   : > { %v8429_v31 = vmul.f32 -1.442695, %v1791_v53  ;;  %v9979_v7 = vld [vmem:[%s12861_s3 + $0x68] ss:$12 sps:$4 sm:$0xff]   ;;  %v9981_v10 = vld [vmem:[%s12861_s3 + $0x98] ss:$12 sps:$4 sm:$0xff]  }
 0x3aa   : > { %10323 = vpow2.f32 %v8428_v9  ;;  %v9980_v9 = vld [vmem:[%s12861_s3 + $0x80] ss:$12 sps:$4 sm:$0xff]   ;;  %v9982_v23 = vld [vmem:[%s12861_s3 + $0xb0] ss:$12 sps:$4 sm:$0xff]  }
 0x3ab   : > { %10325 = vpow2.f32 %v8429_v31 }
 0x3b4   : > { %v10324_v39 = vpop.eup %10323 }
 0x3b5   : > { %v1798_v36 = vadd.f32 1.0, %v10324_v39  ;;  %v10326_v40 = vpop.eup %10325 }
 0x3b6   : > { %v1799_v58 = vadd.f32 1.0, %v10326_v40 }
 0x3b7   : > { %10327 = vrcp.f32 %v1798_v36  ;;  %v964_v36 = vadd.f32 %v11404_v37, %v11330_v8 }
 0x3c1   : > { %v10328_v59 = vpop.eup %10327 }
 0x3c2   : > { %v1805_v48 = vmul.f32 %v10328_v59, %v1804_v44 }
 0x3c4   : > { %v1806_v56 = vadd.f32 %v1805_v48, %v962_v2 }
 0x3c6   : > { %10329 = vtanh.f32 %v1806_v56 }
 0x3c7   : > { %10331 = vrcp.f32 %v1799_v58 }
 0x3d0   : > { %v10330_v60 = vpop.eup %10329 }
 0x3d1   : > { %v1808_v62 = vsub.f32 %v11516_v14, %v10330_v60  ;;  %v10332_v52 = vpop.eup %10331  ;;  %v9976_v14 = vld [vmem:[%s12861_s3 + $0x20] ss:$12 sps:$4 sm:$0xff]  }
 0x3d3   : > { %v1809_v0 = vmul.f32 %v10332_v52, %v1808_v62 }
 0x3d5   : > { %v11659_v3 = vadd.f32 %v10330_v60, %v1809_v0 }
 0x3d7   : > { %v1811_v53 = vpack.c.bf16 %v11659_v3, %v11659_v3 }
 0x3d9   : > { %1813 = vst [vmem:[#allocation3 + $0x8] sm:$0xf] %v1811_v53  ;;  %2011 = vmatmul.mubr.bf16.vlgmr.msra.gmra.mrb[12].mxu0 %v1811_v53  ;;  %9355 = vmatmul.mubr.bf16.vlgmr.msra.gmra.mrb[12].mxu1 %v1811_v53 }
 0x3da   : > { %2248 = vmatpush1.bf16.msra.mxu0 %v11531_v46  ;;  %2279 = vmatprep.mubr.bf16.mxu0 %v12887_v17 }
 0x3db   : > { %2249 = vmatprep.subr.bf16.mxu0 %v11541_v21  ;;  %9374 = vmatprep.mubr.msk.bf16.mxu1 %vm10757_vm0, %v12885_v16 }
 0x3dc   : > { %9359 = vmatpush3.bf16.msra.mxu1 %v9975_v55 }
 0x3dd   : > { %9360 = vmatprep.subr.bf16.mxu1 %v12885_v16 }
 0x3de   : > { %2250 = vmatpush1.bf16.msra.mxu0 %v11547_v34 }
 0x3df   : > { %2251 = vmatprep.subr.bf16.mxu0 %v11557_v41 }
 0x3e0   : > { %9361 = vmatpush3.bf16.msra.mxu1 %v9976_v14 }
 0x3e1   : > { %9362 = vmatprep.subr.bf16.mxu1 %v12885_v16 }
 0x3e2   : > { %2252 = vmatpush1.bf16.msra.mxu0 %v11563_v33 }
 0x3e3   : > { %2253 = vmatprep.subr.bf16.mxu0 %v11573_v22 }
 0x3e4   : > { %9363 = vmatpush3.bf16.msra.mxu1 %v9977_v61 }
 0x3e5   : > { %9364 = vmatprep.subr.bf16.mxu1 %v12885_v16 }
 0x3e6   : > { %2254 = vmatpush1.bf16.msra.mxu0 %v11579_v25 }
 0x3e7   : > { %2255 = vmatprep.subr.bf16.mxu0 %v11594_v35 }
 0x3e8   : > { %9365 = vmatpush3.bf16.msra.mxu1 %v9978_v4 }
 0x3e9   : > { %9366 = vmatprep.subr.bf16.mxu1 %v12885_v16 }
 0x3ea   : > { %2256 = vmatpush1.bf16.msra.mxu0 %v11589_v32 }
 0x3eb   : > { %2257 = vmatprep.subr.bf16.mxu0 %v11603_v45 }
 0x3ec   : > { %9367 = vmatpush3.bf16.msra.mxu1 %v9979_v7 }
 0x3ed   : > { %9368 = vmatprep.subr.bf16.mxu1 %v12885_v16 }
 0x3ee   : > { %2258 = vmatpush1.bf16.msra.mxu0 %v11610_v42 }
 0x3ef   : > { %2259 = vmatprep.subr.bf16.mxu0 %v11620_v50 }
 0x3f0   : > { %9369 = vmatpush3.bf16.msra.mxu1 %v9980_v9 }
 0x3f1   : > { %9370 = vmatprep.subr.bf16.mxu1 %v12885_v16 }
 0x3f2   : > { %2260 = vmatpush1.bf16.msra.mxu0 %v11626_v51 }
 0x3f3   : > { %2261 = vmatprep.subr.bf16.mxu0 %v11636_v57 }
 0x3f4   : > { %9371 = vmatpush3.bf16.msra.mxu1 %v9981_v10 }
 0x3f5   : > { %9372 = vmatprep.subr.bf16.mxu1 %v12885_v16 }
 0x3f6   : > { %2262 = vmatpush1.bf16.msra.mxu0 %v11642_v38 }
 0x3f7   : > { %2516 = vmatprep.subr.bf16.mxu0 %v11526_v43 }
 0x3f8   : > { %9373 = vmatpush3.bf16.msra.mxu1 %v9982_v23 }
 0x3f9   : > { %9378 = vmatprep.subr.bf16.mxu1 %v12885_v16 }
 0x4ac   : > { %v2012_v31 = vpop.f32.mrb[12].mxu0  ;;  %v2053_v39 = vpop.f32.mrb[12].mxu1 }
 0x4ad   : > { %v2059_v40 = vadd.f32 %v2012_v31, %v11341_v24  ;;  %v2014_v44 = vpop.f32.mrb[13].mxu0  ;;  %v9356_v59 = vpop.f32.mrb[13].mxu1  ;;  %v2073_v14 = vadd.f32 %v11414_v12, %v2053_v39  ;;  %v965_v24 = vadd.f32 %v11418_v15, %v11328_v5  ;;  %v9983_v5 = vld [vmem:[%s12861_s3 + $0x8] ss:$12 sps:$4 sm:$0xff]   ;;  %v9985_v39 = vld [vmem:[%s12861_s3 + $0x38] ss:$12 sps:$4 sm:$0xff]  }
 0x4ae   : > { %v2060_v2 = vadd.f32 %v2014_v44, %v964_v36  ;;  %v2016_v48 = vpop.f32.mrb[14].mxu0  ;;  %v2056_v56 = vpop.f32.mrb[14].mxu1  ;;  %v9986_v44 = vld [vmem:[%s12861_s3 + $0x50] ss:$12 sps:$4 sm:$0xff]   ;;  %v9987_v59 = vld [vmem:[%s12861_s3 + $0x68] ss:$12 sps:$4 sm:$0xff]  }
 0x4af   : > { %v8454_v58 = vmul.f32 -1.442695, %v2059_v40  ;;  %v2017_v60 = vpop.f32.mrb[15].mxu0  ;;  %v9357_v62 = vpop.f32.mrb[15].mxu1  ;;  %v9989_v48 = vld [vmem:[%s12861_s3 + $0x98] ss:$12 sps:$4 sm:$0xff]  }
 0x4b0   : > { %v8455_v52 = vmul.f32 -1.442695, %v2060_v2  ;;  %v9988_v2 = vld [vmem:[%s12861_s3 + $0x80] ss:$12 sps:$4 sm:$0xff]   ;;  %v9990_v56 = vld [vmem:[%s12861_s3 + $0xb0] ss:$12 sps:$4 sm:$0xff]   ;;  %v967_v62 = vadd.f32 %v11404_v37, %v11346_v30 }
 0x4b1   : > { %10333 = vpow2.f32 %v8454_v58 }
 0x4b2   : > { %10335 = vpow2.f32 %v8455_v52 }
 0x4bb   : > { %v10334_v0 = vpop.eup %10333 }
 0x4bc   : > { %v2067_v53 = vadd.f32 1.0, %v10334_v0  ;;  %v10336_v55 = vpop.eup %10335 }
 0x4bd   : > { %v2068_v7 = vadd.f32 1.0, %v10336_v55 }
 0x4be   : > { %10337 = vrcp.f32 %v2067_v53 }
 0x4c8   : > { %v10338_v8 = vpop.eup %10337 }
 0x4c9   : > { %v2074_v61 = vmul.f32 %v10338_v8, %v2073_v14 }
 0x4cb   : > { %v2075_v4 = vadd.f32 %v2074_v61, %v965_v24 }
 0x4cd   : > { %10339 = vtanh.f32 %v2075_v4 }
 0x4ce   : > { %10341 = vrcp.f32 %v2068_v7 }
 0x4d7   : > { %v10340_v9 = vpop.eup %10339 }
 0x4d8   : > { %v2077_v10 = vsub.f32 %v11659_v3, %v10340_v9  ;;  %v10342_v23 = vpop.eup %10341  ;;  %v9984_v3 = vld [vmem:[%s12861_s3 + $0x20] ss:$12 sps:$4 sm:$0xff]  }
 0x4da   : > { %v2078_v31 = vmul.f32 %v10342_v23, %v2077_v10 }
 0x4dc   : > { %v11721_v36 = vadd.f32 %v10340_v9, %v2078_v31 }
 0x4de   : > { %v2080_v40 = vpack.c.bf16 %v11721_v36, %v11721_v36 }
 0x4e0   : > { %2082 = vst [vmem:[#allocation3 + $0xc] sm:$0xf] %v2080_v40  ;;  %2280 = vmatmul.mubr.bf16.vlgmr.msra.gmra.mrb[16].mxu0 %v2080_v40  ;;  %9375 = vmatmul.mubr.bf16.vlgmr.msra.gmra.mrb[16].mxu1 %v2080_v40 }
 0x4e1   : > { %2517 = vmatpush1.bf16.msra.mxu0 %v11531_v46  ;;  %2548 = vmatprep.mubr.bf16.mxu0 %v12887_v17 }
 0x4e2   : > { %2518 = vmatprep.subr.bf16.mxu0 %v11541_v21  ;;  %9394 = vmatprep.mubr.msk.bf16.mxu1 %vm10757_vm0, %v12885_v16 }
 0x4e3   : > { %9379 = vmatpush3.bf16.msra.mxu1 %v9983_v5 }
 0x4e4   : > { %9380 = vmatprep.subr.bf16.mxu1 %v12885_v16 }
 0x4e5   : > { %2519 = vmatpush1.bf16.msra.mxu0 %v11547_v34 }
 0x4e6   : > { %2520 = vmatprep.subr.bf16.mxu0 %v11557_v41 }
 0x4e7   : > { %9381 = vmatpush3.bf16.msra.mxu1 %v9984_v3 }
 0x4e8   : > { %9382 = vmatprep.subr.bf16.mxu1 %v12885_v16 }
 0x4e9   : > { %2521 = vmatpush1.bf16.msra.mxu0 %v11563_v33 }
 0x4ea   : > { %2522 = vmatprep.subr.bf16.mxu0 %v11573_v22 }
 0x4eb   : > { %9383 = vmatpush3.bf16.msra.mxu1 %v9985_v39 }
 0x4ec   : > { %9384 = vmatprep.subr.bf16.mxu1 %v12885_v16 }
 0x4ed   : > { %2523 = vmatpush1.bf16.msra.mxu0 %v11579_v25 }
 0x4ee   : > { %2524 = vmatprep.subr.bf16.mxu0 %v11594_v35 }
 0x4ef   : > { %9385 = vmatpush3.bf16.msra.mxu1 %v9986_v44 }
 0x4f0   : > { %9386 = vmatprep.subr.bf16.mxu1 %v12885_v16 }
 0x4f1   : > { %2525 = vmatpush1.bf16.msra.mxu0 %v11589_v32 }
 0x4f2   : > { %2526 = vmatprep.subr.bf16.mxu0 %v11603_v45 }
 0x4f3   : > { %9387 = vmatpush3.bf16.msra.mxu1 %v9987_v59 }
 0x4f4   : > { %9388 = vmatprep.subr.bf16.mxu1 %v12885_v16 }
 0x4f5   : > { %2527 = vmatpush1.bf16.msra.mxu0 %v11610_v42 }
 0x4f6   : > { %2528 = vmatprep.subr.bf16.mxu0 %v11620_v50 }
 0x4f7   : > { %9389 = vmatpush3.bf16.msra.mxu1 %v9988_v2 }
 0x4f8   : > { %9390 = vmatprep.subr.bf16.mxu1 %v12885_v16 }
 0x4f9   : > { %2529 = vmatpush1.bf16.msra.mxu0 %v11626_v51 }
 0x4fa   : > { %2530 = vmatprep.subr.bf16.mxu0 %v11636_v57 }
 0x4fb   : > { %9391 = vmatpush3.bf16.msra.mxu1 %v9989_v48 }
 0x4fc   : > { %9392 = vmatprep.subr.bf16.mxu1 %v12885_v16 }
 0x4fd   : > { %2531 = vmatpush1.bf16.msra.mxu0 %v11642_v38 }
 0x4fe   : > { %2785 = vmatprep.subr.bf16.mxu0 %v11526_v43 }
 0x4ff   : > { %9393 = vmatpush3.bf16.msra.mxu1 %v9990_v56 }
 0x500   : > { %9398 = vmatprep.subr.bf16.mxu1 %v12885_v16 }
 0x5b3   : > { %v2281_v58 = vpop.f32.mrb[16].mxu0  ;;  %v2322_v60 = vpop.f32.mrb[16].mxu1 }
 0x5b4   : > { %v2328_v52 = vadd.f32 %v2281_v58, %v11355_v47  ;;  %v2283_v0 = vpop.f32.mrb[17].mxu0  ;;  %v9376_v53 = vpop.f32.mrb[17].mxu1  ;;  %v2342_v31 = vadd.f32 %v11414_v12, %v2322_v60  ;;  %v968_v47 = vadd.f32 %v11418_v15, %v11344_v27  ;;  %v9991_v27 = vld [vmem:[%s12861_s3 + $0x8] ss:$12 sps:$4 sm:$0xff]   ;;  %v9993_v58 = vld [vmem:[%s12861_s3 + $0x38] ss:$12 sps:$4 sm:$0xff]  }
 0x5b5   : > { %v2329_v55 = vadd.f32 %v2283_v0, %v967_v62  ;;  %v2285_v14 = vpop.f32.mrb[18].mxu0  ;;  %v2325_v8 = vpop.f32.mrb[18].mxu1  ;;  %v9995_v60 = vld [vmem:[%s12861_s3 + $0x68] ss:$12 sps:$4 sm:$0xff]   ;;  %v9996_v62 = vld [vmem:[%s12861_s3 + $0x80] ss:$12 sps:$4 sm:$0xff]  }
 0x5b6   : > { %v8480_v24 = vmul.f32 -1.442695, %v2328_v52  ;;  %v2286_v61 = vpop.f32.mrb[19].mxu0  ;;  %v9377_v4 = vpop.f32.mrb[19].mxu1  ;;  %v9997_v52 = vld [vmem:[%s12861_s3 + $0x98] ss:$12 sps:$4 sm:$0xff]   ;;  %v970_v14 = vadd.f32 %v11404_v37, %v11362_v54 }
 0x5b7   : > { %v8481_v7 = vmul.f32 -1.442695, %v2329_v55  ;;  %v9998_v0 = vld [vmem:[%s12861_s3 + $0xb0] ss:$12 sps:$4 sm:$0xff]  }
 0x5b8   : > { %10343 = vpow2.f32 %v8480_v24 }
 0x5b9   : > { %10345 = vpow2.f32 %v8481_v7 }
 0x5c2   : > { %v10344_v9 = vpop.eup %10343 }
 0x5c3   : > { %v2336_v10 = vadd.f32 1.0, %v10344_v9  ;;  %v10346_v23 = vpop.eup %10345 }
 0x5c4   : > { %v2337_v3 = vadd.f32 1.0, %v10346_v23 }
 0x5c5   : > { %10347 = vrcp.f32 %v2336_v10 }
 0x5cf   : > { %v10348_v30 = vpop.eup %10347 }
 0x5d0   : > { %v2343_v40 = vmul.f32 %v10348_v30, %v2342_v31 }
 0x5d2   : > { %v2344_v5 = vadd.f32 %v2343_v40, %v968_v47 }
 0x5d4   : > { %10349 = vtanh.f32 %v2344_v5 }
 0x5d5   : > { %10351 = vrcp.f32 %v2337_v3 }
 0x5de   : > { %v10350_v39 = vpop.eup %10349 }
 0x5df   : > { %v2346_v44 = vsub.f32 %v11721_v36, %v10350_v39  ;;  %v10352_v59 = vpop.eup %10351  ;;  %v9992_v36 = vld [vmem:[%s12861_s3 + $0x20] ss:$12 sps:$4 sm:$0xff]  }
 0x5e1   : > { %v2347_v2 = vmul.f32 %v10352_v59, %v2346_v44 }
 0x5e3   : > { %v11783_v48 = vadd.f32 %v10350_v39, %v2347_v2 }
 0x5e5   : > { %v2349_v56 = vpack.c.bf16 %v11783_v48, %v11783_v48 }
 0x5e7   : > { %2351 = vst [vmem:[#allocation3 + $0x10] sm:$0xf] %v2349_v56  ;;  %2549 = vmatmul.mubr.bf16.vlgmr.msra.gmra.mrb[20].mxu0 %v2349_v56  ;;  %9395 = vmatmul.mubr.bf16.vlgmr.msra.gmra.mrb[20].mxu1 %v2349_v56 }
 0x5e8   : > { %2786 = vmatpush1.bf16.msra.mxu0 %v11531_v46  ;;  %2817 = vmatprep.mubr.bf16.mxu0 %v12887_v17 }
 0x5e9   : > { %2787 = vmatprep.subr.bf16.mxu0 %v11541_v21  ;;  %9414 = vmatprep.mubr.msk.bf16.mxu1 %vm10757_vm0, %v12885_v16 }
 0x5ea   : > { %9399 = vmatpush3.bf16.msra.mxu1 %v9991_v27 }
 0x5eb   : > { %9400 = vmatprep.subr.bf16.mxu1 %v12885_v16 }
 0x5ec   : > { %2788 = vmatpush1.bf16.msra.mxu0 %v11547_v34 }
 0x5ed   : > { %2789 = vmatprep.subr.bf16.mxu0 %v11557_v41 }
 0x5ee   : > { %9401 = vmatpush3.bf16.msra.mxu1 %v9992_v36 }
 0x5ef   : > { %9402 = vmatprep.subr.bf16.mxu1 %v12885_v16 }
 0x5f0   : > { %2790 = vmatpush1.bf16.msra.mxu0 %v11563_v33 }
 0x5f1   : > { %2791 = vmatprep.subr.bf16.mxu0 %v11573_v22 }
 0x5f2   : > { %9403 = vmatpush3.bf16.msra.mxu1 %v9993_v58 }
 0x5f3   : > { %9404 = vmatprep.subr.bf16.mxu1 %v12885_v16 }
 0x5f4   : > { %2792 = vmatpush1.bf16.msra.mxu0 %v11579_v25 }
 0x5f5   : > { %2793 = vmatprep.subr.bf16.mxu0 %v11594_v35 }
 0x5f8   : > { %2794 = vmatpush1.bf16.msra.mxu0 %v11589_v32 }
 0x5f9   : > { %2795 = vmatprep.subr.bf16.mxu0 %v11603_v45 }
 0x5fc   : > { %2796 = vmatpush1.bf16.msra.mxu0 %v11610_v42 }
 0x5fd   : > { %2797 = vmatprep.subr.bf16.mxu0 %v11620_v50 }
 0x600   : > { %2798 = vmatpush1.bf16.msra.mxu0 %v11626_v51 }
 0x601   : > { %2799 = vmatprep.subr.bf16.mxu0 %v11636_v57 }
 0x604   : > { %2800 = vmatpush1.bf16.msra.mxu0 %v11642_v38 }
 0x605   : > { %3054 = vmatprep.subr.bf16.mxu0 %v11526_v43  ;;  %v9994_v43 = vld [vmem:[%s12861_s3 + $0x50] ss:$12 sps:$4 sm:$0xff]  }
 0x606   : > { %9405 = vmatpush3.bf16.msra.mxu1 %v9994_v43 }
 0x607   : > { %9406 = vmatprep.subr.bf16.mxu1 %v12885_v16 }
 0x60a   : > { %9407 = vmatpush3.bf16.msra.mxu1 %v9995_v60 }
 0x60b   : > { %9408 = vmatprep.subr.bf16.mxu1 %v12885_v16 }
 0x60e   : > { %9409 = vmatpush3.bf16.msra.mxu1 %v9996_v62 }
 0x60f   : > { %9410 = vmatprep.subr.bf16.mxu1 %v12885_v16 }
 0x612   : > { %9411 = vmatpush3.bf16.msra.mxu1 %v9997_v52 }
 0x613   : > { %9412 = vmatprep.subr.bf16.mxu1 %v12885_v16 }
 0x616   : > { %9413 = vmatpush3.bf16.msra.mxu1 %v9998_v0 }
 0x617   : > { %9418 = vmatprep.subr.bf16.mxu1 %v12885_v16 }
 0x6ba   : > { %v2550_v53 = vpop.f32.mrb[20].mxu0  ;;  %v2591_v55 = vpop.f32.mrb[20].mxu1 }
 0x6bb   : > { %v2597_v8 = vadd.f32 %v2550_v53, %v11371_v63  ;;  %v2552_v24 = vpop.f32.mrb[21].mxu0  ;;  %v9396_v61 = vpop.f32.mrb[21].mxu1  ;;  %v2611_v3 = vadd.f32 %v11414_v12, %v2591_v55  ;;  %v971_v63 = vadd.f32 %v11418_v15, %v11357_v49  ;;  %v9999_v49 = vld [vmem:[%s12861_s3 + $0x8] ss:$12 sps:$4 sm:$0xff]  }
 0x6bc   : > { %v2598_v4 = vadd.f32 %v2552_v24, %v970_v14  ;;  %v2554_v7 = vpop.f32.mrb[22].mxu0  ;;  %v2594_v9 = vpop.f32.mrb[22].mxu1 }
 0x6bd   : > { %v8506_v10 = vmul.f32 -1.442695, %v2597_v8  ;;  %v2555_v23 = vpop.f32.mrb[23].mxu0  ;;  %v9397_v31 = vpop.f32.mrb[23].mxu1 }
 0x6be   : > { %v8507_v30 = vmul.f32 -1.442695, %v2598_v4 }
 0x6bf   : > { %10353 = vpow2.f32 %v8506_v10 }
 0x6c0   : > { %10355 = vpow2.f32 %v8507_v30 }
 0x6c9   : > { %v10354_v47 = vpop.eup %10353 }
 0x6ca   : > { %v2605_v40 = vadd.f32 1.0, %v10354_v47  ;;  %v10356_v5 = vpop.eup %10355 }
 0x6cb   : > { %v2606_v59 = vadd.f32 1.0, %v10356_v5  ;;  %v10014_v5 = vld [vmem:[#allocation6 + $0x1c] ss:$12 sps:$4 sm:$0xff]  }
 0x6cc   : > { %10357 = vrcp.f32 %v2605_v40  ;;  %v10007_v40 = vld [vmem:[#allocation6] ss:$12 sps:$4 sm:$0xff]  }
 0x6d6   : > { %v10358_v54 = vpop.eup %10357 }
 0x6d7   : > { %v2612_v39 = vmul.f32 %v10358_v54, %v2611_v3  ;;  %v10015_v3 = vld [vmem:[#allocation6 + $0x20] ss:$12 sps:$4 sm:$0xff]   ;;  %v10012_v54 = vld [vmem:[#allocation6 + $0x18] ss:$12 sps:$4 sm:$0xff]  }
 0x6d9   : > { %v2613_v44 = vadd.f32 %v2612_v39, %v971_v63  ;;  %v10018_v63 = vld [vmem:[#allocation6 + $0x34] ss:$12 sps:$4 sm:$0xff]   ;;  %v10019_v39 = vld [vmem:[#allocation6 + $0x38] ss:$12 sps:$4 sm:$0xff]  }
 0x6db   : > { %10359 = vtanh.f32 %v2613_v44  ;;  %v10016_v44 = vld [vmem:[#allocation6 + $0x30] ss:$12 sps:$4 sm:$0xff]  }
 0x6dc   : > { %10361 = vrcp.f32 %v2606_v59  ;;  %v10022_v59 = vld [vmem:[#allocation6 + $0x4c] ss:$12 sps:$4 sm:$0xff]  }
 0x6e5   : > { %v10360_v2 = vpop.eup %10359 }
 0x6e6   : > { %v2615_v56 = vsub.f32 %v11783_v48, %v10360_v2  ;;  %v10362_v27 = vpop.eup %10361 }
 0x6e8   : > { %v2616_v36 = vmul.f32 %v10362_v27, %v2615_v56  ;;  %v10020_v56 = vld [vmem:[#allocation6 + $0x48] ss:$12 sps:$4 sm:$0xff]   ;;  %v10026_v27 = vld [vmem:[#allocation6 + $0x64] ss:$12 sps:$4 sm:$0xff]  }
 0x6ea   : > { %v11845_v58 = vadd.f32 %v10360_v2, %v2616_v36  ;;  %v10023_v2 = vld [vmem:[#allocation6 + $0x50] ss:$12 sps:$4 sm:$0xff]   ;;  %v10027_v36 = vld [vmem:[#allocation6 + $0x68] ss:$12 sps:$4 sm:$0xff]  }
 0x6ec   : > { %v2618_v43 = vpack.c.bf16 %v11845_v58, %v11845_v58 }
 0x6ee   : > { %2620 = vst [vmem:[#allocation3 + $0x14] sm:$0xf] %v2618_v43  ;;  %2818 = vmatmul.mubr.bf16.vlgmr.msra.gmra.mrb[24].mxu0 %v2618_v43  ;;  %9415 = vmatmul.mubr.bf16.vlgmr.msra.gmra.mrb[24].mxu1 %v2618_v43  ;;  %v10030_v43 = vld [vmem:[#allocation6 + $0x7c] ss:$12 sps:$4 sm:$0xff]  }
 0x6ef   : > { %3055 = vmatpush1.bf16.msra.mxu0 %v11531_v46  ;;  %3086 = vmatprep.mubr.bf16.mxu0 %v12887_v17  ;;  %v10000_v46 = vld [vmem:[%s12861_s3 + $0x20] ss:$12 sps:$4 sm:$0xff]  }
 0x6f0   : > { %3056 = vmatprep.subr.bf16.mxu0 %v11541_v21  ;;  %9434 = vmatprep.mubr.msk.bf16.mxu1 %vm10757_vm0, %v12885_v16  ;;  %v10001_v21 = vld [vmem:[%s12861_s3 + $0x38] ss:$12 sps:$4 sm:$0xff]  }
 0x6f1   : > { %9419 = vmatpush3.bf16.msra.mxu1 %v9999_v49  ;;  %v10031_v49 = vld [vmem:[#allocation6 + $0x80] ss:$12 sps:$4 sm:$0xff]  }
 0x6f2   : > { %9420 = vmatprep.subr.bf16.mxu1 %v12885_v16 }
 0x6f3   : > { %3057 = vmatpush1.bf16.msra.mxu0 %v11547_v34  ;;  %v10002_v34 = vld [vmem:[%s12861_s3 + $0x50] ss:$12 sps:$4 sm:$0xff]  }
 0x6f4   : > { %3058 = vmatprep.subr.bf16.mxu0 %v11557_v41  ;;  %v10003_v41 = vld [vmem:[%s12861_s3 + $0x68] ss:$12 sps:$4 sm:$0xff]  }
 0x6f5   : > { %9421 = vmatpush3.bf16.msra.mxu1 %v10000_v46  ;;  %v10028_v46 = vld [vmem:[#allocation6 + $0x78] ss:$12 sps:$4 sm:$0xff]  }
 0x6f6   : > { %9422 = vmatprep.subr.bf16.mxu1 %v12885_v16 }
 0x6f7   : > { %3059 = vmatpush1.bf16.msra.mxu0 %v11563_v33  ;;  %v10009_v33 = vld [vmem:[#allocation6 + $0x4] ss:$12 sps:$4 sm:$0xff]  }
 0x6f8   : > { %3060 = vmatprep.subr.bf16.mxu0 %v11573_v22  ;;  %v10004_v22 = vld [vmem:[%s12861_s3 + $0x80] ss:$12 sps:$4 sm:$0xff]  }
 0x6f9   : > { %9423 = vmatpush3.bf16.msra.mxu1 %v10001_v21  ;;  %v10034_v21 = vld [vmem:[#allocation6 + $0x94] ss:$12 sps:$4 sm:$0xff]  }
 0x6fa   : > { %9424 = vmatprep.subr.bf16.mxu1 %v12885_v16 }
 0x6fb   : > { %3061 = vmatpush1.bf16.msra.mxu0 %v11579_v25  ;;  %v10005_v25 = vld [vmem:[%s12861_s3 + $0x98] ss:$12 sps:$4 sm:$0xff]  }
 0x6fc   : > { %3062 = vmatprep.subr.bf16.mxu0 %v11594_v35  ;;  %v10010_v35 = vld [vmem:[#allocation6 + $0x8] ss:$12 sps:$4 sm:$0xff]  }
 0x6fd   : > { %9425 = vmatpush3.bf16.msra.mxu1 %v10002_v34  ;;  %v10035_v34 = vld [vmem:[#allocation6 + $0x98] ss:$12 sps:$4 sm:$0xff]  }
 0x6fe   : > { %9426 = vmatprep.subr.bf16.mxu1 %v12885_v16 }
 0x6ff   : > { %3063 = vmatpush1.bf16.msra.mxu0 %v11589_v32  ;;  %v10006_v32 = vld [vmem:[%s12861_s3 + $0xb0] ss:$12 sps:$4 sm:$0xff]  }
 0x700   : > { %3064 = vmatprep.subr.bf16.mxu0 %v11603_v45 }
 0x701   : > { %9427 = vmatpush3.bf16.msra.mxu1 %v10003_v41  ;;  %v10032_v41 = vld [vmem:[#allocation6 + $0x90] ss:$12 sps:$4 sm:$0xff]  }
 0x702   : > { %9428 = vmatprep.subr.bf16.mxu1 %v12885_v16 }
 0x703   : > { %3065 = vmatpush1.bf16.msra.mxu0 %v11610_v42 }
 0x704   : > { %3066 = vmatprep.subr.bf16.mxu0 %v11620_v50  ;;  %v973_v50 = vadd.f32 %v11404_v37, %v11375_v6 }
 0x705   : > { %9429 = vmatpush3.bf16.msra.mxu1 %v10004_v22  ;;  %v10039_v22 = vld [vmem:[#allocation6 + $0xb0] ss:$12 sps:$4 sm:$0xff]  }
 0x706   : > { %9430 = vmatprep.subr.bf16.mxu1 %v12885_v16 }
 0x707   : > { %3067 = vmatpush1.bf16.msra.mxu0 %v11626_v51 }
 0x708   : > { %3068 = vmatprep.subr.bf16.mxu0 %v11636_v57 }
 0x709   : > { %9431 = vmatpush3.bf16.msra.mxu1 %v10005_v25  ;;  %v10036_v25 = vld [vmem:[#allocation6 + $0xa8] ss:$12 sps:$4 sm:$0xff]  }
 0x70a   : > { %9432 = vmatprep.subr.bf16.mxu1 %v12885_v16 }
 0x70b   : > { %3069 = vmatpush1.bf16.msra.mxu0 %v11642_v38 }
 0x70c   : > { %3371 = vmatprep.subr.bf16.mxu0 %v10009_v33  ;;  %v10038_v33 = vld [vmem:[#allocation6 + $0xac] ss:$12 sps:$4 sm:$0xff]  }
 0x70d   : > { %9433 = vmatpush3.bf16.msra.mxu1 %v10006_v32  ;;  %v10040_v32 = vld [vmem:[#allocation3 + $0x8] sm:$0xff]  }
 0x70e   : > { %9438 = vmatprep.subr.bf16.mxu1 %v10010_v35 }
 0x7c1   : > { %v2819_v45 = vpop.f32.mrb[24].mxu0  ;;  %v2860_v42 = vpop.f32.mrb[24].mxu1 }
 0x7c2   : > { %v2866_v51 = vadd.f32 %v2819_v45, %v11384_v20  ;;  %v2821_v57 = vpop.f32.mrb[25].mxu0  ;;  %v9416_v38 = vpop.f32.mrb[25].mxu1  ;;  %v2880_v61 = vadd.f32 %v11414_v12, %v2860_v42  ;;  %v974_v20 = vadd.f32 %v11418_v15, %v11373_v1  ;;  %v10011_v1 = vld [vmem:[#allocation3] sm:$0xff]  }
 0x7c3   : > { %v2867_v48 = vadd.f32 %v2821_v57, %v973_v50  ;;  %v2823_v60 = vpop.f32.mrb[26].mxu0  ;;  %v2863_v62 = vpop.f32.mrb[26].mxu1  ;;  %v11914_v45 = vld [vmem:[#allocation9 + $0x4] ss:$12 sps:$4 sm:$0xff]   ;;  %v11916_v42 = vld [vmem:[#allocation9] ss:$12 sps:$4 sm:$0xff]  }
 0x7c4   : > { %v8532_v52 = vmul.f32 -1.442695, %v2866_v51  ;;  %v2824_v0 = vpop.f32.mrb[27].mxu0  ;;  %v9417_v53 = vpop.f32.mrb[27].mxu1  ;;  %v11920_v50 = vld [vmem:[#allocation9 + $0x1c] ss:$12 sps:$4 sm:$0xff]  }
 0x7c5   : > { %v8533_v55 = vmul.f32 -1.442695, %v2867_v48  ;;  %v11922_v51 = vld [vmem:[#allocation9 + $0x18] ss:$12 sps:$4 sm:$0xff]   ;;  %v11926_v57 = vld [vmem:[#allocation9 + $0x34] ss:$12 sps:$4 sm:$0xff]  }
 0x7c6   : > { %10363 = vpow2.f32 %v8532_v52  ;;  %v11928_v38 = vld [vmem:[#allocation9 + $0x30] ss:$12 sps:$4 sm:$0xff]   ;;  %v11932_v48 = vld [vmem:[#allocation9 + $0x4c] ss:$12 sps:$4 sm:$0xff]   ;;  %v11934_v60 = vld [vmem:[#allocation9 + $0x48] ss:$12 sps:$4 sm:$0xff]  }
 0x7c7   : > { %10365 = vpow2.f32 %v8533_v55  ;;  %v11938_v62 = vld [vmem:[#allocation9 + $0x60] ss:$12 sps:$4 sm:$0xff]   ;;  %v11940_v52 = vld [vmem:[#allocation9 + $0x64] ss:$12 sps:$4 sm:$0xff]   ;;  %v11942_v0 = vld [vmem:[#allocation9 + $0x7c] ss:$12 sps:$4 sm:$0xff]  }
 0x7c8   : > { %v11946_v53 = vld [vmem:[#allocation9 + $0x78] ss:$12 sps:$4 sm:$0xff]   ;;  %v11949_v55 = vld [vmem:[#allocation9 + $0x94] ss:$12 sps:$4 sm:$0xff]  }
 0x7d0   : > { %v10364_v14 = vpop.eup %10363 }
 0x7d1   : > { %v2874_v8 = vadd.f32 1.0, %v10364_v14  ;;  %v10366_v24 = vpop.eup %10365  ;;  %v11952_v14 = vld [vmem:[#allocation9 + $0x90] ss:$12 sps:$4 sm:$0xff]  }
 0x7d2   : > { %v2875_v9 = vadd.f32 1.0, %v10366_v24  ;;  %v11955_v24 = vld [vmem:[#allocation9 + $0xac] ss:$12 sps:$4 sm:$0xff]  }
 0x7d3   : > { %10367 = vrcp.f32 %v2874_v8  ;;  %v10064_v8 = vld [vmem:[#allocation9 + $0x8] ss:$12 sps:$4 sm:$0xff]  }
 0x7dd   : > { %v10368_v6 = vpop.eup %10367 }
 0x7de   : > { %v2881_v4 = vmul.f32 %v10368_v6, %v2880_v61  ;;  %v10068_v61 = vld [vmem:[#allocation9 + $0x20] ss:$12 sps:$4 sm:$0xff]   ;;  %v11958_v6 = vld [vmem:[#allocation9 + $0xa8] ss:$12 sps:$4 sm:$0xff]  }
 0x7e0   : > { %v2882_v7 = vadd.f32 %v2881_v4, %v974_v20  ;;  %v10069_v20 = vld [vmem:[#allocation9 + $0x38] ss:$12 sps:$4 sm:$0xff]   ;;  %v10070_v4 = vld [vmem:[#allocation9 + $0x50] ss:$12 sps:$4 sm:$0xff]  }
 0x7e2   : > { %10369 = vtanh.f32 %v2882_v7  ;;  %v10071_v7 = vld [vmem:[#allocation9 + $0x68] ss:$12 sps:$4 sm:$0xff]  }
 0x7e3   : > { %10371 = vrcp.f32 %v2875_v9  ;;  %v10072_v9 = vld [vmem:[#allocation9 + $0x80] ss:$12 sps:$4 sm:$0xff]  }
 0x7ec   : > { %v10370_v10 = vpop.eup %10369 }
 0x7ed   : > { %v2884_v23 = vsub.f32 %v11845_v58, %v10370_v10  ;;  %v10372_v31 = vpop.eup %10371  ;;  %v10024_v58 = vld [vmem:[#allocation6 + $0x60] ss:$12 sps:$4 sm:$0xff]  }
 0x7ef   : > { %v2885_v30 = vmul.f32 %v10372_v31, %v2884_v23  ;;  %v10074_v23 = vld [vmem:[#allocation9 + $0xb0] ss:$12 sps:$4 sm:$0xff]  }
 0x7f1   : > { %v11905_v47 = vadd.f32 %v10370_v10, %v2885_v30  ;;  %v10073_v10 = vld [vmem:[#allocation9 + $0x98] ss:$12 sps:$4 sm:$0xff]  }
 0x7f3   : > { %v2887_v12 = vpack.c.bf16 %v11905_v47, %v11905_v47 }
 0x7f5   : > { %2889 = vst [vmem:[#allocation3 + $0x18] sm:$0xf] %v2887_v12  ;;  %3087 = vmatmul.mubr.bf16.vlgmr.msra.gmra.mrb[28].mxu0 %v2887_v12  ;;  %9435 = vmatmul.mubr.bf16.vlgmr.msra.gmra.mrb[28].mxu1 %v2887_v12 }
 0x7f6   : > { %3372 = vmatpush1.bf16.msra.mxu0 %v10007_v40  ;;  %9439 = vmatpush3.bf16.msra.mxu1 %v10010_v35  ;;  %v10041_v35 = vld [vmem:[#allocation3 + $0x10] sm:$0xff]   ;;  %v976_v40 = vadd.f32 %v11404_v37, %v11386_v26  ;;  %v10558_v26 = vld [vmem:[%s12863_s5 + $0x2] ss:$0 sm:$0xff] }
 0x7f7   : > { %9454 = vmatprep.mubr.bf16.mxu1 %v10011_v1  ;;  %3373 = vmatprep.subr.bf16.mxu0 %v10014_v5 }
 0x7f8   : > { %9440 = vmatprep.subr.bf16.mxu1 %v10015_v3  ;;  %3403 = vmatprep.mubr.bf16.mxu0 %v12887_v17 }
 0x7fa   : > { %3374 = vmatpush1.bf16.msra.mxu0 %v10012_v54  ;;  %9441 = vmatpush3.bf16.msra.mxu1 %v10015_v3 }
 0x7fb   : > { %3375 = vmatprep.subr.bf16.mxu0 %v10018_v63  ;;  %9442 = vmatprep.subr.bf16.mxu1 %v10019_v39 }
 0x7fe   : > { %3376 = vmatpush1.bf16.msra.mxu0 %v10016_v44  ;;  %9443 = vmatpush3.bf16.msra.mxu1 %v10019_v39 }
 0x7ff   : > { %3377 = vmatprep.subr.bf16.mxu0 %v10022_v59  ;;  %9444 = vmatprep.subr.bf16.mxu1 %v10023_v2 }
 0x802   : > { %3378 = vmatpush1.bf16.msra.mxu0 %v10020_v56  ;;  %9445 = vmatpush3.bf16.msra.mxu1 %v10023_v2 }
 0x803   : > { %3379 = vmatprep.subr.bf16.mxu0 %v10026_v27  ;;  %9446 = vmatprep.subr.bf16.mxu1 %v10027_v36 }
 0x806   : > { %3380 = vmatpush1.bf16.msra.mxu0 %v10024_v58  ;;  %9447 = vmatpush3.bf16.msra.mxu1 %v10027_v36  ;;  %v977_v58 = vadd.f32 %v11418_v15, %v11388_v28 }
 0x807   : > { %3381 = vmatprep.subr.bf16.mxu0 %v10030_v43  ;;  %9448 = vmatprep.subr.bf16.mxu1 %v10031_v49 }
 0x80a   : > { %3382 = vmatpush1.bf16.msra.mxu0 %v10028_v46  ;;  %9449 = vmatpush3.bf16.msra.mxu1 %v10031_v49 }
 0x80b   : > { %3383 = vmatprep.subr.bf16.mxu0 %v10034_v21  ;;  %9450 = vmatprep.subr.bf16.mxu1 %v10035_v34 }
 0x80e   : > { %3384 = vmatpush1.bf16.msra.mxu0 %v10032_v41  ;;  %9451 = vmatpush3.bf16.msra.mxu1 %v10035_v34 }
 0x80f   : > { %3385 = vmatprep.subr.bf16.mxu0 %v10038_v33  ;;  %9452 = vmatprep.subr.bf16.mxu1 %v10039_v22 }
 0x812   : > { %3386 = vmatpush1.bf16.msra.mxu0 %v10036_v25  ;;  %9453 = vmatpush3.bf16.msra.mxu1 %v10039_v22 }
 0x813   : > { %9462 = vmatprep.subr.bf16.mxu1 %v12885_v16  ;;  %3703 = vmatprep.subr.bf16.mxu0 %v11914_v45 }
 0x815   : > { %3404 = vmatmul.mubr.bf16.vlgmr.msra.gmra.mrb[32].mxu0 %v10011_v1  ;;  %9455 = vmatmul.mubr.bf16.vlgmr.msra.gmra.mrb[32].mxu1 %v10040_v32 }
 0x816   : > { %9458 = vmatprep.mubr.bf16.mxu1 %v10041_v35  ;;  %3413 = vmatprep.mubr.bf16.mxu0 %v12887_v17 }
 0x817   : > { %3704 = vmatpush1.bf16.msra.mxu0 %v11916_v42  ;;  %9463 = vmatpush3.bf16.msra.mxu1 %v10064_v8 }
 0x818   : > { %3705 = vmatprep.subr.bf16.mxu0 %v11920_v50  ;;  %9464 = vmatprep.subr.bf16.mxu1 %v12885_v16 }
 0x81b   : > { %3706 = vmatpush1.bf16.msra.mxu0 %v11922_v51  ;;  %9465 = vmatpush3.bf16.msra.mxu1 %v10068_v61 }
 0x81c   : > { %3707 = vmatprep.subr.bf16.mxu0 %v11926_v57  ;;  %9466 = vmatprep.subr.bf16.mxu1 %v12885_v16 }
 0x81d   : > { %3414 = vmatmul.mubr.bf16.gmra.mrb[36].mxu0 %v10040_v32 }
 0x81e   : > { %3423 = vmatprep.mubr.bf16.mxu0 %v12887_v17 }
 0x81f   : > { %3708 = vmatpush1.bf16.msra.mxu0 %v11928_v38  ;;  %9467 = vmatpush3.bf16.msra.mxu1 %v10069_v20 }
 0x820   : > { %3709 = vmatprep.subr.bf16.mxu0 %v11932_v48  ;;  %9468 = vmatprep.subr.bf16.mxu1 %v12885_v16 }
 0x823   : > { %3710 = vmatpush1.bf16.msra.mxu0 %v11934_v60  ;;  %9469 = vmatpush3.bf16.msra.mxu1 %v10070_v4 }
 0x824   : > { %3711 = vmatprep.subr.bf16.mxu0 %v11940_v52  ;;  %9470 = vmatprep.subr.bf16.mxu1 %v12885_v16 }
 0x825   : > { %3424 = vmatmul.mubr.bf16.gmra.mrb[40].mxu0 %v10041_v35 }
 0x826   : > { %3433 = vmatprep.mubr.bf16.mxu0 %v12887_v17 }
 0x827   : > { %3712 = vmatpush1.bf16.msra.mxu0 %v11938_v62  ;;  %9471 = vmatpush3.bf16.msra.mxu1 %v10071_v7 }
 0x828   : > { %3713 = vmatprep.subr.bf16.mxu0 %v11942_v0  ;;  %9472 = vmatprep.subr.bf16.mxu1 %v12885_v16 }
 0x82b   : > { %3714 = vmatpush1.bf16.msra.mxu0 %v11946_v53  ;;  %9473 = vmatpush3.bf16.msra.mxu1 %v10072_v9 }
 0x82c   : > { %3715 = vmatprep.subr.bf16.mxu0 %v11949_v55  ;;  %9474 = vmatprep.subr.bf16.mxu1 %v12885_v16 }
 0x82f   : > { %3716 = vmatpush1.bf16.msra.mxu0 %v11952_v14  ;;  %9475 = vmatpush3.bf16.msra.mxu1 %v10073_v10 }
 0x830   : > { %3717 = vmatprep.subr.bf16.mxu0 %v11955_v24  ;;  %9476 = vmatprep.subr.bf16.mxu1 %v12885_v16 }
 0x833   : > { %3718 = vmatpush1.bf16.msra.mxu0 %v11958_v6  ;;  %9477 = vmatpush3.bf16.msra.mxu1 %v10074_v23 }
 0x834   : > { %3970 = vmatprep.subr.bf16.mxu0 %v11914_v45  ;;  %9482 = vmatprep.subr.bf16.mxu1 %v12885_v16 }
 0x8c8   : > { %v3088_v31 = vpop.f32.mrb[28].mxu0  ;;  %v3129_v30 = vpop.f32.mrb[28].mxu1 }
 0x8c9   : > { %v3135_v12 = vadd.f32 %v3088_v31, %v11391_v29  ;;  %v3090_v5 = vpop.f32.mrb[29].mxu0  ;;  %v9436_v3 = vpop.f32.mrb[29].mxu1  ;;  %v3149_v29 = vadd.f32 %v10558_v26, %v3129_v30 }
 0x8ca   : > { %v3136_v1 = vadd.f32 %v3090_v5, %v976_v40  ;;  %v3092_v54 = vpop.f32.mrb[30].mxu0  ;;  %v3132_v63 = vpop.f32.mrb[30].mxu1  ;;  %v10076_v3 = vld [vmem:[#allocation9 + $0x20] ss:$12 sps:$4 sm:$0xff]  }
 0x8cb   : > { %v8558_v39 = vmul.f32 -1.442695, %v3135_v12  ;;  %v3093_v44 = vpop.f32.mrb[31].mxu0  ;;  %v9437_v59 = vpop.f32.mrb[31].mxu1  ;;  %v10078_v54 = vld [vmem:[#allocation9 + $0x50] ss:$12 sps:$4 sm:$0xff]  }
 0x8cc   : > { %v8559_v2 = vmul.f32 -1.442695, %v3136_v1  ;;  %v10077_v1 = vld [vmem:[#allocation9 + $0x38] ss:$12 sps:$4 sm:$0xff]   ;;  %v10079_v63 = vld [vmem:[#allocation9 + $0x68] ss:$12 sps:$4 sm:$0xff]  }
 0x8cd   : > { %10373 = vpow2.f32 %v8558_v39  ;;  %v10080_v39 = vld [vmem:[#allocation9 + $0x80] ss:$12 sps:$4 sm:$0xff]   ;;  %v10081_v44 = vld [vmem:[#allocation9 + $0x98] ss:$12 sps:$4 sm:$0xff]   ;;  %v10082_v59 = vld [vmem:[#allocation9 + $0xb0] ss:$12 sps:$4 sm:$0xff]  }
 0x8ce   : > { %10375 = vpow2.f32 %v8559_v2  ;;  %v3168_v2 = vld [vmem:[%s12916_s4] sm:$0x7] }
 0x8d7   : > { %v10374_v56 = vpop.eup %10373 }
 0x8d8   : > { %v3143_v27 = vadd.f32 1.0, %v10374_v56  ;;  %v10376_v36 = vpop.eup %10375  ;;  %v3169_v56 = vmul.f32 %v3168_v2, %v11240_v19 }
 0x8d9   : > { %v3144_v46 = vadd.f32 1.0, %v10376_v36 }
 0x8da   : > { %10377 = vrcp.f32 %v3143_v27  ;;  %v3167_v27 = vld [vmem:[%s12917_s25] sm:$0x7]  ;;  %s8350_s25 = sshll.u32 %s11029_s23, 3 }
 0x8db   : > { %v3170_v36 = vadd.f32 %v3169_v56, %v3167_v27  ;;  %s668_s14 = scalar_lea.vmem [#allocation14], %s8350_s25 }
 0x8dc   : > { %s8208_s9 = sshll.u32 %s668_s14, 4  ;;  %s12816_s9 = int_to_ptr.vmem [resolvable:$true] %s8208_s9 }
 0x8dd   : > { %s10673_s8 = scalar_lea.vmem %s12816_s9, 128  ;;  %p10680_p2 = scmp.lt.s32.totalorder %s12816_s9, %s10678_s18 }
 0x8de   : > { %p10674_p1 = scmp.ne.s32.totalorder %s12816_s9, %s10673_s8  ;;  %p10681_p0 = scmp.lt.s32.totalorder %s10679_s12, %s10673_s8 }
 0x8e0   : > { %p10675_p6 = pnand %p10674_p1, %p12926_p3  ;;  %p10682_p12 = por %p10681_p0, %p10680_p2 }
 0x8e2   : > { %p10676_p10 = pneg %p10675_p6 }
 0x8e4   : > { %v10378_v37 = vpop.eup %10377  ;;  %p10683_p11 = pnand %p10682_p12, %p10676_p10 }
 0x8e5   : > { %v3150_v43 = vmul.f32 %v10378_v37, %v3149_v29 }
 0x8e7   : > { %v3151_v49 = vadd.f32 %v3150_v43, %v977_v58 }
 0x8e8   : > { %v11979_v21 = vpop.f32.mrb[32].mxu0  ;;  %v11981_v34 = vpop.f32.mrb[32].mxu1 }
 0x8e9   : > { %10379 = vtanh.f32 %v3151_v49  ;;  %v11983_v41 = vpop.f32.mrb[33].mxu0  ;;  %v11985_v33 = vpop.f32.mrb[33].mxu1 }
 0x8ea   : > { %v11987_v22 = vpop.f32.mrb[34].mxu0  ;;  %v11989_v25 = vpop.f32.mrb[34].mxu1  ;;  %10381 = vrcp.f32 %v3144_v46  ;;  %v12064_v46 = vrot.slane %v3170_v36, %v11231_v11 }
 0x8eb   : > { %v11991_v32 = vpop.f32.mrb[35].mxu0  ;;  %v11993_v28 = vpop.f32.mrb[35].mxu1 }
 0x8f0   : > { %v11995_v15 = vpop.f32.mrb[36].mxu0 }
 0x8f1   : > { %v11997_v35 = vpop.f32.mrb[37].mxu0 }
 0x8f2   : > { %v11999_v8 = vpop.f32.mrb[38].mxu0 }
 0x8f3   : > { %v10380_v61 = vpop.eup %10379  ;;  %v12001_v20 = vpop.f32.mrb[39].mxu0 }
 0x8f4   : > { %v3153_v4 = vsub.f32 %v11905_v47, %v10380_v61  ;;  %v10382_v7 = vpop.eup %10381  ;;  %v10075_v47 = vld [vmem:[#allocation9 + $0x8] ss:$12 sps:$4 sm:$0xff]  }
 0x8f6   : > { %v3154_v9 = vmul.f32 %v10382_v7, %v3153_v4  ;;  %v12071_v7 = vrot.slane %v3170_v36, %v11233_v13 }
 0x8f8   : > { %v3155_v10 = vadd.f32 %v10380_v61, %v3154_v9  ;;  %v12004_v23 = vpop.f32.mrb[40].mxu0  ;;  %v3406_v9 = vadd.f32 %v11979_v21, %v12064_v46  ;;  %v12080_v21 = vld [vmem:[%s12916_s4 + $0x2] ss:$0 sm:$0xff] }
 0x8f9   : > { %v12006_v31 = vpop.f32.mrb[41].mxu0 }
 0x8fa   : > { %v3156_v30 = vpack.c.bf16 %v3155_v10, %v3155_v10  ;;  %v12008_v40 = vpop.f32.mrb[42].mxu0  ;;  %v3408_v10 = vadd.f32 %v11983_v41, %v12071_v7  ;;  %v12083_v41 = vrot.slane %v3170_v36, %v11238_v18 }
 0x8fb   : > { %v12010_v12 = vpop.f32.mrb[43].mxu0 }
 0x8fc   : > { %3158 = vst [vmem:[#allocation3 + $0x1c] sm:$0xf] %v3156_v30 }
 0x903   : > { %v10063_v5 = vld [vmem:[#allocation3 + $0x18] sm:$0xff]  }
 0x904   : > { %3434 = vmatmul.mubr.bf16.gmra.mrb[44].mxu0 %v10063_v5  ;;  %9459 = vmatmul.mubr.bf16.gmra.mrb[36].mxu1 %v10063_v5 }
 0x905   : > { %3735 = vmatprep.mubr.bf16.mxu0 %v12887_v17  ;;  %9478 = vmatprep.mubr.msk.bf16.mxu1 %vm10757_vm0, %v12885_v16 }
 0x90c   : > { %3736 = vmatmul.mubr.bf16.vlgmr.msra.gmra.mrb[48].mxu0 %v12887_v17  ;;  %9479 = vmatmul.mubr.bf16.vlgmr.msra.gmra.mrb[40].mxu1 %v12887_v17 }
 0x90d   : > { %3971 = vmatpush1.bf16.msra.mxu0 %v11916_v42  ;;  %4002 = vmatprep.mubr.bf16.mxu0 %v12887_v17 }
 0x90e   : > { %3972 = vmatprep.subr.bf16.mxu0 %v11920_v50  ;;  %9498 = vmatprep.mubr.msk.bf16.mxu1 %vm10757_vm0, %v12885_v16 }
 0x90f   : > { %9483 = vmatpush3.bf16.msra.mxu1 %v10075_v47 }
 0x910   : > { %9484 = vmatprep.subr.bf16.mxu1 %v12885_v16 }
 0x911   : > { %3973 = vmatpush1.bf16.msra.mxu0 %v11922_v51 }
 0x912   : > { %3974 = vmatprep.subr.bf16.mxu0 %v11926_v57 }
 0x913   : > { %9485 = vmatpush3.bf16.msra.mxu1 %v10076_v3 }
 0x914   : > { %9486 = vmatprep.subr.bf16.mxu1 %v12885_v16 }
 0x915   : > { %3975 = vmatpush1.bf16.msra.mxu0 %v11928_v38 }
 0x916   : > { %3976 = vmatprep.subr.bf16.mxu0 %v11932_v48 }
 0x917   : > { %9487 = vmatpush3.bf16.msra.mxu1 %v10077_v1 }
 0x918   : > { %9488 = vmatprep.subr.bf16.mxu1 %v12885_v16 }
 0x919   : > { %3977 = vmatpush1.bf16.msra.mxu0 %v11934_v60 }
 0x91a   : > { %3978 = vmatprep.subr.bf16.mxu0 %v11940_v52 }
 0x91b   : > { %9489 = vmatpush3.bf16.msra.mxu1 %v10078_v54 }
 0x91c   : > { %9490 = vmatprep.subr.bf16.mxu1 %v12885_v16 }
 0x91d   : > { %3979 = vmatpush1.bf16.msra.mxu0 %v11938_v62 }
 0x91e   : > { %3980 = vmatprep.subr.bf16.mxu0 %v11942_v0 }
 0x91f   : > { %9491 = vmatpush3.bf16.msra.mxu1 %v10079_v63 }
 0x920   : > { %9492 = vmatprep.subr.bf16.mxu1 %v12885_v16 }
 0x921   : > { %3981 = vmatpush1.bf16.msra.mxu0 %v11946_v53 }
 0x922   : > { %3982 = vmatprep.subr.bf16.mxu0 %v11949_v55 }
 0x923   : > { %9493 = vmatpush3.bf16.msra.mxu1 %v10080_v39 }
 0x924   : > { %9494 = vmatprep.subr.bf16.mxu1 %v12885_v16 }
 0x925   : > { %3983 = vmatpush1.bf16.msra.mxu0 %v11952_v14 }
 0x926   : > { %3984 = vmatprep.subr.bf16.mxu0 %v11955_v24 }
 0x927   : > { %9495 = vmatpush3.bf16.msra.mxu1 %v10081_v44 }
 0x928   : > { %9496 = vmatprep.subr.bf16.mxu1 %v12885_v16 }
 0x929   : > { %3985 = vmatpush1.bf16.msra.mxu0 %v11958_v6 }
 0x92a   : > { %4237 = vmatprep.subr.bf16.mxu0 %v11914_v45 }
 0x92b   : > { %9497 = vmatpush3.bf16.msra.mxu1 %v10082_v59 }
 0x92c   : > { %9502 = vmatprep.subr.bf16.mxu1 %v12885_v16 }
 0x9d7   : > { %v12051_v26 = vpop.f32.mrb[44].mxu0  ;;  %v12053_v29 = vpop.f32.mrb[36].mxu1 }
 0x9d8   : > { %v12055_v37 = vpop.f32.mrb[45].mxu0  ;;  %v12057_v58 = vpop.f32.mrb[37].mxu1 }
 0x9d9   : > { %v12059_v43 = vpop.f32.mrb[46].mxu0  ;;  %v12061_v49 = vpop.f32.mrb[38].mxu1 }
 0x9da   : > { %v12066_v61 = vpop.f32.mrb[47].mxu0  ;;  %v12068_v4 = vpop.f32.mrb[39].mxu1 }
 0x9df   : > { %v3737_v30 = vpop.f32.mrb[48].mxu0  ;;  %v3778_v5 = vpop.f32.mrb[40].mxu1 }
 0x9e0   : > { %v3784_v47 = vadd.f32 %v3737_v30, %v3406_v9  ;;  %v3739_v3 = vpop.f32.mrb[49].mxu0  ;;  %v9480_v1 = vpop.f32.mrb[41].mxu1  ;;  %v3798_v9 = vadd.f32 %v12080_v21, %v3778_v5  ;;  %v10083_v5 = vld [vmem:[#allocation9 + $0x8] ss:$12 sps:$4 sm:$0xff]  }
 0x9e1   : > { %v3785_v54 = vadd.f32 %v3739_v3, %v3408_v10  ;;  %v3741_v63 = vpop.f32.mrb[50].mxu0  ;;  %v3781_v39 = vpop.f32.mrb[42].mxu1 }
 0x9e2   : > { %v8613_v44 = vmul.f32 -1.442695, %v3784_v47  ;;  %v3742_v59 = vpop.f32.mrb[51].mxu0  ;;  %v9481_v2 = vpop.f32.mrb[43].mxu1  ;;  %v3479_v47 = vadd.f32 %v11985_v33, %v12083_v41  ;;  %v12918_v33 = vmov 0.0  }
 0x9e3   : > { %v8614_v56 = vmul.f32 -1.442695, %v3785_v54  ;;  %v10084_v2 = vld [vmem:[#allocation9 + $0x20] ss:$12 sps:$4 sm:$0xff]  }
 0x9e4   : > { %10383 = vpow2.f32 %v8613_v44 }
 0x9e5   : > { %10385 = vpow2.f32 %v8614_v56  ;;  %v10085_v56 = vld [vmem:[#allocation9 + $0x38] ss:$12 sps:$4 sm:$0xff]  }
 0x9ee   : > { %v10384_v27 = vpop.eup %10383 }
 0x9ef   : > { %v3792_v16 = vadd.f32 1.0, %v10384_v27  ;;  %v10386_v10 = vpop.eup %10385  ;;  %v10086_v27 = vld [vmem:[#allocation9 + $0x50] ss:$12 sps:$4 sm:$0xff]  }
 0x9f0   : > { %v3793_v1 = vadd.f32 1.0, %v10386_v10  ;;  %v10088_v10 = vld [vmem:[#allocation9 + $0x80] ss:$12 sps:$4 sm:$0xff]  }
 0x9f1   : > { %10387 = vrcp.f32 %v3792_v16 }
 0x9fb   : > { %v10388_v30 = vpop.eup %10387 }
 0x9fc   : > { %v3799_v3 = vmul.f32 %v10388_v30, %v3798_v9  ;;  %v10087_v9 = vld [vmem:[#allocation9 + $0x68] ss:$12 sps:$4 sm:$0xff]   ;;  %v10089_v30 = vld [vmem:[#allocation9 + $0x98] ss:$12 sps:$4 sm:$0xff]  }
 0x9fe   : > { %v3800_v54 = vadd.f32 %v3799_v3, %v3479_v47  ;;  %v10090_v47 = vld [vmem:[#allocation9 + $0xb0] ss:$12 sps:$4 sm:$0xff]   ;;  %v3410_v3 = vadd.f32 %v11987_v22, %v12064_v46 }
 0xa00   : > { %10389 = vtanh.f32 %v3800_v54 }
 0xa01   : > { %10391 = vrcp.f32 %v3793_v1  ;;  %v3412_v1 = vadd.f32 %v11991_v32, %v12071_v7 }
 0xa0a   : > { %v10390_v16 = vpop.eup %10389 }
 0xa0b   : > { %v3802_v63 = vsub.f32 0.0, %v10390_v16  ;;  %v10392_v39 = vpop.eup %10391 }
 0xa0d   : > { %v3803_v44 = vmul.f32 %v10392_v39, %v3802_v63 }
 0xa0f   : > { %v12088_v59 = vadd.f32 %v10390_v16, %v3803_v44 }
 0xa11   : > { %v3805_v36 = vpack.c.bf16 %v12088_v59, %v12088_v59 }
 0xa13   : > { %3806 = vst [vmem:[#allocation3] sm:$0xf] %v3805_v36  ;;  %4003 = vmatmul.mubr.bf16.vlgmr.msra.gmra.mrb[52].mxu0 %v3805_v36  ;;  %9499 = vmatmul.mubr.bf16.vlgmr.msra.gmra.mrb[44].mxu1 %v3805_v36 }
 0xa14   : > { %4238 = vmatpush1.bf16.msra.mxu0 %v11916_v42  ;;  %4269 = vmatprep.mubr.bf16.mxu0 %v12887_v17 }
 0xa15   : > { %4239 = vmatprep.subr.bf16.mxu0 %v11920_v50  ;;  %9518 = vmatprep.mubr.msk.bf16.mxu1 %vm10757_vm0, %v12918_v33 }
 0xa16   : > { %9503 = vmatpush3.bf16.msra.mxu1 %v10083_v5 }
 0xa17   : > { %9504 = vmatprep.subr.bf16.mxu1 %v12918_v33 }
 0xa18   : > { %4240 = vmatpush1.bf16.msra.mxu0 %v11922_v51 }
 0xa19   : > { %4241 = vmatprep.subr.bf16.mxu0 %v11926_v57 }
 0xa1a   : > { %9505 = vmatpush3.bf16.msra.mxu1 %v10084_v2 }
 0xa1b   : > { %9506 = vmatprep.subr.bf16.mxu1 %v12918_v33 }
 0xa1c   : > { %4242 = vmatpush1.bf16.msra.mxu0 %v11928_v38 }
 0xa1d   : > { %4243 = vmatprep.subr.bf16.mxu0 %v11932_v48 }
 0xa1e   : > { %9507 = vmatpush3.bf16.msra.mxu1 %v10085_v56 }
 0xa1f   : > { %9508 = vmatprep.subr.bf16.mxu1 %v12918_v33 }
 0xa20   : > { %4244 = vmatpush1.bf16.msra.mxu0 %v11934_v60 }
 0xa21   : > { %4245 = vmatprep.subr.bf16.mxu0 %v11940_v52 }
 0xa22   : > { %9509 = vmatpush3.bf16.msra.mxu1 %v10086_v27 }
 0xa23   : > { %9510 = vmatprep.subr.bf16.mxu1 %v12918_v33 }
 0xa24   : > { %4246 = vmatpush1.bf16.msra.mxu0 %v11938_v62 }
 0xa25   : > { %4247 = vmatprep.subr.bf16.mxu0 %v11942_v0 }
 0xa26   : > { %9511 = vmatpush3.bf16.msra.mxu1 %v10087_v9 }
 0xa27   : > { %9512 = vmatprep.subr.bf16.mxu1 %v12918_v33 }
 0xa28   : > { %4248 = vmatpush1.bf16.msra.mxu0 %v11946_v53 }
 0xa29   : > { %4249 = vmatprep.subr.bf16.mxu0 %v11949_v55 }
 0xa2a   : > { %9513 = vmatpush3.bf16.msra.mxu1 %v10088_v10 }
 0xa2b   : > { %9514 = vmatprep.subr.bf16.mxu1 %v12918_v33 }
 0xa2c   : > { %4250 = vmatpush1.bf16.msra.mxu0 %v11952_v14 }
 0xa2d   : > { %4251 = vmatprep.subr.bf16.mxu0 %v11955_v24 }
 0xa2e   : > { %9515 = vmatpush3.bf16.msra.mxu1 %v10089_v30 }
 0xa2f   : > { %9516 = vmatprep.subr.bf16.mxu1 %v12918_v33 }
 0xa30   : > { %4252 = vmatpush1.bf16.msra.mxu0 %v11958_v6 }
 0xa31   : > { %4504 = vmatprep.subr.bf16.mxu0 %v11914_v45 }
 0xa32   : > { %9517 = vmatpush3.bf16.msra.mxu1 %v10090_v47 }
 0xa33   : > { %9522 = vmatprep.subr.bf16.mxu1 %v12918_v33 }
 0xae6   : > { %v4004_v54 = vpop.f32.mrb[52].mxu0  ;;  %v4045_v16 = vpop.f32.mrb[44].mxu1 }
 0xae7   : > { %v4051_v63 = vadd.f32 %v4004_v54, %v3410_v3  ;;  %v4006_v39 = vpop.f32.mrb[53].mxu0  ;;  %v9500_v44 = vpop.f32.mrb[45].mxu1  ;;  %v4065_v32 = vadd.f32 %v12080_v21, %v4045_v16  ;;  %v3482_v3 = vadd.f32 %v11993_v28, %v12083_v41  ;;  %v10091_v28 = vld [vmem:[#allocation9 + $0x8] ss:$12 sps:$4 sm:$0xff]  }
 0xae8   : > { %v4052_v36 = vadd.f32 %v4006_v39, %v3412_v1  ;;  %v4008_v5 = vpop.f32.mrb[54].mxu0  ;;  %v4048_v2 = vpop.f32.mrb[46].mxu1 }
 0xae9   : > { %v8639_v56 = vmul.f32 -1.442695, %v4051_v63  ;;  %v4009_v27 = vpop.f32.mrb[55].mxu0  ;;  %v9501_v9 = vpop.f32.mrb[47].mxu1 }
 0xaea   : > { %v8640_v10 = vmul.f32 -1.442695, %v4052_v36 }
 0xaeb   : > { %10393 = vpow2.f32 %v8639_v56 }
 0xaec   : > { %10395 = vpow2.f32 %v8640_v10 }
 0xaf5   : > { %v10394_v30 = vpop.eup %10393 }
 0xaf6   : > { %v4059_v47 = vadd.f32 1.0, %v10394_v30  ;;  %v10396_v22 = vpop.eup %10395 }
 0xaf7   : > { %v4060_v39 = vadd.f32 1.0, %v10396_v22 }
 0xaf8   : > { %10397 = vrcp.f32 %v4059_v47 }
 0xb02   : > { %v10398_v17 = vpop.eup %10397 }
 0xb03   : > { %v4066_v54 = vmul.f32 %v10398_v17, %v4065_v32  ;;  %v12919_v17 = vmov 0  }
 0xb05   : > { %v4067_v1 = vadd.f32 %v4066_v54, %v3482_v3 }
 0xb07   : > { %10399 = vtanh.f32 %v4067_v1 }
 0xb08   : > { %10401 = vrcp.f32 %v4060_v39 }
 0xb11   : > { %v10400_v63 = vpop.eup %10399 }
 0xb12   : > { %v4069_v44 = vsub.f32 %v12088_v59, %v10400_v63  ;;  %v10402_v36 = vpop.eup %10401 }
 0xb14   : > { %v4070_v5 = vmul.f32 %v10402_v36, %v4069_v44  ;;  %v3487_v36 = vadd.f32 %v11981_v34, %v12083_v41  ;;  %v10099_v34 = vld [vmem:[#allocation9 + $0x8] ss:$12 sps:$4 sm:$0xff]  }
 0xb16   : > { %v12127_v2 = vadd.f32 %v10400_v63, %v4070_v5 }
 0xb18   : > { %v4072_v56 = vpack.c.bf16 %v12127_v2, %v12127_v2 }
 0xb1a   : > { %4073 = vst [vmem:[#allocation3 + $0x4] sm:$0xf] %v4072_v56  ;;  %4270 = vmatmul.mubr.bf16.vlgmr.msra.gmra.mrb[56].mxu0 %v4072_v56  ;;  %9519 = vmatmul.mubr.bf16.vlgmr.msra.gmra.mrb[48].mxu1 %v4072_v56 }
 0xb1b   : > { %4505 = vmatpush1.bf16.msra.mxu0 %v11916_v42  ;;  %4536 = vmatprep.mubr.bf16.mxu0 %v12919_v17 }
 0xb1c   : > { %4506 = vmatprep.subr.bf16.mxu0 %v11920_v50  ;;  %9538 = vmatprep.mubr.msk.bf16.mxu1 %vm10757_vm0, %v12918_v33 }
 0xb1d   : > { %9523 = vmatpush3.bf16.msra.mxu1 %v10091_v28 }
 0xb1e   : > { %9524 = vmatprep.subr.bf16.mxu1 %v12918_v33 }
 0xb1f   : > { %4507 = vmatpush1.bf16.msra.mxu0 %v11922_v51 }
 0xb20   : > { %4508 = vmatprep.subr.bf16.mxu0 %v11926_v57 }
 0xb23   : > { %4509 = vmatpush1.bf16.msra.mxu0 %v11928_v38 }
 0xb24   : > { %4510 = vmatprep.subr.bf16.mxu0 %v11932_v48 }
 0xb27   : > { %4511 = vmatpush1.bf16.msra.mxu0 %v11934_v60 }
 0xb28   : > { %4512 = vmatprep.subr.bf16.mxu0 %v11940_v52  ;;  %v10092_v52 = vld [vmem:[#allocation9 + $0x20] ss:$12 sps:$4 sm:$0xff]  }
 0xb29   : > { %9525 = vmatpush3.bf16.msra.mxu1 %v10092_v52 }
 0xb2a   : > { %9526 = vmatprep.subr.bf16.mxu1 %v12918_v33 }
 0xb2b   : > { %4513 = vmatpush1.bf16.msra.mxu0 %v11938_v62  ;;  %v10093_v62 = vld [vmem:[#allocation9 + $0x38] ss:$12 sps:$4 sm:$0xff]  }
 0xb2c   : > { %4514 = vmatprep.subr.bf16.mxu0 %v11942_v0  ;;  %v10094_v0 = vld [vmem:[#allocation9 + $0x50] ss:$12 sps:$4 sm:$0xff]  }
 0xb2d   : > { %9527 = vmatpush3.bf16.msra.mxu1 %v10093_v62 }
 0xb2e   : > { %9528 = vmatprep.subr.bf16.mxu1 %v12918_v33 }
 0xb2f   : > { %4515 = vmatpush1.bf16.msra.mxu0 %v11946_v53  ;;  %v10095_v53 = vld [vmem:[#allocation9 + $0x68] ss:$12 sps:$4 sm:$0xff]  }
 0xb30   : > { %4516 = vmatprep.subr.bf16.mxu0 %v11949_v55  ;;  %v10096_v55 = vld [vmem:[#allocation9 + $0x80] ss:$12 sps:$4 sm:$0xff]  }
 0xb31   : > { %9529 = vmatpush3.bf16.msra.mxu1 %v10094_v0 }
 0xb32   : > { %9530 = vmatprep.subr.bf16.mxu1 %v12918_v33 }
 0xb33   : > { %4517 = vmatpush1.bf16.msra.mxu0 %v11952_v14  ;;  %v10098_v14 = vld [vmem:[#allocation9 + $0xb0] ss:$12 sps:$4 sm:$0xff]  }
 0xb34   : > { %4518 = vmatprep.subr.bf16.mxu0 %v11955_v24  ;;  %v3416_v24 = vadd.f32 %v11995_v15, %v12064_v46 }
 0xb35   : > { %9531 = vmatpush3.bf16.msra.mxu1 %v10095_v53 }
 0xb36   : > { %9532 = vmatprep.subr.bf16.mxu1 %v12918_v33 }
 0xb37   : > { %4519 = vmatpush1.bf16.msra.mxu0 %v11958_v6  ;;  %v3418_v6 = vadd.f32 %v11997_v35, %v12071_v7 }
 0xb38   : > { %4771 = vmatprep.subr.bf16.mxu0 %v11914_v45  ;;  %v10097_v45 = vld [vmem:[#allocation9 + $0x98] ss:$12 sps:$4 sm:$0xff]  }
 0xb39   : > { %9533 = vmatpush3.bf16.msra.mxu1 %v10096_v55 }
 0xb3a   : > { %9534 = vmatprep.subr.bf16.mxu1 %v12918_v33 }
 0xb3d   : > { %9535 = vmatpush3.bf16.msra.mxu1 %v10097_v45 }
 0xb3e   : > { %9536 = vmatprep.subr.bf16.mxu1 %v12918_v33 }
 0xb41   : > { %9537 = vmatpush3.bf16.msra.mxu1 %v10098_v14  ;;  %v12195_v14 = vld [vmem:[#allocation9 + $0x94] ss:$12 sps:$4 sm:$0xff]  }
 0xb42   : > { %9542 = vmatprep.subr.bf16.mxu1 %v12918_v33 }
 0xbed   : > { %v4271_v59 = vpop.f32.mrb[56].mxu0  ;;  %v4312_v16 = vpop.f32.mrb[48].mxu1 }
 0xbee   : > { %v4318_v27 = vadd.f32 %v4271_v59, %v3416_v24  ;;  %v4273_v9 = vpop.f32.mrb[57].mxu0  ;;  %v9520_v10 = vpop.f32.mrb[49].mxu1  ;;  %v4332_v35 = vadd.f32 %v12080_v21, %v4312_v16  ;;  %v10110_v24 = vld [vmem:[#allocation9 + $0x80] ss:$12 sps:$4 sm:$0xff]   ;;  %v10114_v16 = vld [vmem:[#allocation9 + $0x98] ss:$12 sps:$4 sm:$0xff]  }
 0xbef   : > { %v4319_v30 = vadd.f32 %v4273_v9, %v3418_v6  ;;  %v4275_v47 = vpop.f32.mrb[58].mxu0  ;;  %v4315_v22 = vpop.f32.mrb[50].mxu1  ;;  %v12199_v6 = vld [vmem:[#allocation9 + $0x90] ss:$12 sps:$4 sm:$0xff]   ;;  %v12202_v59 = vld [vmem:[#allocation9 + $0xac] ss:$12 sps:$4 sm:$0xff]   ;;  %v3420_v10 = vadd.f32 %v11999_v8, %v12064_v46 }
 0xbf0   : > { %v8665_v32 = vmul.f32 -1.442695, %v4318_v27  ;;  %v4276_v3 = vpop.f32.mrb[59].mxu0  ;;  %v9521_v54 = vpop.f32.mrb[51].mxu1  ;;  %v12206_v27 = vld [vmem:[#allocation9 + $0xa8] ss:$12 sps:$4 sm:$0xff]  }
 0xbf1   : > { %v8666_v1 = vmul.f32 -1.442695, %v4319_v30  ;;  %v10118_v9 = vld [vmem:[#allocation9 + $0xb0] ss:$12 sps:$4 sm:$0xff]   ;;  %v3422_v30 = vadd.f32 %v12001_v20, %v12071_v7 }
 0xbf2   : > { %10403 = vpow2.f32 %v8665_v32 }
 0xbf3   : > { %10405 = vpow2.f32 %v8666_v1 }
 0xbfc   : > { %v10404_v39 = vpop.eup %10403 }
 0xbfd   : > { %v4326_v63 = vadd.f32 1.0, %v10404_v39  ;;  %v10406_v15 = vpop.eup %10405 }
 0xbfe   : > { %v4327_v28 = vadd.f32 1.0, %v10406_v15 }
 0xbff   : > { %10407 = vrcp.f32 %v4326_v63 }
 0xc09   : > { %v10408_v44 = vpop.eup %10407 }
 0xc0a   : > { %v4333_v5 = vmul.f32 %v10408_v44, %v4332_v35 }
 0xc0c   : > { %v4334_v56 = vadd.f32 %v4333_v5, %v3487_v36 }
 0xc0e   : > { %10409 = vtanh.f32 %v4334_v56 }
 0xc0f   : > { %10411 = vrcp.f32 %v4327_v28 }
 0xc18   : > { %v10410_v52 = vpop.eup %10409 }
 0xc19   : > { %v4336_v62 = vsub.f32 %v12127_v2, %v10410_v52  ;;  %v10412_v0 = vpop.eup %10411  ;;  %v12192_v2 = vld [vmem:[#allocation9 + $0x78] ss:$12 sps:$4 sm:$0xff]  }
 0xc1b   : > { %v4337_v53 = vmul.f32 %v10412_v0, %v4336_v62 }
 0xc1d   : > { %v12166_v55 = vadd.f32 %v10410_v52, %v4337_v53  ;;  %v3490_v52 = vadd.f32 %v11989_v25, %v12083_v41  ;;  %v12227_v25 = vld [vmem:[#allocation9 + $0x4] ss:$12 sps:$4 sm:$0xff]  }
 0xc1f   : > { %v4339_v45 = vpack.c.bf16 %v12166_v55, %v12166_v55 }
 0xc21   : > { %4340 = vst [vmem:[#allocation3 + $0x8] sm:$0xf] %v4339_v45  ;;  %4537 = vmatmul.mubr.bf16.vlgmr.msra.gmra.mrb[60].mxu0 %v4339_v45  ;;  %9539 = vmatmul.mubr.bf16.vlgmr.msra.gmra.mrb[52].mxu1 %v4339_v45 }
 0xc22   : > { %4772 = vmatpush1.bf16.msra.mxu0 %v11916_v42  ;;  %4803 = vmatprep.mubr.bf16.mxu0 %v12919_v17  ;;  %v10100_v42 = vld [vmem:[#allocation9 + $0x20] ss:$12 sps:$4 sm:$0xff]  }
 0xc23   : > { %4773 = vmatprep.subr.bf16.mxu0 %v11920_v50  ;;  %9558 = vmatprep.mubr.msk.bf16.mxu1 %vm10757_vm0, %v12918_v33  ;;  %v10101_v50 = vld [vmem:[#allocation9 + $0x38] ss:$12 sps:$4 sm:$0xff]  }
 0xc24   : > { %9543 = vmatpush3.bf16.msra.mxu1 %v10099_v34 }
 0xc25   : > { %9544 = vmatprep.subr.bf16.mxu1 %v12918_v33 }
 0xc26   : > { %4774 = vmatpush1.bf16.msra.mxu0 %v11922_v51  ;;  %v10102_v51 = vld [vmem:[#allocation9 + $0x50] ss:$12 sps:$4 sm:$0xff]  }
 0xc27   : > { %4775 = vmatprep.subr.bf16.mxu0 %v11926_v57  ;;  %v12183_v57 = vld [vmem:[#allocation9 + $0x60] ss:$12 sps:$4 sm:$0xff]  }
 0xc28   : > { %9545 = vmatpush3.bf16.msra.mxu1 %v10100_v42 }
 0xc29   : > { %9546 = vmatprep.subr.bf16.mxu1 %v12918_v33 }
 0xc2a   : > { %4776 = vmatpush1.bf16.msra.mxu0 %v11928_v38  ;;  %v12185_v38 = vld [vmem:[#allocation9 + $0x64] ss:$12 sps:$4 sm:$0xff]  }
 0xc2b   : > { %4777 = vmatprep.subr.bf16.mxu0 %v11932_v48  ;;  %v10106_v48 = vld [vmem:[#allocation9 + $0x68] ss:$12 sps:$4 sm:$0xff]  }
 0xc2c   : > { %9547 = vmatpush3.bf16.msra.mxu1 %v10101_v50 }
 0xc2d   : > { %9548 = vmatprep.subr.bf16.mxu1 %v12918_v33 }
 0xc2e   : > { %4778 = vmatpush1.bf16.msra.mxu0 %v11934_v60  ;;  %v12187_v60 = vld [vmem:[#allocation9 + $0x7c] ss:$12 sps:$4 sm:$0xff]  }
 0xc2f   : > { %4779 = vmatprep.subr.bf16.mxu0 %v12185_v38 }
 0xc30   : > { %9549 = vmatpush3.bf16.msra.mxu1 %v10102_v51 }
 0xc31   : > { %9550 = vmatprep.subr.bf16.mxu1 %v12918_v33 }
 0xc32   : > { %4780 = vmatpush1.bf16.msra.mxu0 %v12183_v57 }
 0xc33   : > { %4781 = vmatprep.subr.bf16.mxu0 %v12187_v60 }
 0xc34   : > { %9551 = vmatpush3.bf16.msra.mxu1 %v10106_v48 }
 0xc35   : > { %9552 = vmatprep.subr.bf16.mxu1 %v12918_v33 }
 0xc36   : > { %4782 = vmatpush1.bf16.msra.mxu0 %v12192_v2 }
 0xc37   : > { %4783 = vmatprep.subr.bf16.mxu0 %v12195_v14 }
 0xc38   : > { %9553 = vmatpush3.bf16.msra.mxu1 %v10110_v24  ;;  %v12229_v24 = vld [vmem:[#allocation9] ss:$12 sps:$4 sm:$0xff]  }
 0xc39   : > { %9554 = vmatprep.subr.bf16.mxu1 %v12918_v33 }
 0xc3a   : > { %4784 = vmatpush1.bf16.msra.mxu0 %v12199_v6 }
 0xc3b   : > { %4785 = vmatprep.subr.bf16.mxu0 %v12202_v59 }
 0xc3c   : > { %9555 = vmatpush3.bf16.msra.mxu1 %v10114_v16  ;;  %v12233_v16 = vld [vmem:[#allocation9 + $0x1c] ss:$12 sps:$4 sm:$0xff]  }
 0xc3d   : > { %9556 = vmatprep.subr.bf16.mxu1 %v12918_v33 }
 0xc3e   : > { %4786 = vmatpush1.bf16.msra.mxu0 %v12206_v27 }
 0xc3f   : > { %5038 = vmatprep.subr.bf16.mxu0 %v12227_v25 }
 0xc40   : > { %9557 = vmatpush3.bf16.msra.mxu1 %v10118_v9  ;;  %v12236_v9 = vld [vmem:[#allocation9 + $0x18] ss:$12 sps:$4 sm:$0xff]  }
 0xc41   : > { %9562 = vmatprep.subr.bf16.mxu1 %v12918_v33 }
 0xcf4   : > { %v4538_v47 = vpop.f32.mrb[60].mxu0  ;;  %v4579_v22 = vpop.f32.mrb[52].mxu1 }
 0xcf5   : > { %v4585_v32 = vadd.f32 %v4538_v47, %v3420_v10  ;;  %v4540_v3 = vpop.f32.mrb[61].mxu0  ;;  %v9540_v54 = vpop.f32.mrb[53].mxu1  ;;  %v4599_v20 = vadd.f32 %v12080_v21, %v4579_v22  ;;  %v10126_v10 = vld [vmem:[#allocation9 + $0x20] ss:$12 sps:$4 sm:$0xff]   ;;  %v12243_v47 = vld [vmem:[#allocation9 + $0x30] ss:$12 sps:$4 sm:$0xff]  }
 0xcf6   : > { %v4586_v1 = vadd.f32 %v4540_v3, %v3422_v30  ;;  %v4542_v39 = vpop.f32.mrb[62].mxu0  ;;  %v4582_v63 = vpop.f32.mrb[54].mxu1  ;;  %v12240_v30 = vld [vmem:[#allocation9 + $0x34] ss:$12 sps:$4 sm:$0xff]   ;;  %v10130_v22 = vld [vmem:[#allocation9 + $0x38] ss:$12 sps:$4 sm:$0xff]  }
 0xcf7   : > { %v8691_v15 = vmul.f32 -1.442695, %v4585_v32  ;;  %v4543_v35 = vpop.f32.mrb[63].mxu0  ;;  %v9541_v44 = vpop.f32.mrb[55].mxu1  ;;  %v12247_v32 = vld [vmem:[#allocation9 + $0x4c] ss:$12 sps:$4 sm:$0xff]  }
 0xcf8   : > { %v8692_v36 = vmul.f32 -1.442695, %v4586_v1  ;;  %v12250_v3 = vld [vmem:[#allocation9 + $0x48] ss:$12 sps:$4 sm:$0xff]   ;;  %v10134_v54 = vld [vmem:[#allocation9 + $0x50] ss:$12 sps:$4 sm:$0xff]   ;;  %v3426_v35 = vadd.f32 %v12004_v23, %v12064_v46  ;;  %v3428_v44 = vadd.f32 %v12006_v31, %v12071_v7 }
 0xcf9   : > { %10413 = vpow2.f32 %v8691_v15  ;;  %v10135_v1 = vld [vmem:[#allocation9 + $0x68] ss:$12 sps:$4 sm:$0xff]   ;;  %v10136_v39 = vld [vmem:[#allocation9 + $0x80] ss:$12 sps:$4 sm:$0xff]   ;;  %v10137_v63 = vld [vmem:[#allocation9 + $0x98] ss:$12 sps:$4 sm:$0xff]  }
 0xcfa   : > { %10415 = vpow2.f32 %v8692_v36  ;;  %v10138_v15 = vld [vmem:[#allocation9 + $0xb0] ss:$12 sps:$4 sm:$0xff]  }
 0xd03   : > { %v10414_v5 = vpop.eup %10413 }
 0xd04   : > { %v4593_v56 = vadd.f32 1.0, %v10414_v5  ;;  %v10416_v8 = vpop.eup %10415 }
 0xd05   : > { %v4594_v53 = vadd.f32 1.0, %v10416_v8 }
 0xd06   : > { %10417 = vrcp.f32 %v4593_v56 }
 0xd10   : > { %v10418_v28 = vpop.eup %10417 }
 0xd11   : > { %v4600_v62 = vmul.f32 %v10418_v28, %v4599_v20 }
 0xd13   : > { %v4601_v0 = vadd.f32 %v4600_v62, %v3490_v52 }
 0xd15   : > { %10419 = vtanh.f32 %v4601_v0 }
 0xd16   : > { %10421 = vrcp.f32 %v4594_v53 }
 0xd1f   : > { %v10420_v45 = vpop.eup %10419 }
 0xd20   : > { %v4603_v34 = vsub.f32 %v12166_v55, %v10420_v45  ;;  %v10422_v42 = vpop.eup %10421  ;;  %v10122_v55 = vld [vmem:[#allocation9 + $0x8] ss:$12 sps:$4 sm:$0xff]  }
 0xd22   : > { %v4604_v50 = vmul.f32 %v10422_v42, %v4603_v34 }
 0xd24   : > { %v12220_v51 = vadd.f32 %v10420_v45, %v4604_v50 }
 0xd26   : > { %v4606_v48 = vpack.c.bf16 %v12220_v51, %v12220_v51 }
 0xd28   : > { %4607 = vst [vmem:[#allocation3 + $0xc] sm:$0xf] %v4606_v48  ;;  %4804 = vmatmul.mubr.bf16.vlgmr.msra.gmra.mrb[64].mxu0 %v4606_v48  ;;  %9559 = vmatmul.mubr.bf16.vlgmr.msra.gmra.mrb[56].mxu1 %v4606_v48 }
 0xd29   : > { %5070 = vmatprep.mubr.bf16.mxu0 %v12919_v17  ;;  %9578 = vmatprep.mubr.msk.bf16.mxu1 %vm10757_vm0, %v12918_v33 }
 0xd2a   : > { %5039 = vmatpush1.bf16.msra.mxu0 %v12229_v24  ;;  %9563 = vmatpush3.bf16.msra.mxu1 %v10122_v55  ;;  %v3495_v55 = vadd.f32 %v12057_v58, %v12083_v41  ;;  %v10139_v58 = vld [vmem:[#allocation9 + $0x8] ss:$12 sps:$4 sm:$0xff]  }
 0xd2b   : > { %9564 = vmatprep.subr.bf16.mxu1 %v12918_v33  ;;  %5040 = vmatprep.subr.bf16.mxu0 %v12233_v16 }
 0xd2e   : > { %5041 = vmatpush1.bf16.msra.mxu0 %v12236_v9  ;;  %9565 = vmatpush3.bf16.msra.mxu1 %v10126_v10 }
 0xd2f   : > { %9566 = vmatprep.subr.bf16.mxu1 %v12918_v33  ;;  %5042 = vmatprep.subr.bf16.mxu0 %v12240_v30 }
 0xd32   : > { %5043 = vmatpush1.bf16.msra.mxu0 %v12243_v47  ;;  %9567 = vmatpush3.bf16.msra.mxu1 %v10130_v22 }
 0xd33   : > { %9568 = vmatprep.subr.bf16.mxu1 %v12918_v33  ;;  %5044 = vmatprep.subr.bf16.mxu0 %v12247_v32 }
 0xd36   : > { %5045 = vmatpush1.bf16.msra.mxu0 %v12250_v3  ;;  %9569 = vmatpush3.bf16.msra.mxu1 %v10134_v54 }
 0xd37   : > { %5046 = vmatprep.subr.bf16.mxu0 %v12185_v38  ;;  %9570 = vmatprep.subr.bf16.mxu1 %v12918_v33 }
 0xd3a   : > { %5047 = vmatpush1.bf16.msra.mxu0 %v12183_v57  ;;  %9571 = vmatpush3.bf16.msra.mxu1 %v10135_v1 }
 0xd3b   : > { %5048 = vmatprep.subr.bf16.mxu0 %v12187_v60  ;;  %9572 = vmatprep.subr.bf16.mxu1 %v12918_v33 }
 0xd3e   : > { %5049 = vmatpush1.bf16.msra.mxu0 %v12192_v2  ;;  %9573 = vmatpush3.bf16.msra.mxu1 %v10136_v39 }
 0xd3f   : > { %5050 = vmatprep.subr.bf16.mxu0 %v12195_v14  ;;  %9574 = vmatprep.subr.bf16.mxu1 %v12918_v33 }
 0xd42   : > { %5051 = vmatpush1.bf16.msra.mxu0 %v12199_v6  ;;  %9575 = vmatpush3.bf16.msra.mxu1 %v10137_v63 }
 0xd43   : > { %5052 = vmatprep.subr.bf16.mxu0 %v12202_v59  ;;  %9576 = vmatprep.subr.bf16.mxu1 %v12918_v33 }
 0xd46   : > { %5053 = vmatpush1.bf16.msra.mxu0 %v12206_v27  ;;  %9577 = vmatpush3.bf16.msra.mxu1 %v10138_v15 }
 0xd47   : > { %5305 = vmatprep.subr.bf16.mxu0 %v12227_v25  ;;  %9582 = vmatprep.subr.bf16.mxu1 %v12918_v33 }
 0xdfb   : > { %v4805_v36 = vpop.f32.mrb[64].mxu0  ;;  %v4846_v5 = vpop.f32.mrb[56].mxu1 }
 0xdfc   : > { %v4852_v56 = vadd.f32 %v4805_v36, %v3426_v35  ;;  %v4807_v8 = vpop.f32.mrb[65].mxu0  ;;  %v9560_v20 = vpop.f32.mrb[57].mxu1  ;;  %v4866_v31 = vadd.f32 %v12080_v21, %v4846_v5  ;;  %v10141_v36 = vld [vmem:[#allocation9 + $0x38] ss:$12 sps:$4 sm:$0xff]   ;;  %v10142_v5 = vld [vmem:[#allocation9 + $0x50] ss:$12 sps:$4 sm:$0xff]  }
 0xdfd   : > { %v4853_v28 = vadd.f32 %v4807_v8, %v3428_v44  ;;  %v4809_v52 = vpop.f32.mrb[66].mxu0  ;;  %v4849_v62 = vpop.f32.mrb[58].mxu1  ;;  %v10144_v8 = vld [vmem:[#allocation9 + $0x80] ss:$12 sps:$4 sm:$0xff]   ;;  %v10146_v20 = vld [vmem:[#allocation9 + $0xb0] ss:$12 sps:$4 sm:$0xff]  }
 0xdfe   : > { %v8717_v0 = vmul.f32 -1.442695, %v4852_v56  ;;  %v4810_v53 = vpop.f32.mrb[67].mxu0  ;;  %v9561_v45 = vpop.f32.mrb[59].mxu1  ;;  %v10143_v56 = vld [vmem:[#allocation9 + $0x68] ss:$12 sps:$4 sm:$0xff]   ;;  %v3432_v52 = vadd.f32 %v12010_v12, %v12071_v7 }
 0xdff   : > { %v8718_v34 = vmul.f32 -1.442695, %v4853_v28  ;;  %v3430_v28 = vadd.f32 %v12008_v40, %v12064_v46 }
 0xe00   : > { %10423 = vpow2.f32 %v8717_v0 }
 0xe01   : > { %10425 = vpow2.f32 %v8718_v34 }
 0xe0a   : > { %v10424_v42 = vpop.eup %10423 }
 0xe0b   : > { %v4860_v50 = vadd.f32 1.0, %v10424_v42  ;;  %v10426_v23 = vpop.eup %10425 }
 0xe0c   : > { %v4861_v54 = vadd.f32 1.0, %v10426_v23 }
 0xe0d   : > { %10427 = vrcp.f32 %v4860_v50 }
 0xe17   : > { %v10428_v48 = vpop.eup %10427 }
 0xe18   : > { %v4867_v10 = vmul.f32 %v10428_v48, %v4866_v31 }
 0xe1a   : > { %v4868_v22 = vadd.f32 %v4867_v10, %v3495_v55 }
 0xe1c   : > { %10429 = vtanh.f32 %v4868_v22 }
 0xe1d   : > { %10431 = vrcp.f32 %v4861_v54 }
 0xe26   : > { %v10430_v1 = vpop.eup %10429 }
 0xe27   : > { %v4870_v39 = vsub.f32 %v12220_v51, %v10430_v1  ;;  %v10432_v63 = vpop.eup %10431  ;;  %v10140_v51 = vld [vmem:[#allocation9 + $0x20] ss:$12 sps:$4 sm:$0xff]  }
 0xe29   : > { %v4871_v15 = vmul.f32 %v10432_v63, %v4870_v39  ;;  %v3498_v39 = vadd.f32 %v12068_v4, %v12083_v41  ;;  %v10147_v4 = vld [vmem:[#allocation9 + $0x8] ss:$12 sps:$4 sm:$0xff]  }
 0xe2b   : > { %v12276_v35 = vadd.f32 %v10430_v1, %v4871_v15 }
 0xe2d   : > { %v4873_v44 = vpack.c.bf16 %v12276_v35, %v12276_v35 }
 0xe2f   : > { %4874 = vst [vmem:[#allocation3 + $0x10] sm:$0xf] %v4873_v44  ;;  %5071 = vmatmul.mubr.bf16.vlgmr.msra.gmra.mrb[68].mxu0 %v4873_v44  ;;  %9579 = vmatmul.mubr.bf16.vlgmr.msra.gmra.mrb[60].mxu1 %v4873_v44 }
 0xe30   : > { %5306 = vmatpush1.bf16.msra.mxu0 %v12229_v24  ;;  %5337 = vmatprep.mubr.bf16.mxu0 %v12919_v17 }
 0xe31   : > { %5307 = vmatprep.subr.bf16.mxu0 %v12233_v16  ;;  %9598 = vmatprep.mubr.msk.bf16.mxu1 %vm10757_vm0, %v12918_v33 }
 0xe32   : > { %9583 = vmatpush3.bf16.msra.mxu1 %v10139_v58 }
 0xe33   : > { %9584 = vmatprep.subr.bf16.mxu1 %v12918_v33 }
 0xe34   : > { %5308 = vmatpush1.bf16.msra.mxu0 %v12236_v9 }
 0xe35   : > { %5309 = vmatprep.subr.bf16.mxu0 %v12240_v30 }
 0xe36   : > { %9585 = vmatpush3.bf16.msra.mxu1 %v10140_v51 }
 0xe37   : > { %9586 = vmatprep.subr.bf16.mxu1 %v12918_v33 }
 0xe38   : > { %5310 = vmatpush1.bf16.msra.mxu0 %v12243_v47 }
 0xe39   : > { %5311 = vmatprep.subr.bf16.mxu0 %v12247_v32 }
 0xe3a   : > { %9587 = vmatpush3.bf16.msra.mxu1 %v10141_v36 }
 0xe3b   : > { %9588 = vmatprep.subr.bf16.mxu1 %v12918_v33 }
 0xe3c   : > { %5312 = vmatpush1.bf16.msra.mxu0 %v12250_v3 }
 0xe3d   : > { %5313 = vmatprep.subr.bf16.mxu0 %v12185_v38 }
 0xe3e   : > { %9589 = vmatpush3.bf16.msra.mxu1 %v10142_v5 }
 0xe3f   : > { %9590 = vmatprep.subr.bf16.mxu1 %v12918_v33 }
 0xe40   : > { %5314 = vmatpush1.bf16.msra.mxu0 %v12183_v57 }
 0xe41   : > { %5315 = vmatprep.subr.bf16.mxu0 %v12187_v60 }
 0xe42   : > { %9591 = vmatpush3.bf16.msra.mxu1 %v10143_v56 }
 0xe43   : > { %9592 = vmatprep.subr.bf16.mxu1 %v12918_v33 }
 0xe44   : > { %5316 = vmatpush1.bf16.msra.mxu0 %v12192_v2 }
 0xe45   : > { %5317 = vmatprep.subr.bf16.mxu0 %v12195_v14 }
 0xe46   : > { %9593 = vmatpush3.bf16.msra.mxu1 %v10144_v8 }
 0xe47   : > { %9594 = vmatprep.subr.bf16.mxu1 %v12918_v33 }
 0xe48   : > { %5318 = vmatpush1.bf16.msra.mxu0 %v12199_v6 }
 0xe49   : > { %5319 = vmatprep.subr.bf16.mxu0 %v12202_v59 }
 0xe4c   : > { %5320 = vmatpush1.bf16.msra.mxu0 %v12206_v27 }
 0xe4d   : > { %5572 = vmatprep.subr.bf16.mxu0 %v12227_v25  ;;  %v10145_v25 = vld [vmem:[#allocation9 + $0x98] ss:$12 sps:$4 sm:$0xff]  }
 0xe4e   : > { %9595 = vmatpush3.bf16.msra.mxu1 %v10145_v25 }
 0xe4f   : > { %9596 = vmatprep.subr.bf16.mxu1 %v12918_v33 }
 0xe52   : > { %9597 = vmatpush3.bf16.msra.mxu1 %v10146_v20 }
 0xe53   : > { %9602 = vmatprep.subr.bf16.mxu1 %v12918_v33 }
 0xf02   : > { %v5072_v62 = vpop.f32.mrb[68].mxu0  ;;  %v5113_v0 = vpop.f32.mrb[60].mxu1 }
 0xf03   : > { %v5119_v53 = vadd.f32 %v5072_v62, %v3430_v28  ;;  %v5074_v45 = vpop.f32.mrb[69].mxu0  ;;  %v9580_v34 = vpop.f32.mrb[61].mxu1  ;;  %v5133_v12 = vadd.f32 %v12080_v21, %v5113_v0 }
 0xf04   : > { %v5120_v42 = vadd.f32 %v5074_v45, %v3432_v52  ;;  %v5076_v50 = vpop.f32.mrb[70].mxu0  ;;  %v5116_v23 = vpop.f32.mrb[62].mxu1 }
 0xf05   : > { %v8743_v31 = vmul.f32 -1.442695, %v5119_v53  ;;  %v5077_v48 = vpop.f32.mrb[71].mxu0  ;;  %v9581_v55 = vpop.f32.mrb[63].mxu1  ;;  %v3503_v50 = vadd.f32 %v12053_v29, %v12083_v41  ;;  %v10159_v29 = vld [vmem:[#allocation3] sm:$0xff]  }
 0xf06   : > { %v8744_v10 = vmul.f32 -1.442695, %v5120_v42 }
 0xf07   : > { %10433 = vpow2.f32 %v8743_v31 }
 0xf08   : > { %10435 = vpow2.f32 %v8744_v10 }
 0xf11   : > { %v10434_v22 = vpop.eup %10433 }
 0xf12   : > { %v5127_v54 = vadd.f32 1.0, %v10434_v22  ;;  %v10436_v40 = vpop.eup %10435 }
 0xf13   : > { %v5128_v44 = vadd.f32 1.0, %v10436_v40 }
 0xf14   : > { %10437 = vrcp.f32 %v5127_v54 }
 0xf1e   : > { %v10438_v1 = vpop.eup %10437 }
 0xf1f   : > { %v5134_v63 = vmul.f32 %v10438_v1, %v5133_v12  ;;  %v10155_v12 = vld [vmem:[#allocation11] ss:$12 sps:$4 sm:$0xff]   ;;  %v10162_v1 = vld [vmem:[#allocation11 + $0x1c] ss:$12 sps:$4 sm:$0xff]  }
 0xf21   : > { %v5135_v15 = vadd.f32 %v5134_v63, %v3498_v39  ;;  %v10163_v39 = vld [vmem:[#allocation11 + $0x20] ss:$12 sps:$4 sm:$0xff]   ;;  %v10160_v63 = vld [vmem:[#allocation11 + $0x18] ss:$12 sps:$4 sm:$0xff]  }
 0xf23   : > { %10439 = vtanh.f32 %v5135_v15  ;;  %v10166_v15 = vld [vmem:[#allocation11 + $0x34] ss:$12 sps:$4 sm:$0xff]  }
 0xf24   : > { %10441 = vrcp.f32 %v5128_v44  ;;  %v10167_v44 = vld [vmem:[#allocation11 + $0x38] ss:$12 sps:$4 sm:$0xff]  }
 0xf2d   : > { %v10440_v58 = vpop.eup %10439 }
 0xf2e   : > { %v5137_v51 = vsub.f32 %v12276_v35, %v10440_v58  ;;  %v10442_v36 = vpop.eup %10441 }
 0xf30   : > { %v5138_v5 = vmul.f32 %v10442_v36, %v5137_v51  ;;  %v10170_v51 = vld [vmem:[#allocation11 + $0x4c] ss:$12 sps:$4 sm:$0xff]   ;;  %v10171_v36 = vld [vmem:[#allocation11 + $0x50] ss:$12 sps:$4 sm:$0xff]  }
 0xf32   : > { %v12315_v56 = vadd.f32 %v10440_v58, %v5138_v5  ;;  %v10164_v58 = vld [vmem:[#allocation11 + $0x30] ss:$12 sps:$4 sm:$0xff]   ;;  %v10168_v5 = vld [vmem:[#allocation11 + $0x48] ss:$12 sps:$4 sm:$0xff]  }
 0xf34   : > { %v5140_v8 = vpack.c.bf16 %v12315_v56, %v12315_v56 }
 0xf36   : > { %5141 = vst [vmem:[#allocation3 + $0x14] sm:$0xf] %v5140_v8  ;;  %5338 = vmatmul.mubr.bf16.vlgmr.msra.gmra.mrb[72].mxu0 %v5140_v8  ;;  %9599 = vmatmul.mubr.bf16.vlgmr.msra.gmra.mrb[64].mxu1 %v5140_v8  ;;  %v10175_v8 = vld [vmem:[#allocation11 + $0x68] ss:$12 sps:$4 sm:$0xff]  }
 0xf37   : > { %5573 = vmatpush1.bf16.msra.mxu0 %v12229_v24  ;;  %5604 = vmatprep.mubr.bf16.mxu0 %v12919_v17  ;;  %v10148_v24 = vld [vmem:[#allocation9 + $0x20] ss:$12 sps:$4 sm:$0xff]  }
 0xf38   : > { %5574 = vmatprep.subr.bf16.mxu0 %v12233_v16  ;;  %9618 = vmatprep.mubr.msk.bf16.mxu1 %vm10757_vm0, %v12918_v33  ;;  %v3436_v16 = vadd.f32 %v12051_v26, %v12064_v46 }
 0xf39   : > { %9603 = vmatpush3.bf16.msra.mxu1 %v10147_v4  ;;  %v10172_v4 = vld [vmem:[#allocation11 + $0x60] ss:$12 sps:$4 sm:$0xff]  }
 0xf3a   : > { %9604 = vmatprep.subr.bf16.mxu1 %v12918_v33 }
 0xf3b   : > { %5575 = vmatpush1.bf16.msra.mxu0 %v12236_v9  ;;  %v3438_v9 = vadd.f32 %v12055_v37, %v12071_v7 }
 0xf3c   : > { %5576 = vmatprep.subr.bf16.mxu0 %v12240_v30 }
 0xf3d   : > { %9605 = vmatpush3.bf16.msra.mxu1 %v10148_v24  ;;  %v10178_v24 = vld [vmem:[#allocation11 + $0x7c] ss:$12 sps:$4 sm:$0xff]  }
 0xf3e   : > { %9606 = vmatprep.subr.bf16.mxu1 %v12918_v33 }
 0xf3f   : > { %5577 = vmatpush1.bf16.msra.mxu0 %v12243_v47 }
 0xf40   : > { %5578 = vmatprep.subr.bf16.mxu0 %v12247_v32 }
 0xf43   : > { %5579 = vmatpush1.bf16.msra.mxu0 %v12250_v3 }
 0xf44   : > { %5580 = vmatprep.subr.bf16.mxu0 %v12185_v38  ;;  %v10150_v38 = vld [vmem:[#allocation9 + $0x50] ss:$12 sps:$4 sm:$0xff]  }
 0xf47   : > { %5581 = vmatpush1.bf16.msra.mxu0 %v12183_v57  ;;  %v10149_v57 = vld [vmem:[#allocation9 + $0x38] ss:$12 sps:$4 sm:$0xff]  }
 0xf48   : > { %5582 = vmatprep.subr.bf16.mxu0 %v12187_v60  ;;  %9607 = vmatpush3.bf16.msra.mxu1 %v10149_v57  ;;  %v10151_v60 = vld [vmem:[#allocation9 + $0x68] ss:$12 sps:$4 sm:$0xff]   ;;  %v10179_v57 = vld [vmem:[#allocation11 + $0x80] ss:$12 sps:$4 sm:$0xff]  }
 0xf49   : > { %9608 = vmatprep.subr.bf16.mxu1 %v12918_v33 }
 0xf4b   : > { %5583 = vmatpush1.bf16.msra.mxu0 %v12192_v2  ;;  %v10157_v2 = vld [vmem:[#allocation11 + $0x4] ss:$12 sps:$4 sm:$0xff]  }
 0xf4c   : > { %5584 = vmatprep.subr.bf16.mxu0 %v12195_v14  ;;  %9609 = vmatpush3.bf16.msra.mxu1 %v10150_v38  ;;  %v10152_v14 = vld [vmem:[#allocation9 + $0x80] ss:$12 sps:$4 sm:$0xff]   ;;  %v10176_v38 = vld [vmem:[#allocation11 + $0x78] ss:$12 sps:$4 sm:$0xff]  }
 0xf4d   : > { %9610 = vmatprep.subr.bf16.mxu1 %v12918_v33 }
 0xf4f   : > { %5585 = vmatpush1.bf16.msra.mxu0 %v12199_v6  ;;  %v10153_v6 = vld [vmem:[#allocation9 + $0x98] ss:$12 sps:$4 sm:$0xff]  }
 0xf50   : > { %5586 = vmatprep.subr.bf16.mxu0 %v12202_v59  ;;  %9611 = vmatpush3.bf16.msra.mxu1 %v10151_v60  ;;  %v10154_v59 = vld [vmem:[#allocation9 + $0xb0] ss:$12 sps:$4 sm:$0xff]   ;;  %v10182_v60 = vld [vmem:[#allocation11 + $0x94] ss:$12 sps:$4 sm:$0xff]  }
 0xf51   : > { %9612 = vmatprep.subr.bf16.mxu1 %v12918_v33 }
 0xf53   : > { %5587 = vmatpush1.bf16.msra.mxu0 %v12206_v27  ;;  %v10158_v27 = vld [vmem:[#allocation11 + $0x8] ss:$12 sps:$4 sm:$0xff]  }
 0xf54   : > { %5888 = vmatprep.subr.bf16.mxu0 %v10157_v2  ;;  %9613 = vmatpush3.bf16.msra.mxu1 %v10152_v14  ;;  %v10183_v2 = vld [vmem:[#allocation11 + $0x98] ss:$12 sps:$4 sm:$0xff]   ;;  %v10180_v14 = vld [vmem:[#allocation11 + $0x90] ss:$12 sps:$4 sm:$0xff]  }
 0xf55   : > { %9614 = vmatprep.subr.bf16.mxu1 %v12918_v33 }
 0xf58   : > { %9615 = vmatpush3.bf16.msra.mxu1 %v10153_v6  ;;  %v10186_v6 = vld [vmem:[#allocation11 + $0xac] ss:$12 sps:$4 sm:$0xff]  }
 0xf59   : > { %9616 = vmatprep.subr.bf16.mxu1 %v12918_v33 }
 0xf5c   : > { %9617 = vmatpush3.bf16.msra.mxu1 %v10154_v59  ;;  %v10187_v59 = vld [vmem:[#allocation11 + $0xb0] ss:$12 sps:$4 sm:$0xff]  }
 0xf5d   : > { %9622 = vmatprep.subr.bf16.mxu1 %v10158_v27 }
0x1009   : > { %v5339_v30 = vpop.f32.mrb[72].mxu0  ;;  %v5380_v47 = vpop.f32.mrb[64].mxu1 }
0x100a   : > { %v5386_v32 = vadd.f32 %v5339_v30, %v3436_v16  ;;  %v5341_v3 = vpop.f32.mrb[73].mxu0  ;;  %v9600_v35 = vpop.f32.mrb[65].mxu1  ;;  %v5400_v37 = vadd.f32 %v12080_v21, %v5380_v47  ;;  %v10188_v16 = vld [vmem:[#allocation3 + $0x8] sm:$0xff]   ;;  %v12361_v30 = vld [vmem:[#allocation12 + $0x4] ss:$12 sps:$4 sm:$0xff]  }
0x100b   : > { %v5387_v25 = vadd.f32 %v5341_v3, %v3438_v9  ;;  %v5343_v20 = vpop.f32.mrb[74].mxu0  ;;  %v5383_v28 = vpop.f32.mrb[66].mxu1  ;;  %v10189_v9 = vld [vmem:[#allocation3 + $0x10] sm:$0xff]   ;;  %v12363_v47 = vld [vmem:[#allocation12] ss:$12 sps:$4 sm:$0xff]  }
0x100c   : > { %v8769_v52 = vmul.f32 -1.442695, %v5386_v32  ;;  %v5344_v62 = vpop.f32.mrb[75].mxu0  ;;  %v9601_v0 = vpop.f32.mrb[67].mxu1  ;;  %v12367_v32 = vld [vmem:[#allocation12 + $0x1c] ss:$12 sps:$4 sm:$0xff]  }
0x100d   : > { %v8770_v53 = vmul.f32 -1.442695, %v5387_v25  ;;  %v12369_v3 = vld [vmem:[#allocation12 + $0x18] ss:$12 sps:$4 sm:$0xff]   ;;  %v12373_v35 = vld [vmem:[#allocation12 + $0x34] ss:$12 sps:$4 sm:$0xff]  }
0x100e   : > { %10443 = vpow2.f32 %v8769_v52  ;;  %v12375_v25 = vld [vmem:[#allocation12 + $0x30] ss:$12 sps:$4 sm:$0xff]   ;;  %v12379_v20 = vld [vmem:[#allocation12 + $0x4c] ss:$12 sps:$4 sm:$0xff]   ;;  %v12381_v28 = vld [vmem:[#allocation12 + $0x48] ss:$12 sps:$4 sm:$0xff]  }
0x100f   : > { %10445 = vpow2.f32 %v8770_v53  ;;  %v12385_v52 = vld [vmem:[#allocation12 + $0x60] ss:$12 sps:$4 sm:$0xff]   ;;  %v12387_v62 = vld [vmem:[#allocation12 + $0x64] ss:$12 sps:$4 sm:$0xff]   ;;  %v12389_v0 = vld [vmem:[#allocation12 + $0x7c] ss:$12 sps:$4 sm:$0xff]  }
0x1010   : > { %v12393_v53 = vld [vmem:[#allocation12 + $0x78] ss:$12 sps:$4 sm:$0xff]  }
0x1018   : > { %v10444_v45 = vpop.eup %10443 }
0x1019   : > { %v5394_v34 = vadd.f32 1.0, %v10444_v45  ;;  %v10446_v26 = vpop.eup %10445  ;;  %v12396_v45 = vld [vmem:[#allocation12 + $0x94] ss:$12 sps:$4 sm:$0xff]  }
0x101a   : > { %v5395_v48 = vadd.f32 1.0, %v10446_v26  ;;  %v10212_v26 = vld [vmem:[#allocation12 + $0x8] ss:$12 sps:$4 sm:$0xff]  }
0x101b   : > { %10447 = vrcp.f32 %v5394_v34  ;;  %v12399_v34 = vld [vmem:[#allocation12 + $0x90] ss:$12 sps:$4 sm:$0xff]  }
0x1025   : > { %v10448_v42 = vpop.eup %10447 }
0x1026   : > { %v5401_v23 = vmul.f32 %v10448_v42, %v5400_v37  ;;  %v12402_v37 = vld [vmem:[#allocation12 + $0xac] ss:$12 sps:$4 sm:$0xff]  }
0x1027   : > { %v10216_v42 = vld [vmem:[#allocation12 + $0x20] ss:$12 sps:$4 sm:$0xff]  }
0x1028   : > { %v5402_v31 = vadd.f32 %v5401_v23, %v3503_v50  ;;  %v12405_v50 = vld [vmem:[#allocation12 + $0xa8] ss:$12 sps:$4 sm:$0xff]   ;;  %v10217_v23 = vld [vmem:[#allocation12 + $0x38] ss:$12 sps:$4 sm:$0xff]  }
0x102a   : > { %10449 = vtanh.f32 %v5402_v31  ;;  %v10218_v31 = vld [vmem:[#allocation12 + $0x50] ss:$12 sps:$4 sm:$0xff]  }
0x102b   : > { %10451 = vrcp.f32 %v5395_v48  ;;  %v10219_v48 = vld [vmem:[#allocation12 + $0x68] ss:$12 sps:$4 sm:$0xff]  }
0x1034   : > { %v10450_v55 = vpop.eup %10449 }
0x1035   : > { %v5404_v10 = vsub.f32 %v12315_v56, %v10450_v55  ;;  %v10452_v22 = vpop.eup %10451  ;;  %v10174_v56 = vld [vmem:[#allocation11 + $0x64] ss:$12 sps:$4 sm:$0xff]  }
0x1037   : > { %v5405_v54 = vmul.f32 %v10452_v22, %v5404_v10  ;;  %v10221_v10 = vld [vmem:[#allocation12 + $0x98] ss:$12 sps:$4 sm:$0xff]   ;;  %v10222_v22 = vld [vmem:[#allocation12 + $0xb0] ss:$12 sps:$4 sm:$0xff]  }
0x1039   : > { %v12352_v40 = vadd.f32 %v10450_v55, %v5405_v54  ;;  %v10220_v55 = vld [vmem:[#allocation12 + $0x80] ss:$12 sps:$4 sm:$0xff]   ;;  %v3440_v54 = vadd.f32 %v12059_v43, %v12064_v46 }
0x103a   : > { %v10559_v46 = vld [vmem:[%s12916_s4 + $0x2] ss:$0 sm:$0xff] }
0x103b   : > { %v5407_v21 = vpack.c.bf16 %v12352_v40, %v12352_v40 }
0x103d   : > { %5408 = vst [vmem:[#allocation3 + $0x18] sm:$0xf] %v5407_v21  ;;  %5605 = vmatmul.mubr.bf16.vlgmr.msra.gmra.mrb[76].mxu0 %v5407_v21  ;;  %9619 = vmatmul.mubr.bf16.vlgmr.msra.gmra.mrb[68].mxu1 %v5407_v21 }
0x103e   : > { %5889 = vmatpush1.bf16.msra.mxu0 %v10155_v12  ;;  %9623 = vmatpush3.bf16.msra.mxu1 %v10158_v27  ;;  %v10184_v27 = vld [vmem:[#allocation11 + $0xa8] ss:$12 sps:$4 sm:$0xff]   ;;  %v3442_v12 = vadd.f32 %v12066_v61, %v12071_v7 }
0x103f   : > { %9638 = vmatprep.mubr.bf16.mxu1 %v10159_v29  ;;  %5890 = vmatprep.subr.bf16.mxu0 %v10162_v1 }
0x1040   : > { %9624 = vmatprep.subr.bf16.mxu1 %v10163_v39  ;;  %5920 = vmatprep.mubr.bf16.mxu0 %v12919_v17 }
0x1042   : > { %5891 = vmatpush1.bf16.msra.mxu0 %v10160_v63  ;;  %9625 = vmatpush3.bf16.msra.mxu1 %v10163_v39 }
0x1043   : > { %5892 = vmatprep.subr.bf16.mxu0 %v10166_v15  ;;  %9626 = vmatprep.subr.bf16.mxu1 %v10167_v44 }
0x1046   : > { %5893 = vmatpush1.bf16.msra.mxu0 %v10164_v58  ;;  %9627 = vmatpush3.bf16.msra.mxu1 %v10167_v44 }
0x1047   : > { %5894 = vmatprep.subr.bf16.mxu0 %v10170_v51  ;;  %9628 = vmatprep.subr.bf16.mxu1 %v10171_v36 }
0x104a   : > { %5895 = vmatpush1.bf16.msra.mxu0 %v10168_v5  ;;  %9629 = vmatpush3.bf16.msra.mxu1 %v10171_v36 }
0x104b   : > { %5896 = vmatprep.subr.bf16.mxu0 %v10174_v56  ;;  %9630 = vmatprep.subr.bf16.mxu1 %v10175_v8 }
0x104e   : > { %5897 = vmatpush1.bf16.msra.mxu0 %v10172_v4  ;;  %9631 = vmatpush3.bf16.msra.mxu1 %v10175_v8 }
0x104f   : > { %5898 = vmatprep.subr.bf16.mxu0 %v10178_v24  ;;  %9632 = vmatprep.subr.bf16.mxu1 %v10179_v57  ;;  %v3506_v24 = vadd.f32 %v12061_v49, %v12083_v41 }
0x1052   : > { %5899 = vmatpush1.bf16.msra.mxu0 %v10176_v38  ;;  %9633 = vmatpush3.bf16.msra.mxu1 %v10179_v57 }
0x1053   : > { %5900 = vmatprep.subr.bf16.mxu0 %v10182_v60  ;;  %9634 = vmatprep.subr.bf16.mxu1 %v10183_v2 }
0x1056   : > { %5901 = vmatpush1.bf16.msra.mxu0 %v10180_v14  ;;  %9635 = vmatpush3.bf16.msra.mxu1 %v10183_v2 }
0x1057   : > { %5902 = vmatprep.subr.bf16.mxu0 %v10186_v6  ;;  %9636 = vmatprep.subr.bf16.mxu1 %v10187_v59 }
0x105a   : > { %5903 = vmatpush1.bf16.msra.mxu0 %v10184_v27  ;;  %9637 = vmatpush3.bf16.msra.mxu1 %v10187_v59 }
0x105b   : > { %9646 = vmatprep.subr.bf16.mxu1 %v12918_v33  ;;  %6220 = vmatprep.subr.bf16.mxu0 %v12361_v30 }
0x105d   : > { %5921 = vmatmul.mubr.bf16.vlgmr.msra.gmra.mrb[80].mxu0 %v10159_v29  ;;  %9639 = vmatmul.mubr.bf16.vlgmr.msra.gmra.mrb[72].mxu1 %v10188_v16 }
0x105e   : > { %9642 = vmatprep.mubr.bf16.mxu1 %v10189_v9  ;;  %5930 = vmatprep.mubr.bf16.mxu0 %v12919_v17 }
0x105f   : > { %6221 = vmatpush1.bf16.msra.mxu0 %v12363_v47  ;;  %9647 = vmatpush3.bf16.msra.mxu1 %v10212_v26 }
0x1060   : > { %6222 = vmatprep.subr.bf16.mxu0 %v12367_v32  ;;  %9648 = vmatprep.subr.bf16.mxu1 %v12918_v33 }
0x1063   : > { %6223 = vmatpush1.bf16.msra.mxu0 %v12369_v3  ;;  %9649 = vmatpush3.bf16.msra.mxu1 %v10216_v42 }
0x1064   : > { %6224 = vmatprep.subr.bf16.mxu0 %v12373_v35  ;;  %9650 = vmatprep.subr.bf16.mxu1 %v12918_v33 }
0x1065   : > { %5931 = vmatmul.mubr.bf16.gmra.mrb[84].mxu0 %v10188_v16 }
0x1066   : > { %5940 = vmatprep.mubr.bf16.mxu0 %v12919_v17 }
0x1067   : > { %6225 = vmatpush1.bf16.msra.mxu0 %v12375_v25  ;;  %9651 = vmatpush3.bf16.msra.mxu1 %v10217_v23 }
0x1068   : > { %6226 = vmatprep.subr.bf16.mxu0 %v12379_v20  ;;  %9652 = vmatprep.subr.bf16.mxu1 %v12918_v33 }
0x106b   : > { %6227 = vmatpush1.bf16.msra.mxu0 %v12381_v28  ;;  %9653 = vmatpush3.bf16.msra.mxu1 %v10218_v31 }
0x106c   : > { %6228 = vmatprep.subr.bf16.mxu0 %v12387_v62  ;;  %9654 = vmatprep.subr.bf16.mxu1 %v12918_v33 }
0x106d   : > { %5941 = vmatmul.mubr.bf16.gmra.mrb[88].mxu0 %v10189_v9 }
0x106e   : > { %5950 = vmatprep.mubr.bf16.mxu0 %v12919_v17 }
0x106f   : > { %6229 = vmatpush1.bf16.msra.mxu0 %v12385_v52  ;;  %9655 = vmatpush3.bf16.msra.mxu1 %v10219_v48 }
0x1070   : > { %6230 = vmatprep.subr.bf16.mxu0 %v12389_v0  ;;  %9656 = vmatprep.subr.bf16.mxu1 %v12918_v33 }
0x1073   : > { %6231 = vmatpush1.bf16.msra.mxu0 %v12393_v53  ;;  %9657 = vmatpush3.bf16.msra.mxu1 %v10220_v55 }
0x1074   : > { %6232 = vmatprep.subr.bf16.mxu0 %v12396_v45  ;;  %9658 = vmatprep.subr.bf16.mxu1 %v12918_v33 }
0x1077   : > { %6233 = vmatpush1.bf16.msra.mxu0 %v12399_v34  ;;  %9659 = vmatpush3.bf16.msra.mxu1 %v10221_v10 }
0x1078   : > { %6234 = vmatprep.subr.bf16.mxu0 %v12402_v37  ;;  %9660 = vmatprep.subr.bf16.mxu1 %v12918_v33 }
0x107b   : > { %6235 = vmatpush1.bf16.msra.mxu0 %v12405_v50  ;;  %9661 = vmatpush3.bf16.msra.mxu1 %v10222_v22 }
0x107c   : > { %6487 = vmatprep.subr.bf16.mxu0 %v12361_v30  ;;  %9666 = vmatprep.subr.bf16.mxu1 %v12918_v33 }
0x1110   : > { %v5606_v21 = vpop.f32.mrb[76].mxu0  ;;  %v5647_v1 = vpop.f32.mrb[68].mxu1 }
0x1111   : > { %v5653_v39 = vadd.f32 %v5606_v21, %v3440_v54  ;;  %v5608_v29 = vpop.f32.mrb[77].mxu0  ;;  %v9620_v63 = vpop.f32.mrb[69].mxu1  ;;  %v5667_v61 = vadd.f32 %v10559_v46, %v5647_v1 }
0x1112   : > { %v5654_v15 = vadd.f32 %v5608_v29, %v3442_v12  ;;  %v5610_v44 = vpop.f32.mrb[78].mxu0  ;;  %v5650_v58 = vpop.f32.mrb[70].mxu1  ;;  %v10224_v63 = vld [vmem:[#allocation12 + $0x20] ss:$12 sps:$4 sm:$0xff]  }
0x1113   : > { %v8795_v51 = vmul.f32 -1.442695, %v5653_v39  ;;  %v5611_v36 = vpop.f32.mrb[79].mxu0  ;;  %v9621_v5 = vpop.f32.mrb[71].mxu1  ;;  %v10226_v44 = vld [vmem:[#allocation12 + $0x50] ss:$12 sps:$4 sm:$0xff]  }
0x1114   : > { %v8796_v56 = vmul.f32 -1.442695, %v5654_v15  ;;  %v10225_v15 = vld [vmem:[#allocation12 + $0x38] ss:$12 sps:$4 sm:$0xff]   ;;  %v10227_v58 = vld [vmem:[#allocation12 + $0x68] ss:$12 sps:$4 sm:$0xff]  }
0x1115   : > { %10453 = vpow2.f32 %v8795_v51  ;;  %v10228_v51 = vld [vmem:[#allocation12 + $0x80] ss:$12 sps:$4 sm:$0xff]   ;;  %v10229_v36 = vld [vmem:[#allocation12 + $0x98] ss:$12 sps:$4 sm:$0xff]   ;;  %v10230_v5 = vld [vmem:[#allocation12 + $0xb0] ss:$12 sps:$4 sm:$0xff]  }
0x1116   : > { %10455 = vpow2.f32 %v8796_v56  ;;  %v5685_v56 = vld [vmem:[%s12920_s29] sm:$0x7]  ;;  %s12924_s29 = sld [smem:[#allocation29_spill]] }
0x111c   : > { %s12925_s19 = smov %s12924_s29  ;;  %s12814_s21 = scalar_lea.hbm %s12924_s29, %s9035_s24 }
0x111f   : > { %v10454_v8 = vpop.eup %10453 }
0x1120   : > { %v5661_v4 = vadd.f32 1.0, %v10454_v8  ;;  %v10456_v43 = vpop.eup %10455  ;;  %v5686_v8 = vmul.f32 %v5685_v56, %v11240_v19 }
0x1121   : > { %v5662_v60 = vadd.f32 1.0, %v10456_v43 }
0x1122   : > { %10457 = vrcp.f32 %v5661_v4  ;;  %v5684_v4 = vld [vmem:[%s12922_s26] sm:$0x7]  ;;  %s8195_s26 = scalar_lea.sflag [#allocation8], %s11029_s23 }
0x1123   : > { %v5687_v43 = vadd.f32 %v5686_v8, %v5684_v4 }
0x112c   : > { %v10458_v7 = vpop.eup %10457 }
0x112d   : > { %v5668_v57 = vmul.f32 %v10458_v7, %v5667_v61 }
0x112f   : > { %v5669_v38 = vadd.f32 %v5668_v57, %v3506_v24 }
0x1130   : > { %v12427_v2 = vpop.f32.mrb[80].mxu0  ;;  %v12429_v14 = vpop.f32.mrb[72].mxu1 }
0x1131   : > { %10459 = vtanh.f32 %v5669_v38  ;;  %v12431_v6 = vpop.f32.mrb[81].mxu0  ;;  %v12433_v59 = vpop.f32.mrb[73].mxu1 }
0x1132   : > { %v12435_v27 = vpop.f32.mrb[82].mxu0  ;;  %v12437_v16 = vpop.f32.mrb[74].mxu1  ;;  %10461 = vrcp.f32 %v5662_v60  ;;  %v12512_v60 = vrot.slane %v5687_v43, %v11231_v11 }
0x1133   : > { %v12439_v9 = vpop.f32.mrb[83].mxu0  ;;  %v12441_v49 = vpop.f32.mrb[75].mxu1 }
0x1138   : > { %v12443_v41 = vpop.f32.mrb[84].mxu0 }
0x1139   : > { %v12445_v26 = vpop.f32.mrb[85].mxu0 }
0x113a   : > { %v12447_v42 = vpop.f32.mrb[86].mxu0 }
0x113b   : > { %v10460_v23 = vpop.eup %10459  ;;  %v12449_v31 = vpop.f32.mrb[87].mxu0 }
0x113c   : > { %v5671_v48 = vsub.f32 %v12352_v40, %v10460_v23  ;;  %v10462_v55 = vpop.eup %10461  ;;  %v10223_v40 = vld [vmem:[#allocation12 + $0x8] ss:$12 sps:$4 sm:$0xff]  }
0x113e   : > { %v5672_v10 = vmul.f32 %v10462_v55, %v5671_v48  ;;  %v12519_v48 = vrot.slane %v5687_v43, %v11233_v13  ;;  %v5923_v55 = vadd.f32 %v12427_v2, %v12512_v60  ;;  %v12528_v2 = vld [vmem:[%s12921_s28 + $0x2] ss:$0 sm:$0xff] }
0x1140   : > { %v5673_v22 = vadd.f32 %v10460_v23, %v5672_v10  ;;  %v12452_v54 = vpop.f32.mrb[88].mxu0  ;;  %v5925_v10 = vadd.f32 %v12431_v6, %v12519_v48  ;;  %v12531_v6 = vrot.slane %v5687_v43, %v11238_v18  ;;  %v10232_v43 = vld [vmem:[#allocation12 + $0x20] ss:$12 sps:$4 sm:$0xff]  }
0x1141   : > { %v12454_v12 = vpop.f32.mrb[89].mxu0 }
0x1142   : > { %v5674_v21 = vpack.c.bf16 %v5673_v22, %v5673_v22  ;;  %v12456_v1 = vpop.f32.mrb[90].mxu0 }
0x1143   : > { %v12458_v39 = vpop.f32.mrb[91].mxu0 }
0x1144   : > { %5675 = vst [vmem:[#allocation3 + $0x1c] sm:$0xf] %v5674_v21 }
0x114b   : > { %v10211_v29 = vld [vmem:[#allocation3 + $0x18] sm:$0xff]  }
0x114c   : > { %5951 = vmatmul.mubr.bf16.gmra.mrb[92].mxu0 %v10211_v29  ;;  %9643 = vmatmul.mubr.bf16.gmra.mrb[76].mxu1 %v10211_v29 }
0x114d   : > { %6252 = vmatprep.mubr.bf16.mxu0 %v12919_v17  ;;  %9662 = vmatprep.mubr.msk.bf16.mxu1 %vm10757_vm0, %v12918_v33 }
0x1154   : > { %6253 = vmatmul.mubr.bf16.vlgmr.msra.gmra.mrb[96].mxu0 %v12919_v17  ;;  %9663 = vmatmul.mubr.bf16.vlgmr.msra.gmra.mrb[80].mxu1 %v12919_v17 }
0x1155   : > { %6488 = vmatpush1.bf16.msra.mxu0 %v12363_v47  ;;  %6519 = vmatprep.mubr.bf16.mxu0 %v12919_v17 }
0x1156   : > { %6489 = vmatprep.subr.bf16.mxu0 %v12367_v32  ;;  %9682 = vmatprep.mubr.msk.bf16.mxu1 %vm10757_vm0, %v12918_v33 }
0x1157   : > { %9667 = vmatpush3.bf16.msra.mxu1 %v10223_v40 }
0x1158   : > { %9668 = vmatprep.subr.bf16.mxu1 %v12918_v33 }
0x1159   : > { %6490 = vmatpush1.bf16.msra.mxu0 %v12369_v3 }
0x115a   : > { %6491 = vmatprep.subr.bf16.mxu0 %v12373_v35 }
0x115b   : > { %9669 = vmatpush3.bf16.msra.mxu1 %v10224_v63 }
0x115c   : > { %9670 = vmatprep.subr.bf16.mxu1 %v12918_v33 }
0x115d   : > { %6492 = vmatpush1.bf16.msra.mxu0 %v12375_v25 }
0x115e   : > { %6493 = vmatprep.subr.bf16.mxu0 %v12379_v20 }
0x115f   : > { %9671 = vmatpush3.bf16.msra.mxu1 %v10225_v15 }
0x1160   : > { %9672 = vmatprep.subr.bf16.mxu1 %v12918_v33 }
0x1161   : > { %6494 = vmatpush1.bf16.msra.mxu0 %v12381_v28 }
0x1162   : > { %6495 = vmatprep.subr.bf16.mxu0 %v12387_v62 }
0x1163   : > { %9673 = vmatpush3.bf16.msra.mxu1 %v10226_v44 }
0x1164   : > { %9674 = vmatprep.subr.bf16.mxu1 %v12918_v33 }
0x1165   : > { %6496 = vmatpush1.bf16.msra.mxu0 %v12385_v52 }
0x1166   : > { %6497 = vmatprep.subr.bf16.mxu0 %v12389_v0 }
0x1167   : > { %9675 = vmatpush3.bf16.msra.mxu1 %v10227_v58 }
0x1168   : > { %9676 = vmatprep.subr.bf16.mxu1 %v12918_v33 }
0x1169   : > { %6498 = vmatpush1.bf16.msra.mxu0 %v12393_v53 }
0x116a   : > { %6499 = vmatprep.subr.bf16.mxu0 %v12396_v45 }
0x116b   : > { %9677 = vmatpush3.bf16.msra.mxu1 %v10228_v51 }
0x116c   : > { %9678 = vmatprep.subr.bf16.mxu1 %v12918_v33 }
0x116d   : > { %6500 = vmatpush1.bf16.msra.mxu0 %v12399_v34 }
0x116e   : > { %6501 = vmatprep.subr.bf16.mxu0 %v12402_v37 }
0x116f   : > { %9679 = vmatpush3.bf16.msra.mxu1 %v10229_v36 }
0x1170   : > { %9680 = vmatprep.subr.bf16.mxu1 %v12918_v33 }
0x1171   : > { %6502 = vmatpush1.bf16.msra.mxu0 %v12405_v50 }
0x1172   : > { %6754 = vmatprep.subr.bf16.mxu0 %v12361_v30 }
0x1173   : > { %9681 = vmatpush3.bf16.msra.mxu1 %v10230_v5 }
0x1174   : > { %9686 = vmatprep.subr.bf16.mxu1 %v12918_v33 }
0x121f   : > { %v12499_v46 = vpop.f32.mrb[92].mxu0  ;;  %v12501_v61 = vpop.f32.mrb[76].mxu1 }
0x1220   : > { %v12503_v7 = vpop.f32.mrb[93].mxu0  ;;  %v12505_v24 = vpop.f32.mrb[77].mxu1 }
0x1221   : > { %v12507_v57 = vpop.f32.mrb[94].mxu0  ;;  %v12509_v38 = vpop.f32.mrb[78].mxu1 }
0x1222   : > { %v12514_v19 = vpop.f32.mrb[95].mxu0  ;;  %v12516_v23 = vpop.f32.mrb[79].mxu1 }
0x1227   : > { %v6254_v22 = vpop.f32.mrb[96].mxu0  ;;  %v6295_v21 = vpop.f32.mrb[80].mxu1 }
0x1228   : > { %v6301_v29 = vadd.f32 %v6254_v22, %v5923_v55  ;;  %v6256_v40 = vpop.f32.mrb[97].mxu0  ;;  %v9664_v63 = vpop.f32.mrb[81].mxu1  ;;  %v6315_v8 = vadd.f32 %v12528_v2, %v6295_v21  ;;  %v10233_v21 = vld [vmem:[#allocation12 + $0x38] ss:$12 sps:$4 sm:$0xff]  }
0x1229   : > { %v6302_v11 = vadd.f32 %v6256_v40, %v5925_v10  ;;  %v6258_v15 = vpop.f32.mrb[98].mxu0  ;;  %v6298_v44 = vpop.f32.mrb[82].mxu1  ;;  %v5996_v10 = vadd.f32 %v12433_v59, %v12531_v6  ;;  %v10231_v59 = vld [vmem:[#allocation12 + $0x8] ss:$12 sps:$4 sm:$0xff]  }
0x122a   : > { %v8850_v58 = vmul.f32 -1.442695, %v6301_v29  ;;  %v6259_v51 = vpop.f32.mrb[99].mxu0  ;;  %v9665_v36 = vpop.f32.mrb[83].mxu1 }
0x122b   : > { %v8851_v13 = vmul.f32 -1.442695, %v6302_v11  ;;  %v10234_v51 = vld [vmem:[#allocation12 + $0x50] ss:$12 sps:$4 sm:$0xff]   ;;  %v10235_v36 = vld [vmem:[#allocation12 + $0x68] ss:$12 sps:$4 sm:$0xff]  }
0x122c   : > { %10463 = vpow2.f32 %v8850_v58 }
0x122d   : > { %10465 = vpow2.f32 %v8851_v13  ;;  %v10236_v13 = vld [vmem:[#allocation12 + $0x80] ss:$12 sps:$4 sm:$0xff]  }
0x1236   : > { %v10464_v5 = vpop.eup %10463 }
0x1237   : > { %v6309_v56 = vadd.f32 1.0, %v10464_v5  ;;  %v10466_v4 = vpop.eup %10465  ;;  %v10237_v5 = vld [vmem:[#allocation12 + $0x98] ss:$12 sps:$4 sm:$0xff]  }
0x1238   : > { %v6310_v29 = vadd.f32 1.0, %v10466_v4  ;;  %v5929_v4 = vadd.f32 %v12439_v9, %v12519_v48 }
0x1239   : > { %10467 = vrcp.f32 %v6309_v56  ;;  %v10238_v56 = vld [vmem:[#allocation12 + $0xb0] ss:$12 sps:$4 sm:$0xff]  }
0x1243   : > { %v10468_v55 = vpop.eup %10467 }
0x1244   : > { %v6316_v22 = vmul.f32 %v10468_v55, %v6315_v8  ;;  %v5927_v8 = vadd.f32 %v12435_v27, %v12512_v60 }
0x1246   : > { %v6317_v40 = vadd.f32 %v6316_v22, %v5996_v10 }
0x1248   : > { %10469 = vtanh.f32 %v6317_v40 }
0x1249   : > { %10471 = vrcp.f32 %v6310_v29 }
0x1252   : > { %v10470_v63 = vpop.eup %10469 }
0x1253   : > { %v6319_v11 = vsub.f32 0.0, %v10470_v63  ;;  %v10472_v15 = vpop.eup %10471 }
0x1255   : > { %v6320_v44 = vmul.f32 %v10472_v15, %v6319_v11 }
0x1257   : > { %v12536_v58 = vadd.f32 %v10470_v63, %v6320_v44 }
0x1259   : > { %v6322_v18 = vpack.c.bf16 %v12536_v58, %v12536_v58 }
0x125b   : > { %6323 = vst [vmem:[#allocation3] sm:$0xf] %v6322_v18  ;;  %6520 = vmatmul.mubr.bf16.vlgmr.msra.gmra.mrb[100].mxu0 %v6322_v18  ;;  %9683 = vmatmul.mubr.bf16.vlgmr.msra.gmra.mrb[84].mxu1 %v6322_v18 }
0x125c   : > { %6755 = vmatpush1.bf16.msra.mxu0 %v12363_v47  ;;  %6786 = vmatprep.mubr.bf16.mxu0 %v12919_v17 }
0x125d   : > { %6756 = vmatprep.subr.bf16.mxu0 %v12367_v32  ;;  %9702 = vmatprep.mubr.msk.bf16.mxu1 %vm10757_vm0, %v12918_v33 }
0x125e   : > { %9687 = vmatpush3.bf16.msra.mxu1 %v10231_v59 }
0x125f   : > { %9688 = vmatprep.subr.bf16.mxu1 %v12918_v33 }
0x1260   : > { %6757 = vmatpush1.bf16.msra.mxu0 %v12369_v3 }
0x1261   : > { %6758 = vmatprep.subr.bf16.mxu0 %v12373_v35 }
0x1262   : > { %9689 = vmatpush3.bf16.msra.mxu1 %v10232_v43 }
0x1263   : > { %9690 = vmatprep.subr.bf16.mxu1 %v12918_v33 }
0x1264   : > { %6759 = vmatpush1.bf16.msra.mxu0 %v12375_v25 }
0x1265   : > { %6760 = vmatprep.subr.bf16.mxu0 %v12379_v20 }
0x1266   : > { %9691 = vmatpush3.bf16.msra.mxu1 %v10233_v21 }
0x1267   : > { %9692 = vmatprep.subr.bf16.mxu1 %v12918_v33 }
0x1268   : > { %6761 = vmatpush1.bf16.msra.mxu0 %v12381_v28 }
0x1269   : > { %6762 = vmatprep.subr.bf16.mxu0 %v12387_v62 }
0x126a   : > { %9693 = vmatpush3.bf16.msra.mxu1 %v10234_v51 }
0x126b   : > { %9694 = vmatprep.subr.bf16.mxu1 %v12918_v33 }
0x126c   : > { %6763 = vmatpush1.bf16.msra.mxu0 %v12385_v52 }
0x126d   : > { %6764 = vmatprep.subr.bf16.mxu0 %v12389_v0 }
0x126e   : > { %9695 = vmatpush3.bf16.msra.mxu1 %v10235_v36 }
0x126f   : > { %9696 = vmatprep.subr.bf16.mxu1 %v12918_v33 }
0x1270   : > { %6765 = vmatpush1.bf16.msra.mxu0 %v12393_v53 }
0x1271   : > { %6766 = vmatprep.subr.bf16.mxu0 %v12396_v45 }
0x1272   : > { %9697 = vmatpush3.bf16.msra.mxu1 %v10236_v13  ;;  %v5999_v13 = vadd.f32 %v12441_v49, %v12531_v6  ;;  %v10239_v49 = vld [vmem:[#allocation12 + $0x8] ss:$12 sps:$4 sm:$0xff]  }
0x1273   : > { %9698 = vmatprep.subr.bf16.mxu1 %v12918_v33 }
0x1274   : > { %6767 = vmatpush1.bf16.msra.mxu0 %v12399_v34 }
0x1275   : > { %6768 = vmatprep.subr.bf16.mxu0 %v12402_v37 }
0x1276   : > { %9699 = vmatpush3.bf16.msra.mxu1 %v10237_v5 }
0x1277   : > { %9700 = vmatprep.subr.bf16.mxu1 %v12918_v33 }
0x1278   : > { %6769 = vmatpush1.bf16.msra.mxu0 %v12405_v50 }
0x1279   : > { %7021 = vmatprep.subr.bf16.mxu0 %v12361_v30 }
0x127a   : > { %9701 = vmatpush3.bf16.msra.mxu1 %v10238_v56 }
0x127b   : > { %9706 = vmatprep.subr.bf16.mxu1 %v12918_v33 }
0x132e   : > { %v6521_v55 = vpop.f32.mrb[100].mxu0  ;;  %v6562_v10 = vpop.f32.mrb[84].mxu1 }
0x132f   : > { %v6568_v22 = vadd.f32 %v6521_v55, %v5927_v8  ;;  %v6523_v29 = vpop.f32.mrb[101].mxu0  ;;  %v9684_v40 = vpop.f32.mrb[85].mxu1  ;;  %v6582_v9 = vadd.f32 %v12528_v2, %v6562_v10 }
0x1330   : > { %v6569_v63 = vadd.f32 %v6523_v29, %v5929_v4  ;;  %v6525_v11 = vpop.f32.mrb[102].mxu0  ;;  %v6565_v15 = vpop.f32.mrb[86].mxu1 }
0x1331   : > { %v8876_v44 = vmul.f32 -1.442695, %v6568_v22  ;;  %v6526_v18 = vpop.f32.mrb[103].mxu0  ;;  %v9685_v59 = vpop.f32.mrb[87].mxu1 }
0x1332   : > { %v8877_v43 = vmul.f32 -1.442695, %v6569_v63 }
0x1333   : > { %10473 = vpow2.f32 %v8876_v44 }
0x1334   : > { %10475 = vpow2.f32 %v8877_v43 }
0x133d   : > { %v10474_v21 = vpop.eup %10473 }
0x133e   : > { %v6576_v51 = vadd.f32 1.0, %v10474_v21  ;;  %v10476_v27 = vpop.eup %10475 }
0x133f   : > { %v6577_v8 = vadd.f32 1.0, %v10476_v27 }
0x1340   : > { %10477 = vrcp.f32 %v6576_v51 }
0x134a   : > { %v10478_v36 = vpop.eup %10477 }
0x134b   : > { %v6583_v5 = vmul.f32 %v10478_v36, %v6582_v9 }
0x134d   : > { %v6584_v56 = vadd.f32 %v6583_v5, %v5999_v13 }
0x134f   : > { %10479 = vtanh.f32 %v6584_v56  ;;  %v6004_v56 = vadd.f32 %v12429_v14, %v12531_v6  ;;  %v10247_v14 = vld [vmem:[#allocation12 + $0x8] ss:$12 sps:$4 sm:$0xff]  }
0x1350   : > { %10481 = vrcp.f32 %v6577_v8 }
0x1359   : > { %v10480_v4 = vpop.eup %10479 }
0x135a   : > { %v6586_v55 = vsub.f32 %v12536_v58, %v10480_v4  ;;  %v10482_v22 = vpop.eup %10481 }
0x135c   : > { %v6587_v29 = vmul.f32 %v10482_v22, %v6586_v55 }
0x135e   : > { %v12575_v40 = vadd.f32 %v10480_v4, %v6587_v29 }
0x1360   : > { %v6589_v63 = vpack.c.bf16 %v12575_v40, %v12575_v40 }
0x1362   : > { %6590 = vst [vmem:[#allocation3 + $0x4] sm:$0xf] %v6589_v63  ;;  %6787 = vmatmul.mubr.bf16.vlgmr.msra.gmra.mrb[104].mxu0 %v6589_v63  ;;  %9703 = vmatmul.mubr.bf16.vlgmr.msra.gmra.mrb[88].mxu1 %v6589_v63 }
0x1363   : > { %7022 = vmatpush1.bf16.msra.mxu0 %v12363_v47  ;;  %7053 = vmatprep.mubr.bf16.mxu0 %v12919_v17 }
0x1364   : > { %7023 = vmatprep.subr.bf16.mxu0 %v12367_v32  ;;  %9722 = vmatprep.mubr.msk.bf16.mxu1 %vm10757_vm0, %v12918_v33 }
0x1365   : > { %9707 = vmatpush3.bf16.msra.mxu1 %v10239_v49 }
0x1366   : > { %9708 = vmatprep.subr.bf16.mxu1 %v12918_v33 }
0x1367   : > { %7024 = vmatpush1.bf16.msra.mxu0 %v12369_v3 }
0x1368   : > { %7025 = vmatprep.subr.bf16.mxu0 %v12373_v35 }
0x136b   : > { %7026 = vmatpush1.bf16.msra.mxu0 %v12375_v25 }
0x136c   : > { %7027 = vmatprep.subr.bf16.mxu0 %v12379_v20 }
0x136f   : > { %7028 = vmatpush1.bf16.msra.mxu0 %v12381_v28 }
0x1370   : > { %7029 = vmatprep.subr.bf16.mxu0 %v12387_v62  ;;  %v10240_v62 = vld [vmem:[#allocation12 + $0x20] ss:$12 sps:$4 sm:$0xff]  }
0x1371   : > { %9709 = vmatpush3.bf16.msra.mxu1 %v10240_v62 }
0x1372   : > { %9710 = vmatprep.subr.bf16.mxu1 %v12918_v33 }
0x1373   : > { %7030 = vmatpush1.bf16.msra.mxu0 %v12385_v52  ;;  %v10241_v52 = vld [vmem:[#allocation12 + $0x38] ss:$12 sps:$4 sm:$0xff]  }
0x1374   : > { %7031 = vmatprep.subr.bf16.mxu0 %v12389_v0  ;;  %v10242_v0 = vld [vmem:[#allocation12 + $0x50] ss:$12 sps:$4 sm:$0xff]  }
0x1375   : > { %9711 = vmatpush3.bf16.msra.mxu1 %v10241_v52 }
0x1376   : > { %9712 = vmatprep.subr.bf16.mxu1 %v12918_v33 }
0x1377   : > { %7032 = vmatpush1.bf16.msra.mxu0 %v12393_v53  ;;  %v10243_v53 = vld [vmem:[#allocation12 + $0x68] ss:$12 sps:$4 sm:$0xff]  }
0x1378   : > { %7033 = vmatprep.subr.bf16.mxu0 %v12396_v45  ;;  %v10244_v45 = vld [vmem:[#allocation12 + $0x80] ss:$12 sps:$4 sm:$0xff]  }
0x1379   : > { %9713 = vmatpush3.bf16.msra.mxu1 %v10242_v0  ;;  %v12643_v0 = vld [vmem:[#allocation12 + $0x94] ss:$12 sps:$4 sm:$0xff]  }
0x137a   : > { %9714 = vmatprep.subr.bf16.mxu1 %v12918_v33 }
0x137b   : > { %7034 = vmatpush1.bf16.msra.mxu0 %v12399_v34  ;;  %v10246_v34 = vld [vmem:[#allocation12 + $0xb0] ss:$12 sps:$4 sm:$0xff]  }
0x137c   : > { %7035 = vmatprep.subr.bf16.mxu0 %v12402_v37  ;;  %v5933_v37 = vadd.f32 %v12443_v41, %v12512_v60 }
0x137d   : > { %9715 = vmatpush3.bf16.msra.mxu1 %v10243_v53  ;;  %v10258_v53 = vld [vmem:[#allocation12 + $0x80] ss:$12 sps:$4 sm:$0xff]  }
0x137e   : > { %9716 = vmatprep.subr.bf16.mxu1 %v12918_v33 }
0x137f   : > { %7036 = vmatpush1.bf16.msra.mxu0 %v12405_v50  ;;  %v5935_v50 = vadd.f32 %v12445_v26, %v12519_v48 }
0x1380   : > { %7288 = vmatprep.subr.bf16.mxu0 %v12361_v30  ;;  %v10245_v30 = vld [vmem:[#allocation12 + $0x98] ss:$12 sps:$4 sm:$0xff]  }
0x1381   : > { %9717 = vmatpush3.bf16.msra.mxu1 %v10244_v45  ;;  %v12647_v45 = vld [vmem:[#allocation12 + $0x90] ss:$12 sps:$4 sm:$0xff]  }
0x1382   : > { %9718 = vmatprep.subr.bf16.mxu1 %v12918_v33 }
0x1385   : > { %9719 = vmatpush3.bf16.msra.mxu1 %v10245_v30  ;;  %v12650_v30 = vld [vmem:[#allocation12 + $0xac] ss:$12 sps:$4 sm:$0xff]  }
0x1386   : > { %9720 = vmatprep.subr.bf16.mxu1 %v12918_v33 }
0x1389   : > { %9721 = vmatpush3.bf16.msra.mxu1 %v10246_v34  ;;  %v10262_v34 = vld [vmem:[#allocation12 + $0x98] ss:$12 sps:$4 sm:$0xff]  }
0x138a   : > { %9726 = vmatprep.subr.bf16.mxu1 %v12918_v33 }
0x1435   : > { %v6788_v58 = vpop.f32.mrb[104].mxu0  ;;  %v6829_v10 = vpop.f32.mrb[88].mxu1 }
0x1436   : > { %v6835_v11 = vadd.f32 %v6788_v58, %v5933_v37  ;;  %v6790_v15 = vpop.f32.mrb[105].mxu0  ;;  %v9704_v44 = vpop.f32.mrb[89].mxu1  ;;  %v6849_v26 = vadd.f32 %v12528_v2, %v6829_v10  ;;  %v12654_v37 = vld [vmem:[#allocation12 + $0xa8] ss:$12 sps:$4 sm:$0xff]   ;;  %v5937_v58 = vadd.f32 %v12447_v42, %v12512_v60  ;;  %v5939_v10 = vadd.f32 %v12449_v31, %v12519_v48 }
0x1437   : > { %v6836_v18 = vadd.f32 %v6790_v15, %v5935_v50  ;;  %v6792_v59 = vpop.f32.mrb[106].mxu0  ;;  %v6832_v43 = vpop.f32.mrb[90].mxu1  ;;  %v10266_v50 = vld [vmem:[#allocation12 + $0xb0] ss:$12 sps:$4 sm:$0xff]  }
0x1438   : > { %v8902_v21 = vmul.f32 -1.442695, %v6835_v11  ;;  %v6793_v51 = vpop.f32.mrb[107].mxu0  ;;  %v9705_v27 = vpop.f32.mrb[91].mxu1 }
0x1439   : > { %v8903_v9 = vmul.f32 -1.442695, %v6836_v18 }
0x143a   : > { %10483 = vpow2.f32 %v8902_v21 }
0x143b   : > { %10485 = vpow2.f32 %v8903_v9 }
0x1444   : > { %v10484_v36 = vpop.eup %10483 }
0x1445   : > { %v6843_v13 = vadd.f32 1.0, %v10484_v36  ;;  %v10486_v41 = vpop.eup %10485 }
0x1446   : > { %v6844_v55 = vadd.f32 1.0, %v10486_v41 }
0x1447   : > { %10487 = vrcp.f32 %v6843_v13 }
0x1451   : > { %v10488_v5 = vpop.eup %10487 }
0x1452   : > { %v6850_v8 = vmul.f32 %v10488_v5, %v6849_v26 }
0x1454   : > { %v6851_v4 = vadd.f32 %v6850_v8, %v6004_v56  ;;  %v6007_v56 = vadd.f32 %v12437_v16, %v12531_v6  ;;  %v12675_v16 = vld [vmem:[#allocation12 + $0x4] ss:$12 sps:$4 sm:$0xff]  }
0x1456   : > { %10489 = vtanh.f32 %v6851_v4 }
0x1457   : > { %10491 = vrcp.f32 %v6844_v55 }
0x1460   : > { %v10490_v22 = vpop.eup %10489 }
0x1461   : > { %v6853_v29 = vsub.f32 %v12575_v40, %v10490_v22  ;;  %v10492_v63 = vpop.eup %10491  ;;  %v12640_v40 = vld [vmem:[#allocation12 + $0x78] ss:$12 sps:$4 sm:$0xff]  }
0x1463   : > { %v6854_v49 = vmul.f32 %v10492_v63, %v6853_v29 }
0x1465   : > { %v12614_v62 = vadd.f32 %v10490_v22, %v6854_v49 }
0x1467   : > { %v6856_v52 = vpack.c.bf16 %v12614_v62, %v12614_v62 }
0x1469   : > { %6857 = vst [vmem:[#allocation3 + $0x8] sm:$0xf] %v6856_v52  ;;  %7054 = vmatmul.mubr.bf16.vlgmr.msra.gmra.mrb[108].mxu0 %v6856_v52  ;;  %9723 = vmatmul.mubr.bf16.vlgmr.msra.gmra.mrb[92].mxu1 %v6856_v52 }
0x146a   : > { %7289 = vmatpush1.bf16.msra.mxu0 %v12363_v47  ;;  %7320 = vmatprep.mubr.bf16.mxu0 %v12919_v17  ;;  %v10248_v47 = vld [vmem:[#allocation12 + $0x20] ss:$12 sps:$4 sm:$0xff]  }
0x146b   : > { %7290 = vmatprep.subr.bf16.mxu0 %v12367_v32  ;;  %9742 = vmatprep.mubr.msk.bf16.mxu1 %vm10757_vm0, %v12918_v33  ;;  %v10249_v32 = vld [vmem:[#allocation12 + $0x38] ss:$12 sps:$4 sm:$0xff]  }
0x146c   : > { %9727 = vmatpush3.bf16.msra.mxu1 %v10247_v14 }
0x146d   : > { %9728 = vmatprep.subr.bf16.mxu1 %v12918_v33 }
0x146e   : > { %7291 = vmatpush1.bf16.msra.mxu0 %v12369_v3  ;;  %v10250_v3 = vld [vmem:[#allocation12 + $0x50] ss:$12 sps:$4 sm:$0xff]  }
0x146f   : > { %7292 = vmatprep.subr.bf16.mxu0 %v12373_v35  ;;  %v12631_v35 = vld [vmem:[#allocation12 + $0x60] ss:$12 sps:$4 sm:$0xff]  }
0x1470   : > { %9729 = vmatpush3.bf16.msra.mxu1 %v10248_v47  ;;  %v12677_v47 = vld [vmem:[#allocation12] ss:$12 sps:$4 sm:$0xff]  }
0x1471   : > { %9730 = vmatprep.subr.bf16.mxu1 %v12918_v33 }
0x1472   : > { %7293 = vmatpush1.bf16.msra.mxu0 %v12375_v25  ;;  %v12633_v25 = vld [vmem:[#allocation12 + $0x64] ss:$12 sps:$4 sm:$0xff]  }
0x1473   : > { %7294 = vmatprep.subr.bf16.mxu0 %v12379_v20  ;;  %v10254_v20 = vld [vmem:[#allocation12 + $0x68] ss:$12 sps:$4 sm:$0xff]  }
0x1474   : > { %9731 = vmatpush3.bf16.msra.mxu1 %v10249_v32  ;;  %v12681_v32 = vld [vmem:[#allocation12 + $0x1c] ss:$12 sps:$4 sm:$0xff]  }
0x1475   : > { %9732 = vmatprep.subr.bf16.mxu1 %v12918_v33 }
0x1476   : > { %7295 = vmatpush1.bf16.msra.mxu0 %v12381_v28  ;;  %v12635_v28 = vld [vmem:[#allocation12 + $0x7c] ss:$12 sps:$4 sm:$0xff]  }
0x1477   : > { %7296 = vmatprep.subr.bf16.mxu0 %v12633_v25 }
0x1478   : > { %9733 = vmatpush3.bf16.msra.mxu1 %v10250_v3  ;;  %v12684_v3 = vld [vmem:[#allocation12 + $0x18] ss:$12 sps:$4 sm:$0xff]  }
0x1479   : > { %9734 = vmatprep.subr.bf16.mxu1 %v12918_v33 }
0x147a   : > { %7297 = vmatpush1.bf16.msra.mxu0 %v12631_v35 }
0x147b   : > { %7298 = vmatprep.subr.bf16.mxu0 %v12635_v28 }
0x147c   : > { %9735 = vmatpush3.bf16.msra.mxu1 %v10254_v20  ;;  %v10274_v20 = vld [vmem:[#allocation12 + $0x20] ss:$12 sps:$4 sm:$0xff]  }
0x147d   : > { %9736 = vmatprep.subr.bf16.mxu1 %v12918_v33 }
0x147e   : > { %7299 = vmatpush1.bf16.msra.mxu0 %v12640_v40 }
0x147f   : > { %7300 = vmatprep.subr.bf16.mxu0 %v12643_v0 }
0x1480   : > { %9737 = vmatpush3.bf16.msra.mxu1 %v10258_v53  ;;  %v12688_v53 = vld [vmem:[#allocation12 + $0x34] ss:$12 sps:$4 sm:$0xff]  }
0x1481   : > { %9738 = vmatprep.subr.bf16.mxu1 %v12918_v33 }
0x1482   : > { %7301 = vmatpush1.bf16.msra.mxu0 %v12647_v45 }
0x1483   : > { %7302 = vmatprep.subr.bf16.mxu0 %v12650_v30 }
0x1484   : > { %9739 = vmatpush3.bf16.msra.mxu1 %v10262_v34  ;;  %v12691_v34 = vld [vmem:[#allocation12 + $0x30] ss:$12 sps:$4 sm:$0xff]  }
0x1485   : > { %9740 = vmatprep.subr.bf16.mxu1 %v12918_v33 }
0x1486   : > { %7303 = vmatpush1.bf16.msra.mxu0 %v12654_v37 }
0x1487   : > { %7555 = vmatprep.subr.bf16.mxu0 %v12675_v16 }
0x1488   : > { %9741 = vmatpush3.bf16.msra.mxu1 %v10266_v50  ;;  %v10278_v50 = vld [vmem:[#allocation12 + $0x38] ss:$12 sps:$4 sm:$0xff]  }
0x1489   : > { %9746 = vmatprep.subr.bf16.mxu1 %v12918_v33 }
0x153c   : > { %v7055_v11 = vpop.f32.mrb[108].mxu0  ;;  %v7096_v15 = vpop.f32.mrb[92].mxu1 }
0x153d   : > { %v7102_v44 = vadd.f32 %v7055_v11, %v5937_v58  ;;  %v7057_v18 = vpop.f32.mrb[109].mxu0  ;;  %v9724_v59 = vpop.f32.mrb[93].mxu1  ;;  %v7116_v31 = vadd.f32 %v12528_v2, %v7096_v15  ;;  %v12695_v58 = vld [vmem:[#allocation12 + $0x4c] ss:$12 sps:$4 sm:$0xff]   ;;  %v10282_v11 = vld [vmem:[#allocation12 + $0x50] ss:$12 sps:$4 sm:$0xff]  }
0x153e   : > { %v7103_v43 = vadd.f32 %v7057_v18, %v5939_v10  ;;  %v7059_v21 = vpop.f32.mrb[110].mxu0  ;;  %v7099_v51 = vpop.f32.mrb[94].mxu1  ;;  %v12698_v10 = vld [vmem:[#allocation12 + $0x48] ss:$12 sps:$4 sm:$0xff]   ;;  %v10285_v18 = vld [vmem:[#allocation12 + $0x98] ss:$12 sps:$4 sm:$0xff]  }
0x153f   : > { %v8928_v27 = vmul.f32 -1.442695, %v7102_v44  ;;  %v7060_v9 = vpop.f32.mrb[111].mxu0  ;;  %v9725_v36 = vpop.f32.mrb[95].mxu1  ;;  %v10283_v15 = vld [vmem:[#allocation12 + $0x68] ss:$12 sps:$4 sm:$0xff]   ;;  %v5945_v21 = vadd.f32 %v12454_v12, %v12519_v48 }
0x1540   : > { %v8929_v13 = vmul.f32 -1.442695, %v7103_v43  ;;  %v10284_v44 = vld [vmem:[#allocation12 + $0x80] ss:$12 sps:$4 sm:$0xff]   ;;  %v10286_v59 = vld [vmem:[#allocation12 + $0xb0] ss:$12 sps:$4 sm:$0xff]   ;;  %v5943_v43 = vadd.f32 %v12452_v54, %v12512_v60 }
0x1541   : > { %10493 = vpow2.f32 %v8928_v27 }
0x1542   : > { %10495 = vpow2.f32 %v8929_v13 }
0x154b   : > { %v10494_v41 = vpop.eup %10493 }
0x154c   : > { %v7110_v26 = vadd.f32 1.0, %v10494_v41  ;;  %v10496_v42 = vpop.eup %10495 }
0x154d   : > { %v7111_v55 = vadd.f32 1.0, %v10496_v42 }
0x154e   : > { %10497 = vrcp.f32 %v7110_v26 }
0x1558   : > { %v10498_v5 = vpop.eup %10497 }
0x1559   : > { %v7117_v8 = vmul.f32 %v10498_v5, %v7116_v31 }
0x155b   : > { %v7118_v4 = vadd.f32 %v7117_v8, %v6007_v56 }
0x155d   : > { %10499 = vtanh.f32 %v7118_v4 }
0x155e   : > { %10501 = vrcp.f32 %v7111_v55 }
0x1567   : > { %v10500_v22 = vpop.eup %10499 }
0x1568   : > { %v7120_v29 = vsub.f32 %v12614_v62, %v10500_v22  ;;  %v10502_v63 = vpop.eup %10501  ;;  %v10270_v62 = vld [vmem:[#allocation12 + $0x8] ss:$12 sps:$4 sm:$0xff]  }
0x156a   : > { %v7121_v49 = vmul.f32 %v10502_v63, %v7120_v29  ;;  %v6012_v29 = vadd.f32 %v12505_v24, %v12531_v6  ;;  %v10287_v24 = vld [vmem:[#allocation12 + $0x8] ss:$12 sps:$4 sm:$0xff]  }
0x156c   : > { %v12668_v52 = vadd.f32 %v10500_v22, %v7121_v49 }
0x156e   : > { %v7123_v14 = vpack.c.bf16 %v12668_v52, %v12668_v52 }
0x1570   : > { %7124 = vst [vmem:[#allocation3 + $0xc] sm:$0xf] %v7123_v14  ;;  %7321 = vmatmul.mubr.bf16.vlgmr.msra.gmra.mrb[112].mxu0 %v7123_v14  ;;  %9743 = vmatmul.mubr.bf16.vlgmr.msra.gmra.mrb[96].mxu1 %v7123_v14 }
0x1571   : > { %7587 = vmatprep.mubr.bf16.mxu0 %v12919_v17  ;;  %9762 = vmatprep.mubr.msk.bf16.mxu1 %vm10757_vm0, %v12918_v33 }
0x1572   : > { %7556 = vmatpush1.bf16.msra.mxu0 %v12677_v47  ;;  %9747 = vmatpush3.bf16.msra.mxu1 %v10270_v62 }
0x1573   : > { %9748 = vmatprep.subr.bf16.mxu1 %v12918_v33  ;;  %7557 = vmatprep.subr.bf16.mxu0 %v12681_v32 }
0x1576   : > { %7558 = vmatpush1.bf16.msra.mxu0 %v12684_v3  ;;  %9749 = vmatpush3.bf16.msra.mxu1 %v10274_v20 }
0x1577   : > { %9750 = vmatprep.subr.bf16.mxu1 %v12918_v33  ;;  %7559 = vmatprep.subr.bf16.mxu0 %v12688_v53 }
0x157a   : > { %7560 = vmatpush1.bf16.msra.mxu0 %v12691_v34  ;;  %9751 = vmatpush3.bf16.msra.mxu1 %v10278_v50 }
0x157b   : > { %9752 = vmatprep.subr.bf16.mxu1 %v12918_v33  ;;  %7561 = vmatprep.subr.bf16.mxu0 %v12695_v58 }
0x157e   : > { %7562 = vmatpush1.bf16.msra.mxu0 %v12698_v10  ;;  %9753 = vmatpush3.bf16.msra.mxu1 %v10282_v11 }
0x157f   : > { %7563 = vmatprep.subr.bf16.mxu0 %v12633_v25  ;;  %9754 = vmatprep.subr.bf16.mxu1 %v12918_v33 }
0x1582   : > { %7564 = vmatpush1.bf16.msra.mxu0 %v12631_v35  ;;  %9755 = vmatpush3.bf16.msra.mxu1 %v10283_v15 }
0x1583   : > { %7565 = vmatprep.subr.bf16.mxu0 %v12635_v28  ;;  %9756 = vmatprep.subr.bf16.mxu1 %v12918_v33 }
0x1586   : > { %7566 = vmatpush1.bf16.msra.mxu0 %v12640_v40  ;;  %9757 = vmatpush3.bf16.msra.mxu1 %v10284_v44 }
0x1587   : > { %7567 = vmatprep.subr.bf16.mxu0 %v12643_v0  ;;  %9758 = vmatprep.subr.bf16.mxu1 %v12918_v33 }
0x158a   : > { %7568 = vmatpush1.bf16.msra.mxu0 %v12647_v45  ;;  %9759 = vmatpush3.bf16.msra.mxu1 %v10285_v18  ;;  %v10289_v18 = vld [vmem:[#allocation12 + $0x38] ss:$12 sps:$4 sm:$0xff]  }
0x158b   : > { %7569 = vmatprep.subr.bf16.mxu0 %v12650_v30  ;;  %9760 = vmatprep.subr.bf16.mxu1 %v12918_v33 }
0x158e   : > { %7570 = vmatpush1.bf16.msra.mxu0 %v12654_v37  ;;  %9761 = vmatpush3.bf16.msra.mxu1 %v10286_v59  ;;  %v10290_v59 = vld [vmem:[#allocation12 + $0x50] ss:$12 sps:$4 sm:$0xff]  }
0x158f   : > { %7822 = vmatprep.subr.bf16.mxu0 %v12675_v16  ;;  %9766 = vmatprep.subr.bf16.mxu1 %v12918_v33 }
0x1643   : > { %v7322_v51 = vpop.f32.mrb[112].mxu0  ;;  %v7363_v27 = vpop.f32.mrb[96].mxu1 }
0x1644   : > { %v7369_v9 = vadd.f32 %v7322_v51, %v5943_v43  ;;  %v7324_v36 = vpop.f32.mrb[113].mxu0  ;;  %v9744_v13 = vpop.f32.mrb[97].mxu1  ;;  %v7383_v12 = vadd.f32 %v12528_v2, %v7363_v27  ;;  %v10291_v43 = vld [vmem:[#allocation12 + $0x68] ss:$12 sps:$4 sm:$0xff]   ;;  %v10294_v51 = vld [vmem:[#allocation12 + $0xb0] ss:$12 sps:$4 sm:$0xff]   ;;  %v5947_v27 = vadd.f32 %v12456_v1, %v12512_v60 }
0x1645   : > { %v7370_v41 = vadd.f32 %v7324_v36, %v5945_v21  ;;  %v7326_v26 = vpop.f32.mrb[114].mxu0  ;;  %v7366_v42 = vpop.f32.mrb[98].mxu1  ;;  %v10292_v21 = vld [vmem:[#allocation12 + $0x80] ss:$12 sps:$4 sm:$0xff]  }
0x1646   : > { %v8954_v31 = vmul.f32 -1.442695, %v7369_v9  ;;  %v7327_v5 = vpop.f32.mrb[115].mxu0  ;;  %v9745_v56 = vpop.f32.mrb[99].mxu1  ;;  %v5949_v9 = vadd.f32 %v12458_v39, %v12519_v48 }
0x1647   : > { %v8955_v8 = vmul.f32 -1.442695, %v7370_v41 }
0x1648   : > { %10503 = vpow2.f32 %v8954_v31 }
0x1649   : > { %10505 = vpow2.f32 %v8955_v8 }
0x1652   : > { %v10504_v4 = vpop.eup %10503 }
0x1653   : > { %v7377_v55 = vadd.f32 1.0, %v10504_v4  ;;  %v10506_v54 = vpop.eup %10505 }
0x1654   : > { %v7378_v14 = vadd.f32 1.0, %v10506_v54 }
0x1655   : > { %10507 = vrcp.f32 %v7377_v55 }
0x165f   : > { %v10508_v22 = vpop.eup %10507 }
0x1660   : > { %v7384_v63 = vmul.f32 %v10508_v22, %v7383_v12 }
0x1662   : > { %v7385_v49 = vadd.f32 %v7384_v63, %v6012_v29  ;;  %v6015_v63 = vadd.f32 %v12516_v23, %v12531_v6  ;;  %v10296_v23 = vld [vmem:[#allocation12 + $0x20] ss:$12 sps:$4 sm:$0xff]  }
0x1664   : > { %10509 = vtanh.f32 %v7385_v49 }
0x1665   : > { %10511 = vrcp.f32 %v7378_v14 }
0x166e   : > { %v10510_v62 = vpop.eup %10509 }
0x166f   : > { %v7387_v20 = vsub.f32 %v12668_v52, %v10510_v62  ;;  %v10512_v50 = vpop.eup %10511  ;;  %v10288_v52 = vld [vmem:[#allocation12 + $0x20] ss:$12 sps:$4 sm:$0xff]  }
0x1671   : > { %v7388_v11 = vmul.f32 %v10512_v50, %v7387_v20 }
0x1673   : > { %v12724_v15 = vadd.f32 %v10510_v62, %v7388_v11 }
0x1675   : > { %v7390_v44 = vpack.c.bf16 %v12724_v15, %v12724_v15 }
0x1677   : > { %7391 = vst [vmem:[#allocation3 + $0x10] sm:$0xf] %v7390_v44  ;;  %7588 = vmatmul.mubr.bf16.vlgmr.msra.gmra.mrb[116].mxu0 %v7390_v44  ;;  %9763 = vmatmul.mubr.bf16.vlgmr.msra.gmra.mrb[100].mxu1 %v7390_v44 }
0x1678   : > { %7823 = vmatpush1.bf16.msra.mxu0 %v12677_v47  ;;  %7854 = vmatprep.mubr.bf16.mxu0 %v12919_v17 }
0x1679   : > { %7824 = vmatprep.subr.bf16.mxu0 %v12681_v32  ;;  %9782 = vmatprep.mubr.msk.bf16.mxu1 %vm10757_vm0, %v12918_v33 }
0x167a   : > { %9767 = vmatpush3.bf16.msra.mxu1 %v10287_v24 }
0x167b   : > { %9768 = vmatprep.subr.bf16.mxu1 %v12918_v33 }
0x167c   : > { %7825 = vmatpush1.bf16.msra.mxu0 %v12684_v3 }
0x167d   : > { %7826 = vmatprep.subr.bf16.mxu0 %v12688_v53 }
0x167e   : > { %9769 = vmatpush3.bf16.msra.mxu1 %v10288_v52 }
0x167f   : > { %9770 = vmatprep.subr.bf16.mxu1 %v12918_v33 }
0x1680   : > { %7827 = vmatpush1.bf16.msra.mxu0 %v12691_v34 }
0x1681   : > { %7828 = vmatprep.subr.bf16.mxu0 %v12695_v58 }
0x1682   : > { %9771 = vmatpush3.bf16.msra.mxu1 %v10289_v18 }
0x1683   : > { %9772 = vmatprep.subr.bf16.mxu1 %v12918_v33 }
0x1684   : > { %7829 = vmatpush1.bf16.msra.mxu0 %v12698_v10 }
0x1685   : > { %7830 = vmatprep.subr.bf16.mxu0 %v12633_v25 }
0x1686   : > { %9773 = vmatpush3.bf16.msra.mxu1 %v10290_v59 }
0x1687   : > { %9774 = vmatprep.subr.bf16.mxu1 %v12918_v33 }
0x1688   : > { %7831 = vmatpush1.bf16.msra.mxu0 %v12631_v35 }
0x1689   : > { %7832 = vmatprep.subr.bf16.mxu0 %v12635_v28 }
0x168a   : > { %9775 = vmatpush3.bf16.msra.mxu1 %v10291_v43 }
0x168b   : > { %9776 = vmatprep.subr.bf16.mxu1 %v12918_v33 }
0x168c   : > { %7833 = vmatpush1.bf16.msra.mxu0 %v12640_v40 }
0x168d   : > { %7834 = vmatprep.subr.bf16.mxu0 %v12643_v0 }
0x168e   : > { %9777 = vmatpush3.bf16.msra.mxu1 %v10292_v21 }
0x168f   : > { %9778 = vmatprep.subr.bf16.mxu1 %v12918_v33 }
0x1690   : > { %7835 = vmatpush1.bf16.msra.mxu0 %v12647_v45 }
0x1691   : > { %7836 = vmatprep.subr.bf16.mxu0 %v12650_v30 }
0x1694   : > { %7837 = vmatpush1.bf16.msra.mxu0 %v12654_v37 }
0x1695   : > { %8089 = vmatprep.subr.bf16.mxu0 %v12675_v16  ;;  %v10293_v16 = vld [vmem:[#allocation12 + $0x98] ss:$12 sps:$4 sm:$0xff]  }
0x1696   : > { %9779 = vmatpush3.bf16.msra.mxu1 %v10293_v16 }
0x1697   : > { %9780 = vmatprep.subr.bf16.mxu1 %v12918_v33 }
0x169a   : > { %9781 = vmatpush3.bf16.msra.mxu1 %v10294_v51 }
0x169b   : > { %9786 = vmatprep.subr.bf16.mxu1 %v12918_v33 }
0x174a   : > { %v7589_v36 = vpop.f32.mrb[116].mxu0  ;;  %v7630_v13 = vpop.f32.mrb[100].mxu1 }
0x174b   : > { %v7636_v41 = vadd.f32 %v7589_v36, %v5947_v27  ;;  %v7591_v26 = vpop.f32.mrb[117].mxu0  ;;  %v9764_v42 = vpop.f32.mrb[101].mxu1  ;;  %v7650_v39 = vadd.f32 %v12528_v2, %v7630_v13  ;;  %v6020_v27 = vadd.f32 %v12501_v61, %v12531_v6  ;;  %v5959_v61 = vadd.f32 %v12514_v19, %v12519_v48 }
0x174c   : > { %v7637_v31 = vadd.f32 %v7591_v26, %v5949_v9  ;;  %v7593_v5 = vpop.f32.mrb[118].mxu0  ;;  %v7633_v56 = vpop.f32.mrb[102].mxu1 }
0x174d   : > { %v8980_v8 = vmul.f32 -1.442695, %v7636_v41  ;;  %v7594_v4 = vpop.f32.mrb[119].mxu0  ;;  %v9765_v55 = vpop.f32.mrb[103].mxu1 }
0x174e   : > { %v8981_v54 = vmul.f32 -1.442695, %v7637_v31 }
0x174f   : > { %10513 = vpow2.f32 %v8980_v8 }
0x1750   : > { %10515 = vpow2.f32 %v8981_v54 }
0x1759   : > { %v10514_v12 = vpop.eup %10513 }
0x175a   : > { %v7644_v22 = vadd.f32 1.0, %v10514_v12  ;;  %v10516_v1 = vpop.eup %10515 }
0x175b   : > { %v7645_v62 = vadd.f32 1.0, %v10516_v1 }
0x175c   : > { %10517 = vrcp.f32 %v7644_v22 }
0x1766   : > { %v10518_v29 = vpop.eup %10517 }
0x1767   : > { %v7651_v49 = vmul.f32 %v10518_v29, %v7650_v39 }
0x1769   : > { %v7652_v14 = vadd.f32 %v7651_v49, %v6015_v63 }
0x176b   : > { %10519 = vtanh.f32 %v7652_v14 }
0x176c   : > { %10521 = vrcp.f32 %v7645_v62 }
0x1775   : > { %v10520_v20 = vpop.eup %10519 }
0x1776   : > { %v7654_v50 = vsub.f32 %v12724_v15, %v10520_v20  ;;  %v10522_v11 = vpop.eup %10521 }
0x1778   : > { %v7655_v44 = vmul.f32 %v10522_v11, %v7654_v50  ;;  %v6023_v50 = vadd.f32 %v12509_v38, %v12531_v6 }
0x177a   : > { %v12763_v24 = vadd.f32 %v10520_v20, %v7655_v44 }
0x177c   : > { %v7657_v52 = vpack.c.bf16 %v12763_v24, %v12763_v24 }
0x177e   : > { %7658 = vst [vmem:[#allocation3 + $0x14] sm:$0xf] %v7657_v52  ;;  %7855 = vmatmul.mubr.bf16.vlgmr.msra.gmra.mrb[120].mxu0 %v7657_v52  ;;  %9783 = vmatmul.mubr.bf16.vlgmr.msra.gmra.mrb[104].mxu1 %v7657_v52 }
0x177f   : > { %8090 = vmatpush1.bf16.msra.mxu0 %v12677_v47  ;;  %8121 = vmatprep.mubr.bf16.mxu0 %v12919_v17  ;;  %v10295_v17 = vld [vmem:[#allocation12 + $0x8] ss:$12 sps:$4 sm:$0xff]  }
0x1780   : > { %8091 = vmatprep.subr.bf16.mxu0 %v12681_v32  ;;  %9802 = vmatprep.mubr.msk.bf16.mxu1 %vm10757_vm0, %v12918_v33 }
0x1781   : > { %9787 = vmatpush3.bf16.msra.mxu1 %v10295_v17 }
0x1782   : > { %9788 = vmatprep.subr.bf16.mxu1 %v12918_v33 }
0x1783   : > { %8092 = vmatpush1.bf16.msra.mxu0 %v12684_v3 }
0x1784   : > { %8093 = vmatprep.subr.bf16.mxu0 %v12688_v53 }
0x1785   : > { %9789 = vmatpush3.bf16.msra.mxu1 %v10296_v23 }
0x1786   : > { %9790 = vmatprep.subr.bf16.mxu1 %v12918_v33 }
0x1787   : > { %8094 = vmatpush1.bf16.msra.mxu0 %v12691_v34 }
0x1788   : > { %8095 = vmatprep.subr.bf16.mxu0 %v12695_v58 }
0x178b   : > { %8096 = vmatpush1.bf16.msra.mxu0 %v12698_v10 }
0x178c   : > { %8097 = vmatprep.subr.bf16.mxu0 %v12633_v25  ;;  %v10298_v25 = vld [vmem:[#allocation12 + $0x50] ss:$12 sps:$4 sm:$0xff]  }
0x178f   : > { %8098 = vmatpush1.bf16.msra.mxu0 %v12631_v35  ;;  %v10297_v35 = vld [vmem:[#allocation12 + $0x38] ss:$12 sps:$4 sm:$0xff]  }
0x1790   : > { %8099 = vmatprep.subr.bf16.mxu0 %v12635_v28  ;;  %9791 = vmatpush3.bf16.msra.mxu1 %v10297_v35  ;;  %v10299_v28 = vld [vmem:[#allocation12 + $0x68] ss:$12 sps:$4 sm:$0xff]  }
0x1791   : > { %9792 = vmatprep.subr.bf16.mxu1 %v12918_v33 }
0x1793   : > { %8100 = vmatpush1.bf16.msra.mxu0 %v12640_v40  ;;  %v10300_v40 = vld [vmem:[#allocation12 + $0x80] ss:$12 sps:$4 sm:$0xff]  }
0x1794   : > { %8101 = vmatprep.subr.bf16.mxu0 %v12643_v0  ;;  %9793 = vmatpush3.bf16.msra.mxu1 %v10298_v25  ;;  %v10301_v0 = vld [vmem:[#allocation12 + $0x98] ss:$12 sps:$4 sm:$0xff]  }
0x1795   : > { %9794 = vmatprep.subr.bf16.mxu1 %v12918_v33 }
0x1797   : > { %8102 = vmatpush1.bf16.msra.mxu0 %v12647_v45  ;;  %v10302_v45 = vld [vmem:[#allocation12 + $0xb0] ss:$12 sps:$4 sm:$0xff]  }
0x1798   : > { %8103 = vmatprep.subr.bf16.mxu0 %v12650_v30  ;;  %9795 = vmatpush3.bf16.msra.mxu1 %v10299_v28  ;;  %v5953_v30 = vadd.f32 %v12499_v46, %v12512_v60 }
0x1799   : > { %9796 = vmatprep.subr.bf16.mxu1 %v12918_v33 }
0x179b   : > { %8104 = vmatpush1.bf16.msra.mxu0 %v12654_v37  ;;  %v5955_v37 = vadd.f32 %v12503_v7, %v12519_v48 }
0x179c   : > { %9797 = vmatpush3.bf16.msra.mxu1 %v10300_v40 }
0x179d   : > { %9798 = vmatprep.subr.bf16.mxu1 %v12918_v33 }
0x17a0   : > { %9799 = vmatpush3.bf16.msra.mxu1 %v10301_v0 }
0x17a1   : > { %9800 = vmatprep.subr.bf16.mxu1 %v12918_v33 }
0x17a4   : > { %9801 = vmatpush3.bf16.msra.mxu1 %v10302_v45 }
0x1851   : > { %v7856_v47 = vpop.f32.mrb[120].mxu0  ;;  %v7897_v32 = vpop.f32.mrb[104].mxu1 }
0x1852   : > { %v7903_v3 = vadd.f32 %v7856_v47, %v5953_v30  ;;  %v7858_v53 = vpop.f32.mrb[121].mxu0  ;;  %v9784_v34 = vpop.f32.mrb[105].mxu1  ;;  %v7917_v7 = vadd.f32 %v12528_v2, %v7897_v32  ;;  %v5957_v2 = vadd.f32 %v12507_v57, %v12512_v60  ;;  %v10560_v60 = vld [vmem:[%s12921_s28 + $0x2] ss:$0 sm:$0xff] }
0x1853   : > { %v7904_v58 = vadd.f32 %v7858_v53, %v5955_v37  ;;  %v7860_v10 = vpop.f32.mrb[122].mxu0  ;;  %v7900_v15 = vpop.f32.mrb[106].mxu1 }
0x1854   : > { %v9006_v18 = vmul.f32 -1.442695, %v7903_v3  ;;  %v7861_v59 = vpop.f32.mrb[123].mxu0  ;;  %v9785_v43 = vpop.f32.mrb[107].mxu1 }
0x1855   : > { %v9007_v33 = vmul.f32 -1.442695, %v7904_v58 }
0x1856   : > { %10523 = vpow2.f32 %v9006_v18 }
0x1857   : > { %10525 = vpow2.f32 %v9007_v33 }
0x1860   : > { %v10524_v21 = vpop.eup %10523 }
0x1861   : > { %v7911_v16 = vadd.f32 1.0, %v10524_v21  ;;  %v10526_v46 = vpop.eup %10525 }
0x1862   : > { %v7912_v13 = vadd.f32 1.0, %v10526_v46 }
0x1863   : > { %10527 = vrcp.f32 %v7911_v16 }
0x186d   : > { %v10528_v51 = vpop.eup %10527 }
0x186e   : > { %v7918_v9 = vmul.f32 %v10528_v51, %v7917_v7 }
0x1870   : > { %v7919_v36 = vadd.f32 %v7918_v9, %v6020_v27 }
0x1872   : > { %10529 = vtanh.f32 %v7919_v36 }
0x1873   : > { %10531 = vrcp.f32 %v7912_v13 }
0x187c   : > { %v10530_v41 = vpop.eup %10529 }
0x187d   : > { %v7921_v26 = vsub.f32 %v12763_v24, %v10530_v41  ;;  %v10532_v42 = vpop.eup %10531 }
0x187f   : > { %v7922_v31 = vmul.f32 %v10532_v42, %v7921_v26 }
0x1881   : > { %v7923_v5 = vadd.f32 %v10530_v41, %v7922_v31 }
0x1883   : > { %v7924_v56 = vpack.c.bf16 %v7923_v5, %v7923_v5 }
0x1885   : > { %7925 = vst [vmem:[#allocation3 + $0x18] sm:$0xf] %v7924_v56  ;;  %8122 = vmatmul.mubr.bf16.vlgmr.msra.gmra.mrb[124].mxu0 %v7924_v56  ;;  %9803 = vmatmul.mubr.bf16.vlgmr.msra.gmra.mrb[108].mxu1 %v7924_v56 }
0x1958   : > { %v8123_v8 = vpop.f32.mrb[124].mxu0  ;;  %v8164_v4 = vpop.f32.mrb[108].mxu1 }
0x1959   : > { %v8170_v55 = vadd.f32 %v8123_v8, %v5957_v2  ;;  %v8125_v54 = vpop.f32.mrb[125].mxu0  ;;  %v9804_v12 = vpop.f32.mrb[109].mxu1  ;;  %v8184_v19 = vadd.f32 %v10560_v60, %v8164_v4 }
0x195a   : > { %v8171_v22 = vadd.f32 %v8125_v54, %v5959_v61  ;;  %v8127_v1 = vpop.f32.mrb[126].mxu0  ;;  %v8167_v39 = vpop.f32.mrb[110].mxu1 }
0x195b   : > { %v9032_v29 = vmul.f32 -1.442695, %v8170_v55  ;;  %v8128_v63 = vpop.f32.mrb[127].mxu0  ;;  %v9805_v49 = vpop.f32.mrb[111].mxu1 }
0x195c   : > { %v9033_v14 = vmul.f32 -1.442695, %v8171_v22 }
0x195d   : > { %10533 = vpow2.f32 %v9032_v29 }
0x195e   : > { %10535 = vpow2.f32 %v9033_v14 }
0x1967   : > { %v10534_v62 = vpop.eup %10533 }
0x1968   : > { %v8178_v20 = vadd.f32 1.0, %v10534_v62  ;;  %v10536_v57 = vpop.eup %10535 }
0x1969   : > { %v8179_v24 = vadd.f32 1.0, %v10536_v57 }
0x196a   : > { %10537 = vrcp.f32 %v8178_v20 }
0x1974   : > { %v10538_v48 = vpop.eup %10537 }
0x1975   : > { %v8185_v11 = vmul.f32 %v10538_v48, %v8184_v19 }
0x1977   : > { %v8186_v44 = vadd.f32 %v8185_v11, %v6023_v50 }
0x1979   : > { %10539 = vtanh.f32 %v8186_v44 }
0x197a   : > { %10541 = vrcp.f32 %v8179_v24 }
0x1983   : > { %v10540_v52 = vpop.eup %10539 }
0x1984   : > { %v8188_v17 = vsub.f32 %v7923_v5, %v10540_v52  ;;  %v10542_v23 = vpop.eup %10541 }
0x1986   : > { %v8189_v35 = vmul.f32 %v10542_v23, %v8188_v17 }
0x1988   : > { %v8190_v25 = vadd.f32 %v10540_v52, %v8189_v35 }
0x198a   : > { %v8191_v38 = vpack.c.bf16 %v8190_v25, %v8190_v25  ;;  %8193 = vst [vmem:[%s668_s14] sm:$0xff] %v8190_v25 }
0x198b   : > { %10686 = shalt.err (!%p10683_p11)
}
0x198c   : > { %s10687_s23 = scalar_lea.hbm %s12814_s21, 128  ;;  %s10691_s24 = scalar_lea.hbm %s12925_s19, 256 }
0x198d   : > { %p10688_p4 = scmp.ne.s32.totalorder %s12814_s21, %s10687_s23  ;;  %p10692_p9 = scmp.lt.u32.totalorder %s12814_s21, %s12925_s19 }
0x198e   : > { %p10693_p13 = scmp.lt.u32.totalorder %s10691_s24, %s10687_s23  ;;  %p10695_p6 = scmp.lt.u32.totalorder %s10687_s23, %s12814_s21 }
0x198f   : > { %p10689_p7 = pnand %p10688_p4, %p12926_p3 }
0x1990   : > { %p10694_p1 = por %p10693_p13, %p10692_p9 }
0x1991   : > { %p10690_p8 = pneg %p10689_p7 }
0x1992   : > { %p10696_p10 = por %p10695_p6, %p10694_p1 }
0x1994   : > { %p10697_p2 = pnand %p10696_p10, %p10690_p8 }
0x1996   : > { %10700 = shalt.err (!%p10697_p2)
}
0x1997   : > { %9822 = dma.vmem_to_hbm [thread:$0]  (%p12926_p3), %s12816_s9, 128, %s12814_s21, %s8195_s26   ;;  %8192 = vst [vmem:[#allocation3 + $0x1c] sm:$0xf] %v8191_v38 }
0x1998 PF: > { %s12927_s22 = sld [smem:[#allocation19_spill]]  ;;  %s12928_s29 = sld [smem:[#allocation23_spill]] }
0x199e   : > { %s8220_s8 = sand.u32 1, %s12927_s22   ;;  %p12929_p0 = scmp.ne.s32.totalorder %s12928_s29, 0 }
0x199f   : > { %s8221_s17 = scalar_lea.sflag [#allocation8], %s8220_s8 }
0x19a0   : > { %p9838_p12 = pnand %p8338_p5, %p12929_p0 }
0x19a2   : > { %10730 = dma.done.wait (!%p9838_p12), %s8221_s17, 128  }
0x19a3   : > { %10732 = vsyncadd (!%p9838_p12), %s8221_s17, 4294967168  ;;  %s12930_s16 = sld [smem:[#allocation20_spill]]  ;;  %s12931_s18 = sld [smem:[#allocation21_spill]] }
0x19a4   : > { %s12932_s29 = smov %s10739_s30  ;;  %s12933_s30 = smov %s10743_s15 }
0x19a9   : > { %p27_p11 = scmp.ge.s32.totalorder %s12930_s16, 4   ;;  %s12934_s15 = smov %s12931_s18 }
0x19ab   :  { %29 = sbr.rel (!%p27_p11) target bundleno = 13 (0xd), region = 231 }
0x19b2   :  { %8226 = vsyncpa [#allocation7], 1 }
0x19b3   :  { %8228 = vsyncpa [#allocation7 + $0x1], 1 }
0x19b4   :  { %8229 = vsyncpa [#allocation10], 1 }
0x19b5   :  { %8230 = vsyncpa [#allocation13], 1 }
0x19b6   :  { %8231 = vsyncpa [#allocation8], 1 }
0x19b7   :  { %8233 = vsyncpa [#allocation8 + $0x1], 1 }

</bundles_post_ra>
